<compile_context>
chip_gen: v7x
topology: tpu7x:2x2x1
jax: 0.10.0
libtpu: 0.0.40
codegen_flags: <defaults>
</compile_context>

<pallas_src>
from math import gcd

import jax
import jax.numpy as jnp
from jax.experimental import pallas as pl
from jax.experimental.pallas import tpu as pltpu


# --------------------------------------------------------------------------------------
# In-kernel building blocks (f32 norm math)
# --------------------------------------------------------------------------------------
def _group_norm(x, gamma, beta, m_pool, eps=1e-5):
    """GroupNorm on [rows, C] via a precomputed block-averaging matrix m_pool [C, C].

    mean = x @ m_pool ; E[x^2] = (x*x) @ m_pool  -> 2 matmuls per norm instead of 4.
    """
    mean = jnp.dot(x, m_pool, preferred_element_type=jnp.float32)
    sq = jnp.dot(x * x, m_pool, preferred_element_type=jnp.float32)
    var = jnp.maximum(sq - mean * mean, 0.0)      # guard tiny negative cancellation
    return (x - mean) * jax.lax.rsqrt(var + eps) * gamma + beta


def _layer_norm(x, gamma, beta, eps=1e-5):
    mean = jnp.mean(x, axis=-1, keepdims=True)
    var = jnp.mean((x - mean) ** 2, axis=-1, keepdims=True)
    return (x - mean) * jax.lax.rsqrt(var + eps) * gamma + beta


# --------------------------------------------------------------------------------------
# The Pallas kernel: one tile of edges per grid step
# --------------------------------------------------------------------------------------
def _relation_header_kernel(
    slab_ref,                                              # [T, 2h+pad] bf16 edge features
    w_atd_ref, gn_atd_g_ref, gn_atd_b_ref, m_pool2_ref,    # fused agenttype/dist branch
    w1xt_ref, w1da_ref, b1_ref, ln_g_ref, ln_b_ref,        # f_1e first layer + LN
    w2_ref, b2_ref,                                        # f_1e second layer
    l1w_ref, l1b_ref, gn1_g_ref, gn1_b_ref,                # LinearRes linear1 + GN
    l2w_ref, l2b_ref, gn2_g_ref, gn2_b_ref,                # LinearRes linear2 + GN
    wf_ref, bf_ref,                                        # final nn.Linear (lane-padded)
    m_pool_ref,                                            # [h, h] GN pooling matrix
    out_ref,                                               # [T, 128] lane-dense f32 out
):
    f32, bf16 = jnp.float32, jnp.bfloat16
    two_h = w1xt_ref.shape[0]                   # 2 * h_dim (lane-aligned slab split point)

    xt = slab_ref[:, :two_h]                    # bf16 [T, 2h]  = src_xt | dst_xt
    atd = slab_ref[:, two_h:]                   # bf16 [T, pad] = src_at | dst_at | dctr | 0

    m_pool = m_pool_ref[...]

    # Fused agenttype_enc / dist branch: one matmul -> [dist | at], one GN (block-diag pool).
    pre = jnp.dot(atd, w_atd_ref[...], preferred_element_type=f32)        # [T, 2h]
    merged = jnp.maximum(
        _group_norm(pre, gn_atd_g_ref[...], gn_atd_b_ref[...], m_pool2_ref[...]), 0.0)

    # f_1e MLP on cat([src_xt, dst_xt, dist, at]) as two K=2h bf16 matmuls.
    h1 = (jnp.dot(xt, w1xt_ref[...], preferred_element_type=f32)
          + jnp.dot(merged.astype(bf16), w1da_ref[...], preferred_element_type=f32)
          + b1_ref[...])
    h1 = jnp.maximum(_layer_norm(h1, ln_g_ref[...], ln_b_ref[...]), 0.0)
    h_1e = jnp.dot(h1.astype(bf16), w2_ref[...], preferred_element_type=f32) + b2_ref[...]

    # h_1e_out[0]: LinearRes(h, h)
    r = jnp.dot(h_1e.astype(bf16), l1w_ref[...], preferred_element_type=f32) + l1b_ref[...]
    r = jnp.maximum(_group_norm(r, gn1_g_ref[...], gn1_b_ref[...], m_pool), 0.0)
    r = jnp.dot(r.astype(bf16), l2w_ref[...], preferred_element_type=f32) + l2b_ref[...]
    r = _group_norm(r, gn2_g_ref[...], gn2_b_ref[...], m_pool)
    r = jnp.maximum(r + h_1e, 0.0)

    # h_1e_out[1]: nn.Linear(h, num_edge_types), output lanes padded to 128 (unmasked vst).
    out_ref[...] = (jnp.dot(r.astype(bf16), wf_ref[...], preferred_element_type=f32)
                    + bf_ref[...])


KERNEL_PARAM_ORDER = [
    "w_atd", "gn_atd_g", "gn_atd_b", "m_pool2",
    "w1xt", "w1da", "b1", "ln_g", "ln_b",
    "w2", "b2",
    "l1w", "l1b", "gn1_g", "gn1_b",
    "l2w", "l2b", "gn2_g", "gn2_b",
    "wf", "bf", "m_pool",
]


# --------------------------------------------------------------------------------------
# Wrapper: pack the edge slab, pick a tile, build BlockSpecs, call the kernel
# --------------------------------------------------------------------------------------
def fjmp_relation_header(edge_feats, kp, *, tile_e=512):
    """edge_feats = (src_at, dst_at, dctr, src_xt, dst_xt); kp = pack_params(...)."""
    src_at, dst_at, dctr, src_xt, dst_xt = edge_feats
    num_edges = src_at.shape[0]
    h = src_xt.shape[1]
    two_h = 2 * h
    atd_pad = kp["w_atd"].shape[0]
    slab_w = two_h + atd_pad
    net = kp["num_edge_types"]
    net_pad = kp["wf"].shape[1]                 # lane-padded output width (>= 128)

    # Big tiles amortize the ~0.35us per-step overhead; keep >= 2 grid steps when the
    # edge count allows so both v7x TensorCores get work via the "parallel" axis.
    tile = tile_e
    while tile > 128 and pl.cdiv(num_edges, tile) < 2:
        tile //= 2
    e_pad = pl.cdiv(num_edges, tile) * tile

    # One lane-dense bf16 slab: [src_xt | dst_xt | src_at | dst_at | dctr | zero pad].
    feat = jnp.concatenate([src_xt, dst_xt, src_at, dst_at, dctr],
                           axis=1).astype(jnp.bfloat16)
    slab = jnp.pad(feat, ((0, e_pad - num_edges), (0, slab_w - feat.shape[1])))

    weights = [kp[k] for k in KERNEL_PARAM_ORDER]

    out = pl.pallas_call(
        _relation_header_kernel,
        out_shape=jax.ShapeDtypeStruct((e_pad, net_pad), jnp.float32),
        grid=(e_pad // tile,),
        in_specs=([pl.BlockSpec((tile, slab_w), lambda i: (i, 0))]
                  + [pl.BlockSpec(w.shape, lambda i: (0, 0)) for w in weights]),
        out_specs=pl.BlockSpec((tile, net_pad), lambda i: (i, 0)),
        compiler_params=pltpu.CompilerParams(
            dimension_semantics=("parallel",),
            vmem_limit_bytes=32 * 1024 * 1024),
    )(slab, *weights)
    return out[:num_edges, :net]


# --------------------------------------------------------------------------------------
# Deterministic parameter init (matches FJMPRelationHeader.init_weights semantics)
# --------------------------------------------------------------------------------------
def init_params(key, num_agenttypes, h_dim, num_edge_types, hidden_unit=64, ng=32):
    G = gcd(ng, h_dim)
    gs = h_dim // G
    ks = jax.random.split(key, 7)

    def xavier(k, n_in, n_out):
        std = (2.0 / (n_in + n_out)) ** 0.5
        return std * jax.random.normal(k, (n_in, n_out), jnp.float32)

    ones = lambda n: jnp.ones((1, n), jnp.float32)
    zeros = lambda n: jnp.zeros((1, n), jnp.float32)
    bias01 = lambda n: jnp.full((1, n), 0.1, jnp.float32)

    # Block-averaging ("pooling") matrix: m_pool[c1, c2] = 1/gs if same group else 0.
    gid = jnp.arange(h_dim) // gs
    m_pool = (gid[:, None] == gid[None, :]).astype(jnp.float32) / float(gs)

    return dict(
        num_groups=G,
        wat=xavier(ks[0], 2 * num_agenttypes, h_dim),          # Linear(2*nat, h), no bias
        gat_g=ones(h_dim), gat_b=zeros(h_dim),
        wd=xavier(ks[1], 2, h_dim),                            # Linear(2, h), no bias
        gd_g=ones(h_dim), gd_b=zeros(h_dim),
        w1=xavier(ks[2], 4 * h_dim, hidden_unit), b1=bias01(hidden_unit),
        ln_g=ones(hidden_unit), ln_b=zeros(hidden_unit),
        w2=xavier(ks[3], hidden_unit, h_dim), b2=bias01(h_dim),
        l1w=xavier(ks[4], h_dim, h_dim), l1b=bias01(h_dim),
        gn1_g=ones(h_dim), gn1_b=zeros(h_dim),
        l2w=xavier(ks[5], h_dim, h_dim), l2b=bias01(h_dim),
        gn2_g=ones(h_dim), gn2_b=zeros(h_dim),
        wf=xavier(ks[6], h_dim, num_edge_types), bf=bias01(num_edge_types),
        m_pool=m_pool,
    )


# --------------------------------------------------------------------------------------
# Fuse / cast parameters into the layout the kernel expects
# --------------------------------------------------------------------------------------
def pack_params(p, num_agenttypes, h_dim, *, lane=128):
    h, nat = h_dim, num_agenttypes
    bf16 = jnp.bfloat16
    atd_in = 2 * nat + 2
    atd_pad = ((atd_in + lane - 1) // lane) * lane

    # Fused agenttype/dist weight. Slab lanes: [src_at | dst_at | dctr | 0]; output lanes:
    # [dist (h) | at (h)] so that [src_xt | dst_xt | dist | at] matches f_1e's concat order.
    w_atd = jnp.zeros((atd_pad, 2 * h), jnp.float32)
    w_atd = w_atd.at[0:nat, h:].set(p["wat"][:nat])
    w_atd = w_atd.at[nat:2 * nat, h:].set(p["wat"][nat:])
    w_atd = w_atd.at[2 * nat:atd_in, :h].set(p["wd"])

    z = jnp.zeros_like(p["m_pool"])
    m_pool2 = jnp.block([[p["m_pool"], z], [z, p["m_pool"]]])   # block-diag pool for [dist|at]

    # Final nn.Linear padded to >=128 output lanes -> unmasked lane-dense stores in-kernel.
    net = p["wf"].shape[1]
    net_pad = ((net + lane - 1) // lane) * lane
    wf_pad = jnp.zeros((h, net_pad), jnp.float32).at[:, :net].set(p["wf"])
    bf_pad = jnp.zeros((1, net_pad), jnp.float32).at[:, :net].set(p["bf"])

    return dict(
        w_atd=w_atd.astype(bf16),
        gn_atd_g=jnp.concatenate([p["gd_g"], p["gat_g"]], axis=1),
        gn_atd_b=jnp.concatenate([p["gd_b"], p["gat_b"]], axis=1),
        m_pool2=m_pool2,
        w1xt=p["w1"][:2 * h].astype(bf16),
        w1da=p["w1"][2 * h:].astype(bf16),
        b1=p["b1"], ln_g=p["ln_g"], ln_b=p["ln_b"],
        w2=p["w2"].astype(bf16), b2=p["b2"],
        l1w=p["l1w"].astype(bf16), l1b=p["l1b"], gn1_g=p["gn1_g"], gn1_b=p["gn1_b"],
        l2w=p["l2w"].astype(bf16), l2b=p["l2b"], gn2_g=p["gn2_g"], gn2_b=p["gn2_b"],
        wf=wf_pad.astype(bf16), bf=bf_pad,
        m_pool=p["m_pool"],
        num_edge_types=int(net),
    )


# --------------------------------------------------------------------------------------
# Pure-JAX reference: unfused structure, reshape-based GroupNorm, explicit concats.
# Mirrors the kernel's precision policy (bf16 matmul operands, f32 accumulate / norms)
# so the check isolates structural / fusion correctness rather than bf16 rounding.
# --------------------------------------------------------------------------------------
def _dot_bf16(x, w):
    return jnp.dot(x.astype(jnp.bfloat16), w.astype(jnp.bfloat16),
                   preferred_element_type=jnp.float32)


def _gn_ref(x, gamma, beta, num_groups, eps=1e-5):
    n, c = x.shape
    xg = x.reshape(n, num_groups, c // num_groups)
    mean = xg.mean(-1, keepdims=True)
    var = ((xg - mean) ** 2).mean(-1, keepdims=True)
    xg = (xg - mean) / jnp.sqrt(var + eps)
    return xg.reshape(n, c) * gamma + beta


def _ln_ref(x, gamma, beta, eps=1e-5):
    mean = x.mean(-1, keepdims=True)
    var = ((x - mean) ** 2).mean(-1, keepdims=True)
    return (x - mean) / jnp.sqrt(var + eps) * gamma + beta


def reference(edge_feats, p):
    src_at, dst_at, dctr, src_xt, dst_xt = edge_feats
    G = p["num_groups"]
    at = jnp.maximum(_gn_ref(_dot_bf16(jnp.concatenate([src_at, dst_at], 1), p["wat"]),
                             p["gat_g"], p["gat_b"], G), 0.0)
    dist = jnp.maximum(_gn_ref(_dot_bf16(dctr, p["wd"]), p["gd_g"], p["gd_b"], G), 0.0)
    h1 = _dot_bf16(jnp.concatenate([src_xt, dst_xt, dist, at], 1), p["w1"]) + p["b1"]
    h1 = jnp.maximum(_ln_ref(h1, p["ln_g"], p["ln_b"]), 0.0)
    h_1e = _dot_bf16(h1, p["w2"]) + p["b2"]
    r = jnp.maximum(_gn_ref(_dot_bf16(h_1e, p["l1w"]) + p["l1b"],
                            p["gn1_g"], p["gn1_b"], G), 0.0)
    r = _gn_ref(_dot_bf16(r, p["l2w"]) + p["l2b"], p["gn2_g"], p["gn2_b"], G)
    r = jnp.maximum(r + h_1e, 0.0)
    return _dot_bf16(r, p["wf"]) + p["bf"]


# --------------------------------------------------------------------------------------
if __name__ == "__main__":
    key = jax.random.PRNGKey(0)
    num_agenttypes, h_dim, num_edge_types = 2, 64, 3
    n_nodes, n_edges = 24, 200

    k_nodes, k_params, k_edges = jax.random.split(key, 3)
    ka, kc, kx = jax.random.split(k_nodes, 3)
    ksrc, kdst = jax.random.split(k_edges, 2)

    # node data (DGL graph ndata)
    agenttypes = jax.nn.one_hot(
        jax.random.randint(ka, (n_nodes,), 0, num_agenttypes),
        num_agenttypes, dtype=jnp.float32)
    ctrs = jax.random.normal(kc, (n_nodes, 2), jnp.float32)
    xt_enc = jax.random.normal(kx, (n_nodes, h_dim), jnp.float32)

    # edges
    src = jax.random.randint(ksrc, (n_edges,), 0, n_nodes)
    dst = jax.random.randint(kdst, (n_edges,), 0, n_nodes)

    params = init_params(k_params, num_agenttypes, h_dim, num_edge_types)
    kparams = pack_params(params, num_agenttypes, h_dim)

    # glue: DGL apply_edges gather (src/dst node feature lookup) + ctr difference
    # TODO(synk): the graph gather itself has no per-edge Pallas equivalent; it stays in XLA.
    edge_feats = (agenttypes[src], agenttypes[dst],
                  ctrs[dst] - ctrs[src],
                  xt_enc[src], xt_enc[dst])

    out = jax.block_until_ready(fjmp_relation_header(edge_feats, kparams))
    ref = reference(edge_feats, params)

    assert out.shape == (n_edges, num_edge_types)
    max_err = float(jnp.max(jnp.abs(out - ref)))
    if max_err < 5e-2:
        print("KERNEL_OK")
    else:
        print(f"MISMATCH max_err={max_err}")
</pallas_src>

<mosaic_0001>
module attributes {stable_mosaic.version = 11 : i64} {
  func.func @_relation_header_kernel(%arg0: i32, %arg1: memref<128x256xbf16, #tpu.memory_space<vmem>>, %arg2: memref<128x128xbf16, #tpu.memory_space<vmem>>, %arg3: memref<1x128xf32, #tpu.memory_space<vmem>>, %arg4: memref<1x128xf32, #tpu.memory_space<vmem>>, %arg5: memref<128x128xf32, #tpu.memory_space<vmem>>, %arg6: memref<128x64xbf16, #tpu.memory_space<vmem>>, %arg7: memref<128x64xbf16, #tpu.memory_space<vmem>>, %arg8: memref<1x64xf32, #tpu.memory_space<vmem>>, %arg9: memref<1x64xf32, #tpu.memory_space<vmem>>, %arg10: memref<1x64xf32, #tpu.memory_space<vmem>>, %arg11: memref<64x64xbf16, #tpu.memory_space<vmem>>, %arg12: memref<1x64xf32, #tpu.memory_space<vmem>>, %arg13: memref<64x64xbf16, #tpu.memory_space<vmem>>, %arg14: memref<1x64xf32, #tpu.memory_space<vmem>>, %arg15: memref<1x64xf32, #tpu.memory_space<vmem>>, %arg16: memref<1x64xf32, #tpu.memory_space<vmem>>, %arg17: memref<64x64xbf16, #tpu.memory_space<vmem>>, %arg18: memref<1x64xf32, #tpu.memory_space<vmem>>, %arg19: memref<1x64xf32, #tpu.memory_space<vmem>>, %arg20: memref<1x64xf32, #tpu.memory_space<vmem>>, %arg21: memref<64x128xbf16, #tpu.memory_space<vmem>>, %arg22: memref<1x128xf32, #tpu.memory_space<vmem>>, %arg23: memref<64x64xf32, #tpu.memory_space<vmem>>, %arg24: memref<128x128xf32, #tpu.memory_space<vmem>>) attributes {dimension_semantics = [#tpu.dimension_semantics<parallel>], iteration_bounds = array<i64: 2>, scalar_prefetch = 0 : i64, scratch_operands = 0 : i64, tpu.core_type = #tpu.core_type<tc>, window_params = [{transform_indices = @transform_0, window_bounds = array<i64: 128, 256>}, {pipeline_mode = #tpu.pipeline_mode<synchronous>, transform_indices = @transform_1, window_bounds = array<i64: 128, 128>}, {pipeline_mode = #tpu.pipeline_mode<synchronous>, transform_indices = @transform_2, window_bounds = array<i64: 1, 128>}, {pipeline_mode = #tpu.pipeline_mode<synchronous>, transform_indices = @transform_3, window_bounds = array<i64: 1, 128>}, {pipeline_mode = #tpu.pipeline_mode<synchronous>, transform_indices = @transform_4, window_bounds = array<i64: 128, 128>}, {pipeline_mode = #tpu.pipeline_mode<synchronous>, transform_indices = @transform_5, window_bounds = array<i64: 128, 64>}, {pipeline_mode = #tpu.pipeline_mode<synchronous>, transform_indices = @transform_6, window_bounds = array<i64: 128, 64>}, {pipeline_mode = #tpu.pipeline_mode<synchronous>, transform_indices = @transform_7, window_bounds = array<i64: 1, 64>}, {pipeline_mode = #tpu.pipeline_mode<synchronous>, transform_indices = @transform_8, window_bounds = array<i64: 1, 64>}, {pipeline_mode = #tpu.pipeline_mode<synchronous>, transform_indices = @transform_9, window_bounds = array<i64: 1, 64>}, {pipeline_mode = #tpu.pipeline_mode<synchronous>, transform_indices = @transform_10, window_bounds = array<i64: 64, 64>}, {pipeline_mode = #tpu.pipeline_mode<synchronous>, transform_indices = @transform_11, window_bounds = array<i64: 1, 64>}, {pipeline_mode = #tpu.pipeline_mode<synchronous>, transform_indices = @transform_12, window_bounds = array<i64: 64, 64>}, {pipeline_mode = #tpu.pipeline_mode<synchronous>, transform_indices = @transform_13, window_bounds = array<i64: 1, 64>}, {pipeline_mode = #tpu.pipeline_mode<synchronous>, transform_indices = @transform_14, window_bounds = array<i64: 1, 64>}, {pipeline_mode = #tpu.pipeline_mode<synchronous>, transform_indices = @transform_15, window_bounds = array<i64: 1, 64>}, {pipeline_mode = #tpu.pipeline_mode<synchronous>, transform_indices = @transform_16, window_bounds = array<i64: 64, 64>}, {pipeline_mode = #tpu.pipeline_mode<synchronous>, transform_indices = @transform_17, window_bounds = array<i64: 1, 64>}, {pipeline_mode = #tpu.pipeline_mode<synchronous>, transform_indices = @transform_18, window_bounds = array<i64: 1, 64>}, {pipeline_mode = #tpu.pipeline_mode<synchronous>, transform_indices = @transform_19, window_bounds = array<i64: 1, 64>}, {pipeline_mode = #tpu.pipeline_mode<synchronous>, transform_indices = @transform_20, window_bounds = array<i64: 64, 128>}, {pipeline_mode = #tpu.pipeline_mode<synchronous>, transform_indices = @transform_21, window_bounds = array<i64: 1, 128>}, {pipeline_mode = #tpu.pipeline_mode<synchronous>, transform_indices = @transform_22, window_bounds = array<i64: 64, 64>}, {transform_indices = @transform_23, window_bounds = array<i64: 128, 128>}]} {
    %c0 = arith.constant 0 : index
    %c0_0 = arith.constant 0 : index
    %0 = vector.load %arg1[%c0, %c0_0] : memref<128x256xbf16, #tpu.memory_space<vmem>>, vector<128x128xbf16>
    %c0_1 = arith.constant 0 : index
    %c128 = arith.constant 128 : index
    %1 = vector.load %arg1[%c0_1, %c128] : memref<128x256xbf16, #tpu.memory_space<vmem>>, vector<128x128xbf16>
    %c0_2 = arith.constant 0 : index
    %c0_3 = arith.constant 0 : index
    %2 = vector.load %arg23[%c0_2, %c0_3] : memref<64x64xf32, #tpu.memory_space<vmem>>, vector<64x64xf32>
    %c0_4 = arith.constant 0 : index
    %c0_5 = arith.constant 0 : index
    %3 = vector.load %arg2[%c0_4, %c0_5] : memref<128x128xbf16, #tpu.memory_space<vmem>>, vector<128x128xbf16>
    %cst = arith.constant dense<0.000000e+00> : vector<128x128xf32>
    %4 = tpu.matmul %1, %3, %cst {dimension_numbers = #tpu.dot_dimension_numbers<[1], [0], [0], [1], [0, 0, 1, 1], [], []>} : vector<128x128xbf16>, vector<128x128xbf16>, vector<128x128xf32> -> vector<128x128xf32>
    %c0_6 = arith.constant 0 : index
    %c0_7 = arith.constant 0 : index
    %5 = vector.load %arg3[%c0_6, %c0_7] : memref<1x128xf32, #tpu.memory_space<vmem>>, vector<1x128xf32>
    %c0_8 = arith.constant 0 : index
    %c0_9 = arith.constant 0 : index
    %6 = vector.load %arg4[%c0_8, %c0_9] : memref<1x128xf32, #tpu.memory_space<vmem>>, vector<1x128xf32>
    %c0_10 = arith.constant 0 : index
    %c0_11 = arith.constant 0 : index
    %7 = vector.load %arg5[%c0_10, %c0_11] : memref<128x128xf32, #tpu.memory_space<vmem>>, vector<128x128xf32>
    %cst_12 = arith.constant dense<0.000000e+00> : vector<128x128xf32>
    %8 = tpu.matmul %4, %7, %cst_12 {dimension_numbers = #tpu.dot_dimension_numbers<[1], [0], [0], [1], [0, 0, 1, 1], [], []>} : vector<128x128xf32>, vector<128x128xf32>, vector<128x128xf32> -> vector<128x128xf32>
    %9 = arith.mulf %4, %4 : vector<128x128xf32>
    %cst_13 = arith.constant dense<0.000000e+00> : vector<128x128xf32>
    %10 = tpu.matmul %9, %7, %cst_13 {dimension_numbers = #tpu.dot_dimension_numbers<[1], [0], [0], [1], [0, 0, 1, 1], [], []>} : vector<128x128xf32>, vector<128x128xf32>, vector<128x128xf32> -> vector<128x128xf32>
    %11 = arith.mulf %8, %8 : vector<128x128xf32>
    %12 = arith.subf %10, %11 : vector<128x128xf32>
    %cst_14 = arith.constant 0.000000e+00 : f32
    %13 = vector.broadcast %cst_14 : f32 to vector<128x128xf32>
    %14 = arith.maximumf %12, %13 : vector<128x128xf32>
    %15 = arith.subf %4, %8 : vector<128x128xf32>
    %cst_15 = arith.constant 9.99999974E-6 : f32
    %16 = vector.broadcast %cst_15 : f32 to vector<128x128xf32>
    %17 = arith.addf %14, %16 : vector<128x128xf32>
    %18 = math.rsqrt %17 : vector<128x128xf32>
    %19 = arith.mulf %15, %18 : vector<128x128xf32>
    %20 = vector.broadcast %5 : vector<1x128xf32> to vector<128x128xf32>
    %21 = arith.mulf %19, %20 : vector<128x128xf32>
    %22 = vector.broadcast %6 : vector<1x128xf32> to vector<128x128xf32>
    %23 = arith.addf %21, %22 : vector<128x128xf32>
    %cst_16 = arith.constant 0.000000e+00 : f32
    %24 = vector.broadcast %cst_16 : f32 to vector<128x128xf32>
    %25 = arith.maximumf %23, %24 : vector<128x128xf32>
    %c0_17 = arith.constant 0 : index
    %c0_18 = arith.constant 0 : index
    %26 = vector.load %arg6[%c0_17, %c0_18] : memref<128x64xbf16, #tpu.memory_space<vmem>>, vector<128x64xbf16>
    %cst_19 = arith.constant dense<0.000000e+00> : vector<128x64xf32>
    %27 = tpu.matmul %0, %26, %cst_19 {dimension_numbers = #tpu.dot_dimension_numbers<[1], [0], [0], [1], [0, 0, 1, 1], [], []>} : vector<128x128xbf16>, vector<128x64xbf16>, vector<128x64xf32> -> vector<128x64xf32>
    %28 = arith.truncf %25 : vector<128x128xf32> to vector<128x128xbf16>
    %c0_20 = arith.constant 0 : index
    %c0_21 = arith.constant 0 : index
    %29 = vector.load %arg7[%c0_20, %c0_21] : memref<128x64xbf16, #tpu.memory_space<vmem>>, vector<128x64xbf16>
    %cst_22 = arith.constant dense<0.000000e+00> : vector<128x64xf32>
    %30 = tpu.matmul %28, %29, %cst_22 {dimension_numbers = #tpu.dot_dimension_numbers<[1], [0], [0], [1], [0, 0, 1, 1], [], []>} : vector<128x128xbf16>, vector<128x64xbf16>, vector<128x64xf32> -> vector<128x64xf32>
    %31 = arith.addf %27, %30 : vector<128x64xf32>
    %c0_23 = arith.constant 0 : index
    %c0_24 = arith.constant 0 : index
    %32 = vector.load %arg8[%c0_23, %c0_24] : memref<1x64xf32, #tpu.memory_space<vmem>>, vector<1x64xf32>
    %33 = vector.broadcast %32 : vector<1x64xf32> to vector<128x64xf32>
    %34 = arith.addf %31, %33 : vector<128x64xf32>
    %c0_25 = arith.constant 0 : index
    %c0_26 = arith.constant 0 : index
    %35 = vector.load %arg9[%c0_25, %c0_26] : memref<1x64xf32, #tpu.memory_space<vmem>>, vector<1x64xf32>
    %c0_27 = arith.constant 0 : index
    %c0_28 = arith.constant 0 : index
    %36 = vector.load %arg10[%c0_27, %c0_28] : memref<1x64xf32, #tpu.memory_space<vmem>>, vector<1x64xf32>
    %cst_29 = arith.constant dense<0.000000e+00> : vector<128xf32>
    %37 = vector.multi_reduction <add>, %34, %cst_29 [1] : vector<128x64xf32> to vector<128xf32>
    %38 = vector.shape_cast %37 : vector<128xf32> to vector<128x1xf32>
    %cst_30 = arith.constant 6.400000e+01 : f32
    %39 = vector.broadcast %cst_30 : f32 to vector<128x1xf32>
    %40 = arith.divf %38, %39 : vector<128x1xf32>
    %41 = vector.broadcast %40 : vector<128x1xf32> to vector<128x64xf32>
    %42 = arith.subf %34, %41 : vector<128x64xf32>
    %43 = arith.mulf %42, %42 : vector<128x64xf32>
    %cst_31 = arith.constant dense<0.000000e+00> : vector<128xf32>
    %44 = vector.multi_reduction <add>, %43, %cst_31 [1] : vector<128x64xf32> to vector<128xf32>
    %45 = vector.shape_cast %44 : vector<128xf32> to vector<128x1xf32>
    %cst_32 = arith.constant 6.400000e+01 : f32
    %46 = vector.broadcast %cst_32 : f32 to vector<128x1xf32>
    %47 = arith.divf %45, %46 : vector<128x1xf32>
    %48 = vector.broadcast %40 : vector<128x1xf32> to vector<128x64xf32>
    %49 = arith.subf %34, %48 : vector<128x64xf32>
    %cst_33 = arith.constant 9.99999974E-6 : f32
    %50 = vector.broadcast %cst_33 : f32 to vector<128x1xf32>
    %51 = arith.addf %47, %50 : vector<128x1xf32>
    %52 = math.rsqrt %51 : vector<128x1xf32>
    %53 = vector.broadcast %52 : vector<128x1xf32> to vector<128x64xf32>
    %54 = arith.mulf %49, %53 : vector<128x64xf32>
    %55 = vector.broadcast %35 : vector<1x64xf32> to vector<128x64xf32>
    %56 = arith.mulf %54, %55 : vector<128x64xf32>
    %57 = vector.broadcast %36 : vector<1x64xf32> to vector<128x64xf32>
    %58 = arith.addf %56, %57 : vector<128x64xf32>
    %cst_34 = arith.constant 0.000000e+00 : f32
    %59 = vector.broadcast %cst_34 : f32 to vector<128x64xf32>
    %60 = arith.maximumf %58, %59 : vector<128x64xf32>
    %61 = arith.truncf %60 : vector<128x64xf32> to vector<128x64xbf16>
    %c0_35 = arith.constant 0 : index
    %c0_36 = arith.constant 0 : index
    %62 = vector.load %arg11[%c0_35, %c0_36] : memref<64x64xbf16, #tpu.memory_space<vmem>>, vector<64x64xbf16>
    %cst_37 = arith.constant dense<0.000000e+00> : vector<128x64xf32>
    %63 = tpu.matmul %61, %62, %cst_37 {dimension_numbers = #tpu.dot_dimension_numbers<[1], [0], [0], [1], [0, 0, 1, 1], [], []>} : vector<128x64xbf16>, vector<64x64xbf16>, vector<128x64xf32> -> vector<128x64xf32>
    %c0_38 = arith.constant 0 : index
    %c0_39 = arith.constant 0 : index
    %64 = vector.load %arg12[%c0_38, %c0_39] : memref<1x64xf32, #tpu.memory_space<vmem>>, vector<1x64xf32>
    %65 = vector.broadcast %64 : vector<1x64xf32> to vector<128x64xf32>
    %66 = arith.addf %63, %65 : vector<128x64xf32>
    %67 = arith.truncf %66 : vector<128x64xf32> to vector<128x64xbf16>
    %c0_40 = arith.constant 0 : index
    %c0_41 = arith.constant 0 : index
    %68 = vector.load %arg13[%c0_40, %c0_41] : memref<64x64xbf16, #tpu.memory_space<vmem>>, vector<64x64xbf16>
    %cst_42 = arith.constant dense<0.000000e+00> : vector<128x64xf32>
    %69 = tpu.matmul %67, %68, %cst_42 {dimension_numbers = #tpu.dot_dimension_numbers<[1], [0], [0], [1], [0, 0, 1, 1], [], []>} : vector<128x64xbf16>, vector<64x64xbf16>, vector<128x64xf32> -> vector<128x64xf32>
    %c0_43 = arith.constant 0 : index
    %c0_44 = arith.constant 0 : index
    %70 = vector.load %arg14[%c0_43, %c0_44] : memref<1x64xf32, #tpu.memory_space<vmem>>, vector<1x64xf32>
    %71 = vector.broadcast %70 : vector<1x64xf32> to vector<128x64xf32>
    %72 = arith.addf %69, %71 : vector<128x64xf32>
    %c0_45 = arith.constant 0 : index
    %c0_46 = arith.constant 0 : index
    %73 = vector.load %arg15[%c0_45, %c0_46] : memref<1x64xf32, #tpu.memory_space<vmem>>, vector<1x64xf32>
    %c0_47 = arith.constant 0 : index
    %c0_48 = arith.constant 0 : index
    %74 = vector.load %arg16[%c0_47, %c0_48] : memref<1x64xf32, #tpu.memory_space<vmem>>, vector<1x64xf32>
    %cst_49 = arith.constant dense<0.000000e+00> : vector<128x64xf32>
    %75 = tpu.matmul %72, %2, %cst_49 {dimension_numbers = #tpu.dot_dimension_numbers<[1], [0], [0], [1], [0, 0, 1, 1], [], []>} : vector<128x64xf32>, vector<64x64xf32>, vector<128x64xf32> -> vector<128x64xf32>
    %76 = arith.mulf %72, %72 : vector<128x64xf32>
    %cst_50 = arith.constant dense<0.000000e+00> : vector<128x64xf32>
    %77 = tpu.matmul %76, %2, %cst_50 {dimension_numbers = #tpu.dot_dimension_numbers<[1], [0], [0], [1], [0, 0, 1, 1], [], []>} : vector<128x64xf32>, vector<64x64xf32>, vector<128x64xf32> -> vector<128x64xf32>
    %78 = arith.mulf %75, %75 : vector<128x64xf32>
    %79 = arith.subf %77, %78 : vector<128x64xf32>
    %cst_51 = arith.constant 0.000000e+00 : f32
    %80 = vector.broadcast %cst_51 : f32 to vector<128x64xf32>
    %81 = arith.maximumf %79, %80 : vector<128x64xf32>
    %82 = arith.subf %72, %75 : vector<128x64xf32>
    %cst_52 = arith.constant 9.99999974E-6 : f32
    %83 = vector.broadcast %cst_52 : f32 to vector<128x64xf32>
    %84 = arith.addf %81, %83 : vector<128x64xf32>
    %85 = math.rsqrt %84 : vector<128x64xf32>
    %86 = arith.mulf %82, %85 : vector<128x64xf32>
    %87 = vector.broadcast %73 : vector<1x64xf32> to vector<128x64xf32>
    %88 = arith.mulf %86, %87 : vector<128x64xf32>
    %89 = vector.broadcast %74 : vector<1x64xf32> to vector<128x64xf32>
    %90 = arith.addf %88, %89 : vector<128x64xf32>
    %cst_53 = arith.constant 0.000000e+00 : f32
    %91 = vector.broadcast %cst_53 : f32 to vector<128x64xf32>
    %92 = arith.maximumf %90, %91 : vector<128x64xf32>
    %93 = arith.truncf %92 : vector<128x64xf32> to vector<128x64xbf16>
    %c0_54 = arith.constant 0 : index
    %c0_55 = arith.constant 0 : index
    %94 = vector.load %arg17[%c0_54, %c0_55] : memref<64x64xbf16, #tpu.memory_space<vmem>>, vector<64x64xbf16>
    %cst_56 = arith.constant dense<0.000000e+00> : vector<128x64xf32>
    %95 = tpu.matmul %93, %94, %cst_56 {dimension_numbers = #tpu.dot_dimension_numbers<[1], [0], [0], [1], [0, 0, 1, 1], [], []>} : vector<128x64xbf16>, vector<64x64xbf16>, vector<128x64xf32> -> vector<128x64xf32>
    %c0_57 = arith.constant 0 : index
    %c0_58 = arith.constant 0 : index
    %96 = vector.load %arg18[%c0_57, %c0_58] : memref<1x64xf32, #tpu.memory_space<vmem>>, vector<1x64xf32>
    %97 = vector.broadcast %96 : vector<1x64xf32> to vector<128x64xf32>
    %98 = arith.addf %95, %97 : vector<128x64xf32>
    %c0_59 = arith.constant 0 : index
    %c0_60 = arith.constant 0 : index
    %99 = vector.load %arg19[%c0_59, %c0_60] : memref<1x64xf32, #tpu.memory_space<vmem>>, vector<1x64xf32>
    %c0_61 = arith.constant 0 : index
    %c0_62 = arith.constant 0 : index
    %100 = vector.load %arg20[%c0_61, %c0_62] : memref<1x64xf32, #tpu.memory_space<vmem>>, vector<1x64xf32>
    %cst_63 = arith.constant dense<0.000000e+00> : vector<128x64xf32>
    %101 = tpu.matmul %98, %2, %cst_63 {dimension_numbers = #tpu.dot_dimension_numbers<[1], [0], [0], [1], [0, 0, 1, 1], [], []>} : vector<128x64xf32>, vector<64x64xf32>, vector<128x64xf32> -> vector<128x64xf32>
    %102 = arith.mulf %98, %98 : vector<128x64xf32>
    %cst_64 = arith.constant dense<0.000000e+00> : vector<128x64xf32>
    %103 = tpu.matmul %102, %2, %cst_64 {dimension_numbers = #tpu.dot_dimension_numbers<[1], [0], [0], [1], [0, 0, 1, 1], [], []>} : vector<128x64xf32>, vector<64x64xf32>, vector<128x64xf32> -> vector<128x64xf32>
    %104 = arith.mulf %101, %101 : vector<128x64xf32>
    %105 = arith.subf %103, %104 : vector<128x64xf32>
    %cst_65 = arith.constant 0.000000e+00 : f32
    %106 = vector.broadcast %cst_65 : f32 to vector<128x64xf32>
    %107 = arith.maximumf %105, %106 : vector<128x64xf32>
    %108 = arith.subf %98, %101 : vector<128x64xf32>
    %cst_66 = arith.constant 9.99999974E-6 : f32
    %109 = vector.broadcast %cst_66 : f32 to vector<128x64xf32>
    %110 = arith.addf %107, %109 : vector<128x64xf32>
    %111 = math.rsqrt %110 : vector<128x64xf32>
    %112 = arith.mulf %108, %111 : vector<128x64xf32>
    %113 = vector.broadcast %99 : vector<1x64xf32> to vector<128x64xf32>
    %114 = arith.mulf %112, %113 : vector<128x64xf32>
    %115 = vector.broadcast %100 : vector<1x64xf32> to vector<128x64xf32>
    %116 = arith.addf %114, %115 : vector<128x64xf32>
    %117 = arith.addf %116, %66 : vector<128x64xf32>
    %cst_67 = arith.constant 0.000000e+00 : f32
    %118 = vector.broadcast %cst_67 : f32 to vector<128x64xf32>
    %119 = arith.maximumf %117, %118 : vector<128x64xf32>
    %120 = arith.truncf %119 : vector<128x64xf32> to vector<128x64xbf16>
    %c0_68 = arith.constant 0 : index
    %c0_69 = arith.constant 0 : index
    %121 = vector.load %arg21[%c0_68, %c0_69] : memref<64x128xbf16, #tpu.memory_space<vmem>>, vector<64x128xbf16>
    %cst_70 = arith.constant dense<0.000000e+00> : vector<128x128xf32>
    %122 = tpu.matmul %120, %121, %cst_70 {dimension_numbers = #tpu.dot_dimension_numbers<[1], [0], [0], [1], [0, 0, 1, 1], [], []>} : vector<128x64xbf16>, vector<64x128xbf16>, vector<128x128xf32> -> vector<128x128xf32>
    %c0_71 = arith.constant 0 : index
    %c0_72 = arith.constant 0 : index
    %123 = vector.load %arg22[%c0_71, %c0_72] : memref<1x128xf32, #tpu.memory_space<vmem>>, vector<1x128xf32>
    %124 = vector.broadcast %123 : vector<1x128xf32> to vector<128x128xf32>
    %125 = arith.addf %122, %124 : vector<128x128xf32>
    %c0_73 = arith.constant 0 : index
    %c0_74 = arith.constant 0 : index
    %126 = vector.load %arg24[%c0_73, %c0_74] : memref<128x128xf32, #tpu.memory_space<vmem>>, vector<128x128xf32>
    tpu.vector_store %arg24[%c0_73, %c0_74], %125 {strides = array<i32>} : memref<128x128xf32, #tpu.memory_space<vmem>>, vector<128x128xf32>,
    return
  }
  func.func @transform_0(%arg0: i32) -> (i32, i32) {
    %c0_i32 = arith.constant 0 : i32
    %c0_i32_0 = arith.constant 0 : i32
    return %arg0, %c0_i32 : i32, i32
  }
  func.func @transform_1(%arg0: i32) -> (i32, i32) {
    %c0_i32 = arith.constant 0 : i32
    %c0_i32_0 = arith.constant 0 : i32
    %c0_i32_1 = arith.constant 0 : i32
    return %c0_i32, %c0_i32_0 : i32, i32
  }
  func.func @transform_2(%arg0: i32) -> (i32, i32) {
    %c0_i32 = arith.constant 0 : i32
    %c0_i32_0 = arith.constant 0 : i32
    %c0_i32_1 = arith.constant 0 : i32
    return %c0_i32, %c0_i32_0 : i32, i32
  }
  func.func @transform_3(%arg0: i32) -> (i32, i32) {
    %c0_i32 = arith.constant 0 : i32
    %c0_i32_0 = arith.constant 0 : i32
    %c0_i32_1 = arith.constant 0 : i32
    return %c0_i32, %c0_i32_0 : i32, i32
  }
  func.func @transform_4(%arg0: i32) -> (i32, i32) {
    %c0_i32 = arith.constant 0 : i32
    %c0_i32_0 = arith.constant 0 : i32
    %c0_i32_1 = arith.constant 0 : i32
    return %c0_i32, %c0_i32_0 : i32, i32
  }
  func.func @transform_5(%arg0: i32) -> (i32, i32) {
    %c0_i32 = arith.constant 0 : i32
    %c0_i32_0 = arith.constant 0 : i32
    %c0_i32_1 = arith.constant 0 : i32
    return %c0_i32, %c0_i32_0 : i32, i32
  }
  func.func @transform_6(%arg0: i32) -> (i32, i32) {
    %c0_i32 = arith.constant 0 : i32
    %c0_i32_0 = arith.constant 0 : i32
    %c0_i32_1 = arith.constant 0 : i32
    return %c0_i32, %c0_i32_0 : i32, i32
  }
  func.func @transform_7(%arg0: i32) -> (i32, i32) {
    %c0_i32 = arith.constant 0 : i32
    %c0_i32_0 = arith.constant 0 : i32
    %c0_i32_1 = arith.constant 0 : i32
    return %c0_i32, %c0_i32_0 : i32, i32
  }
  func.func @transform_8(%arg0: i32) -> (i32, i32) {
    %c0_i32 = arith.constant 0 : i32
    %c0_i32_0 = arith.constant 0 : i32
    %c0_i32_1 = arith.constant 0 : i32
    return %c0_i32, %c0_i32_0 : i32, i32
  }
  func.func @transform_9(%arg0: i32) -> (i32, i32) {
    %c0_i32 = arith.constant 0 : i32
    %c0_i32_0 = arith.constant 0 : i32
    %c0_i32_1 = arith.constant 0 : i32
    return %c0_i32, %c0_i32_0 : i32, i32
  }
  func.func @transform_10(%arg0: i32) -> (i32, i32) {
    %c0_i32 = arith.constant 0 : i32
    %c0_i32_0 = arith.constant 0 : i32
    %c0_i32_1 = arith.constant 0 : i32
    return %c0_i32, %c0_i32_0 : i32, i32
  }
  func.func @transform_11(%arg0: i32) -> (i32, i32) {
    %c0_i32 = arith.constant 0 : i32
    %c0_i32_0 = arith.constant 0 : i32
    %c0_i32_1 = arith.constant 0 : i32
    return %c0_i32, %c0_i32_0 : i32, i32
  }
  func.func @transform_12(%arg0: i32) -> (i32, i32) {
    %c0_i32 = arith.constant 0 : i32
    %c0_i32_0 = arith.constant 0 : i32
    %c0_i32_1 = arith.constant 0 : i32
    return %c0_i32, %c0_i32_0 : i32, i32
  }
  func.func @transform_13(%arg0: i32) -> (i32, i32) {
    %c0_i32 = arith.constant 0 : i32
    %c0_i32_0 = arith.constant 0 : i32
    %c0_i32_1 = arith.constant 0 : i32
    return %c0_i32, %c0_i32_0 : i32, i32
  }
  func.func @transform_14(%arg0: i32) -> (i32, i32) {
    %c0_i32 = arith.constant 0 : i32
    %c0_i32_0 = arith.constant 0 : i32
    %c0_i32_1 = arith.constant 0 : i32
    return %c0_i32, %c0_i32_0 : i32, i32
  }
  func.func @transform_15(%arg0: i32) -> (i32, i32) {
    %c0_i32 = arith.constant 0 : i32
    %c0_i32_0 = arith.constant 0 : i32
    %c0_i32_1 = arith.constant 0 : i32
    return %c0_i32, %c0_i32_0 : i32, i32
  }
  func.func @transform_16(%arg0: i32) -> (i32, i32) {
    %c0_i32 = arith.constant 0 : i32
    %c0_i32_0 = arith.constant 0 : i32
    %c0_i32_1 = arith.constant 0 : i32
    return %c0_i32, %c0_i32_0 : i32, i32
  }
  func.func @transform_17(%arg0: i32) -> (i32, i32) {
    %c0_i32 = arith.constant 0 : i32
    %c0_i32_0 = arith.constant 0 : i32
    %c0_i32_1 = arith.constant 0 : i32
    return %c0_i32, %c0_i32_0 : i32, i32
  }
  func.func @transform_18(%arg0: i32) -> (i32, i32) {
    %c0_i32 = arith.constant 0 : i32
    %c0_i32_0 = arith.constant 0 : i32
    %c0_i32_1 = arith.constant 0 : i32
    return %c0_i32, %c0_i32_0 : i32, i32
  }
  func.func @transform_19(%arg0: i32) -> (i32, i32) {
    %c0_i32 = arith.constant 0 : i32
    %c0_i32_0 = arith.constant 0 : i32
    %c0_i32_1 = arith.constant 0 : i32
    return %c0_i32, %c0_i32_0 : i32, i32
  }
  func.func @transform_20(%arg0: i32) -> (i32, i32) {
    %c0_i32 = arith.constant 0 : i32
    %c0_i32_0 = arith.constant 0 : i32
    %c0_i32_1 = arith.constant 0 : i32
    return %c0_i32, %c0_i32_0 : i32, i32
  }
  func.func @transform_21(%arg0: i32) -> (i32, i32) {
    %c0_i32 = arith.constant 0 : i32
    %c0_i32_0 = arith.constant 0 : i32
    %c0_i32_1 = arith.constant 0 : i32
    return %c0_i32, %c0_i32_0 : i32, i32
  }
  func.func @transform_22(%arg0: i32) -> (i32, i32) {
    %c0_i32 = arith.constant 0 : i32
    %c0_i32_0 = arith.constant 0 : i32
    %c0_i32_1 = arith.constant 0 : i32
    return %c0_i32, %c0_i32_0 : i32, i32
  }
  func.func @transform_23(%arg0: i32) -> (i32, i32) {
    %c0_i32 = arith.constant 0 : i32
    %c0_i32_0 = arith.constant 0 : i32
    return %arg0, %c0_i32 : i32, i32
  }
}

</mosaic_0001>

<bundles_post_ra>
// kernel: tpu_custom_call.1
= control target key start
LH: loop header
LB: loop body
LE: loop exit
PB: predicated region body
PF: predicated region fallthrough
CT: control target
= control target key end

     0   :  { %s8412_s0 = inlined_call_operand.hbm [shape: bf16[256,256], index: 0, kind: input, shape index: {}]   ;;  %s8413_s1 = inlined_call_operand.vmem [shape: bf16[128,128], index: 1, kind: input, shape index: {}]   ;;  %s8414_s2 = inlined_call_operand.hbm [shape: f32[1,128], index: 2, kind: input, shape index: {}]   ;;  %s8415_s3 = inlined_call_operand.hbm [shape: f32[1,128], index: 3, kind: input, shape index: {}]   ;;  %s8416_s4 = inlined_call_operand.vmem [shape: f32[128,128], index: 4, kind: input, shape index: {}]   ;;  %s8417_s5 = inlined_call_operand.vmem [shape: bf16[128,64], index: 5, kind: input, shape index: {}]   ;;  %s8418_s6 = inlined_call_operand.vmem [shape: bf16[128,64], index: 6, kind: input, shape index: {}]   ;;  %s8419_s7 = inlined_call_operand.hbm [shape: f32[1,64], index: 7, kind: input, shape index: {}]   ;;  %s8420_s8 = inlined_call_operand.hbm [shape: f32[1,64], index: 8, kind: input, shape index: {}]   ;;  %s8421_s9 = inlined_call_operand.hbm [shape: f32[1,64], index: 9, kind: input, shape index: {}]   ;;  %s8422_s10 = inlined_call_operand.hbm [shape: bf16[64,64], index: 10, kind: input, shape index: {}]   ;;  %s8423_s11 = inlined_call_operand.hbm [shape: f32[1,64], index: 11, kind: input, shape index: {}]   ;;  %s8424_s12 = inlined_call_operand.hbm [shape: bf16[64,64], index: 12, kind: input, shape index: {}]   ;;  %s8425_s13 = inlined_call_operand.hbm [shape: f32[1,64], index: 13, kind: input, shape index: {}]   ;;  %s8426_s14 = inlined_call_operand.hbm [shape: f32[1,64], index: 14, kind: input, shape index: {}]   ;;  %s8427_s15 = inlined_call_operand.hbm [shape: f32[1,64], index: 15, kind: input, shape index: {}]   ;;  %s8428_s16 = inlined_call_operand.hbm [shape: bf16[64,64], index: 16, kind: input, shape index: {}]   ;;  %s8429_s17 = inlined_call_operand.hbm [shape: f32[1,64], index: 17, kind: input, shape index: {}]   ;;  %s8430_s18 = inlined_call_operand.vmem [shape: f32[1,64], index: 18, kind: input, shape index: {}]   ;;  %s8431_s19 = inlined_call_operand.vmem [shape: f32[1,64], index: 19, kind: input, shape index: {}]   ;;  %s8432_s20 = inlined_call_operand.hbm [shape: bf16[64,128], index: 20, kind: input, shape index: {}]   ;;  %s8433_s21 = inlined_call_operand.vmem [shape: f32[1,128], index: 21, kind: input, shape index: {}]   ;;  %s8434_s22 = inlined_call_operand.vmem [shape: f32[64,64], index: 22, kind: input, shape index: {}]   ;;  %s8435_s23 = inlined_call_operand.hbm [shape: f32[256,128], index: 23, kind: output, shape index: {}]  }
   0x1   :  { %8463 = sst [smem:[#allocation42_spill]] %s8412_s0 }
   0x2   :  { %8464 = sst [smem:[#allocation43_spill]] %s8413_s1 }
   0x3   :  { %8465 = sst [smem:[#allocation44_spill]] %s8414_s2 }
   0x4   :  { %8466 = sst [smem:[#allocation45_spill]] %s8415_s3 }
   0x5   :  { %8467 = sst [smem:[#allocation46_spill]] %s8416_s4 }
   0x6   :  { %8468 = sst [smem:[#allocation47_spill]] %s8417_s5 }
   0x7   :  { %8469 = sst [smem:[#allocation48_spill]] %s8418_s6 }
   0x8   :  { %8470 = sst [smem:[#allocation49_spill]] %s8419_s7 }
   0x9   :  { %8471 = sst [smem:[#allocation50_spill]] %s8420_s8 }
   0xa   :  { %8472 = sst [smem:[#allocation51_spill]] %s8421_s9 }
   0xb   :  { %8473 = sst [smem:[#allocation52_spill]] %s8422_s10 }
   0xc   :  { %8474 = sst [smem:[#allocation53_spill]] %s8430_s18 }
   0xd   :  { %8475 = sst [smem:[#allocation54_spill]] %s8431_s19 }
   0xe   :  { %8476 = sst [smem:[#allocation55_spill]] %s8433_s21 }
   0xf   :  { %8477 = sst [smem:[#allocation56_spill]] %s8434_s22 }
  0x10   :  { %8478 = sst [smem:[#allocation57_spill]] %s8435_s23 }
  0x11   :  { %28 = vsyncpa [#allocation3], 0 }
  0x12   :  { %30 = vsyncpa [#allocation3 + $0x1], 0 }
  0x13   :  { %31 = vsyncpa [#allocation6], 0 }
  0x14   :  { %32 = vsyncpa [#allocation9], 0 }
  0x15   :  { %33 = vsyncpa [#allocation12], 0 }
  0x16   :  { %34 = vsyncpa [#allocation15], 0 }
  0x17   :  { %35 = vsyncpa [#allocation18], 0 }
  0x18   :  { %36 = vsyncpa [#allocation21], 0 }
  0x19   :  { %37 = vsyncpa [#allocation24], 0 }
  0x1a   :  { %38 = vsyncpa [#allocation4], 0 }
  0x1b   :  { %40 = vsyncpa [#allocation4 + $0x1], 0  ;;  %s6530_s4 = smov 0   ;;  %s6532_s30 = smov 0  }
  0x1c   :  { %s6534_s24 = smov 0   ;;  %s6536_s25 = smov 0  }
  0x1d LB: > { %8479 = sst [smem:[#allocation36_spill]] %s6374_s4  ;;  %s6388_s5 = smov [#allocation5]   ;;  %s6386_s25 = sphi %s6536_s25, %s8544_s25   ;;  %s6382_s24 = sphi %s6534_s24, %s8543_s24   ;;  %s6378_s30 = sphi %s6532_s30, %s8542_s30   ;;  %s6374_s4 = sphi %s6530_s4, %s8541_s4  }
  0x1e   : > { %s581_s1 = sshll.u32 %s6388_s5, 4  ;;  %s6551_s26 = sadd.s32 4294967295, %s6386_s25   ;;  %s6556_s1 = int_to_ptr.vmem [resolvable:$true] %s581_s1 }
  0x1f   : > { %8480 = sst [smem:[#allocation37_spill]] %s6551_s26  ;;  %p4411_p0 = scmp.ge.s32.totalorder %s6386_s25, 1 }
  0x20   : > { %p8450_p1 = scmp.eq.s32.totalorder %s6551_s26, 0  ;;  %p565_p2 = scmp.lt.s32.totalorder %s6386_s25, 3 }
  0x21   : > { %s6389_s6 = smov [#allocation8]   ;;  %s6390_s7 = smov [#allocation11]  }
  0x22   : > { %p6558_p3 = pnand %p4411_p0, %p565_p2  ;;  %s612_s27 = sshll.u32 %s6389_s6, 4  ;;  %s6565_s27 = int_to_ptr.vmem [resolvable:$true] %s612_s27 }
  0x23   : > { %s634_s28 = sshll.u32 %s6390_s7, 4  ;;  %s6391_s3 = smov [#allocation14]   ;;  %s6573_s28 = int_to_ptr.vmem [resolvable:$true] %s634_s28 }
  0x24   : > { %s8481_s2 = scalar_select %p6558_p3, 1, 0 }
  0x25   : > { %p5553_p5 = pneg %p6558_p3  ;;  %s6575_s0 = sshll.u32 %s6391_s3, 4  ;;  %s659_s0 = int_to_ptr.vmem [resolvable:$true] %s6575_s0 }
  0x26   : > { %8482 = sst [smem:[#allocation38_spill]] %s8481_s2 }
  0x27   : > { %p6569_p6 = pnand %p5553_p5, %p8450_p1  ;;  %s8484_s21 = sld [smem:[#allocation44_spill]] }
  0x29   : > { %p6585_p8 = pneg %p6569_p6 }
  0x2d   : > { %s5870_s19 = scalar_lea.hbm %s8484_s21, 16 }
  0x2e   : > { %p5871_p7 = scmp.ne.s32.totalorder %s8484_s21, %s5870_s19  ;;  %p5877_p11 = scmp.lt.u32.totalorder %s5870_s19, %s8484_s21 }
  0x30   : > { %p5873_p9 = pnand %p6585_p8, %p5871_p7 }
  0x32   : > { %p5874_p10 = pneg %p5873_p9 }
  0x34   : > { %p5879_p12 = pnand %p5877_p11, %p5874_p10 }
  0x36   : > { %5882 = shalt.err (!%p5879_p12)
}
  0x37   : > { %s5883_s18 = scalar_lea.vmem %s6556_s1, 16  ;;  %s5890_s23 = scalar_lea.vmem %s6556_s1, 32 }
  0x38   : > { %p5884_p13 = scmp.ne.s32.totalorder %s6556_s1, %s5883_s18  ;;  %p5891_p5 = scmp.lt.s32.totalorder %s6556_s1, %s6556_s1 }
  0x39   : > { %p5892_p7 = scmp.lt.s32.totalorder %s5890_s23, %s5883_s18 }
  0x3a   : > { %p5886_p0 = pnand %p5884_p13, %p6585_p8 }
  0x3b   : > { %p5893_p9 = por %p5892_p7, %p5891_p5 }
  0x3c   : > { %p5887_p2 = pneg %p5886_p0 }
  0x3e   : > { %p5894_p4 = pnand %p5893_p9, %p5887_p2 }
  0x40   : > { %5897 = shalt.err (!%p5894_p4)
}
  0x41   : > { %5556 = dma.hbm_to_vmem [thread:$0]  (!%p6569_p6), %s8484_s21, 16, %s6556_s1, [#allocation6]  }
  0x42   : > { %s8486_s3 = sld [smem:[#allocation49_spill]] }
  0x48   : > { %s5898_s2 = scalar_lea.hbm %s8486_s3, 16 }
  0x49   : > { %p5899_p10 = scmp.ne.s32.totalorder %s8486_s3, %s5898_s2  ;;  %p5905_p4 = scmp.lt.u32.totalorder %s5898_s2, %s8486_s3 }
  0x4b   : > { %p5901_p11 = pnand %p5899_p10, %p6585_p8 }
  0x4d   : > { %p5902_p12 = pneg %p5901_p11 }
  0x4f   : > { %p5907_p13 = pnand %p5905_p4, %p5902_p12 }
  0x51   : > { %5910 = shalt.err (!%p5907_p13)
}
  0x52   : > { %s5911_s1 = scalar_lea.vmem %s6565_s27, 16  ;;  %s5918_s4 = scalar_lea.vmem %s6565_s27, 32 }
  0x53   : > { %p5912_p0 = scmp.ne.s32.totalorder %s6565_s27, %s5911_s1  ;;  %p5919_p7 = scmp.lt.s32.totalorder %s6565_s27, %s6565_s27 }
  0x54   : > { %p5920_p9 = scmp.lt.s32.totalorder %s5918_s4, %s5911_s1 }
  0x55   : > { %p5914_p2 = pnand %p5912_p0, %p6585_p8 }
  0x56   : > { %p5921_p10 = por %p5920_p9, %p5919_p7 }
  0x57   : > { %p5915_p5 = pneg %p5914_p2 }
  0x59   : > { %p5922_p11 = pnand %p5921_p10, %p5915_p5 }
  0x5b   : > { %5925 = shalt.err (!%p5922_p11)
}
  0x5c   : > { %5562 = dma.hbm_to_vmem [thread:$0]  (!%p6569_p6), %s8486_s3, 16, %s6565_s27, [#allocation9]  }
  0x5d   : > { %s8487_s9 = sld [smem:[#allocation51_spill]] }
  0x63   : > { %s5926_s5 = scalar_lea.hbm %s8487_s9, 16 }
  0x64   : > { %p5927_p12 = scmp.ne.s32.totalorder %s8487_s9, %s5926_s5  ;;  %p5933_p0 = scmp.lt.u32.totalorder %s5926_s5, %s8487_s9 }
  0x66   : > { %p5929_p4 = pnand %p5927_p12, %p6585_p8 }
  0x68   : > { %p5930_p13 = pneg %p5929_p4 }
  0x6a   : > { %p5935_p2 = pnand %p5933_p0, %p5930_p13 }
  0x6c   : > { %5938 = shalt.err (!%p5935_p2)
}
  0x6d   : > { %s5939_s27 = scalar_lea.vmem %s6573_s28, 16  ;;  %s5946_s4 = scalar_lea.vmem %s6573_s28, 32 }
  0x6e   : > { %p5940_p5 = scmp.ne.s32.totalorder %s6573_s28, %s5939_s27  ;;  %p5947_p10 = scmp.lt.s32.totalorder %s6573_s28, %s6573_s28 }
  0x6f   : > { %p5948_p11 = scmp.lt.s32.totalorder %s5946_s4, %s5939_s27 }
  0x70   : > { %p5942_p7 = pnand %p5940_p5, %p6585_p8 }
  0x71   : > { %p5949_p12 = por %p5948_p11, %p5947_p10 }
  0x72   : > { %p5943_p9 = pneg %p5942_p7 }
  0x74   : > { %p5950_p4 = pnand %p5949_p12, %p5943_p9 }
  0x76   : > { %5953 = shalt.err (!%p5950_p4)
}
  0x77   : > { %5568 = dma.hbm_to_vmem [thread:$0]  (!%p6569_p6), %s8487_s9, 16, %s6573_s28, [#allocation12]  }
  0x78   : > { %s6392_s19 = smov [#allocation17]   ;;  %s5954_s18 = scalar_lea.hbm %s8423_s11, 16 }
  0x79   : > { %s682_s22 = sshll.u32 %s6392_s19, 4  ;;  %p5955_p13 = scmp.ne.s32.totalorder %s8423_s11, %s5954_s18  ;;  %s683_s22 = int_to_ptr.vmem [resolvable:$true] %s682_s22 }
  0x7a   : > { %p5961_p5 = scmp.lt.u32.totalorder %s5954_s18, %s8423_s11 }
  0x7b   : > { %p5957_p0 = pnand %p5955_p13, %p6585_p8 }
  0x7d   : > { %p5958_p2 = pneg %p5957_p0 }
  0x7f   : > { %p5963_p7 = pnand %p5961_p5, %p5958_p2 }
  0x81   : > { %5966 = shalt.err (!%p5963_p7)
}
  0x82   : > { %s5967_s28 = scalar_lea.vmem %s659_s0, 16  ;;  %s5974_s26 = scalar_lea.vmem %s659_s0, 32 }
  0x83   : > { %p5968_p9 = scmp.ne.s32.totalorder %s659_s0, %s5967_s28  ;;  %p5975_p12 = scmp.lt.s32.totalorder %s659_s0, %s659_s0 }
  0x84   : > { %p5976_p4 = scmp.lt.s32.totalorder %s5974_s26, %s5967_s28 }
  0x85   : > { %p5970_p10 = pnand %p5968_p9, %p6585_p8 }
  0x86   : > { %p5977_p1 = por %p5976_p4, %p5975_p12 }
  0x87   : > { %p5971_p11 = pneg %p5970_p10 }
  0x89   : > { %p5978_p3 = pnand %p5977_p1, %p5971_p11 }
  0x8b   : > { %5981 = shalt.err (!%p5978_p3)
}
  0x8c   : > { %5574 = dma.hbm_to_vmem [thread:$0]  (!%p6569_p6), %s8423_s11, 16, %s659_s0, [#allocation15]  }
  0x8d   : > { %s5982_s18 = scalar_lea.hbm %s8425_s13, 16 }
  0x8e   : > { %p5983_p13 = scmp.ne.s32.totalorder %s8425_s13, %s5982_s18  ;;  %p5989_p3 = scmp.lt.u32.totalorder %s5982_s18, %s8425_s13 }
  0x90   : > { %p5985_p0 = pnand %p5983_p13, %p6585_p8 }
  0x92   : > { %p5986_p1 = pneg %p5985_p0 }
  0x94   : > { %p5991_p2 = pnand %p5989_p3, %p5986_p1 }
  0x96   : > { %5994 = shalt.err (!%p5991_p2)
}
  0x97   : > { %s5995_s28 = scalar_lea.vmem %s683_s22, 16  ;;  %s6002_s0 = scalar_lea.vmem %s683_s22, 32 }
  0x98   : > { %p5996_p5 = scmp.ne.s32.totalorder %s683_s22, %s5995_s28  ;;  %p6003_p10 = scmp.lt.s32.totalorder %s683_s22, %s683_s22 }
  0x99   : > { %p6004_p11 = scmp.lt.s32.totalorder %s6002_s0, %s5995_s28 }
  0x9a   : > { %p5998_p7 = pnand %p5996_p5, %p6585_p8 }
  0x9b   : > { %p6005_p12 = por %p6004_p11, %p6003_p10 }
  0x9c   : > { %p5999_p9 = pneg %p5998_p7 }
  0x9e   : > { %p6006_p4 = pnand %p6005_p12, %p5999_p9 }
  0xa0   : > { %6009 = shalt.err (!%p6006_p4)
}
  0xa1   : > { %5580 = dma.hbm_to_vmem [thread:$0]  (!%p6569_p6), %s8425_s13, 16, %s683_s22, [#allocation18]  }
  0xa2   : > { %s6393_s19 = smov [#allocation20]   ;;  %s6394_s6 = smov [#allocation23]  }
  0xa3   : > { %s704_s5 = sshll.u32 %s6393_s19, 4  ;;  %s728_s18 = sshll.u32 %s6394_s6, 4  ;;  %s705_s5 = int_to_ptr.vmem [resolvable:$true] %s704_s5  ;;  %s729_s18 = int_to_ptr.vmem [resolvable:$true] %s728_s18 }
  0xa4   : > { %s6010_s27 = scalar_lea.hbm %s8427_s15, 16 }
  0xa5   : > { %p6011_p13 = scmp.ne.s32.totalorder %s8427_s15, %s6010_s27  ;;  %p6017_p3 = scmp.lt.u32.totalorder %s6010_s27, %s8427_s15 }
  0xa7   : > { %p6013_p0 = pnand %p6011_p13, %p6585_p8 }
  0xa9   : > { %p6014_p1 = pneg %p6013_p0 }
  0xab   : > { %p6019_p2 = pnand %p6017_p3, %p6014_p1 }
  0xad   : > { %6022 = shalt.err (!%p6019_p2)
}
  0xae   : > { %s6023_s22 = scalar_lea.vmem %s705_s5, 16  ;;  %s6030_s2 = scalar_lea.vmem %s705_s5, 32 }
  0xaf   : > { %p6024_p5 = scmp.ne.s32.totalorder %s705_s5, %s6023_s22  ;;  %p6031_p10 = scmp.lt.s32.totalorder %s705_s5, %s705_s5 }
  0xb0   : > { %p6032_p11 = scmp.lt.s32.totalorder %s6030_s2, %s6023_s22 }
  0xb1   : > { %p6026_p7 = pnand %p6024_p5, %p6585_p8 }
  0xb2   : > { %p6033_p12 = por %p6032_p11, %p6031_p10 }
  0xb3   : > { %p6027_p9 = pneg %p6026_p7 }
  0xb5   : > { %p6034_p4 = pnand %p6033_p12, %p6027_p9 }
  0xb7   : > { %6037 = shalt.err (!%p6034_p4)
}
  0xb8   : > { %5586 = dma.hbm_to_vmem [thread:$0]  (!%p6569_p6), %s8427_s15, 16, %s705_s5, [#allocation21]  }
  0xb9   : > { %s6038_s27 = scalar_lea.hbm %s8429_s17, 16 }
  0xba   : > { %p6039_p13 = scmp.ne.s32.totalorder %s8429_s17, %s6038_s27  ;;  %p6045_p3 = scmp.lt.u32.totalorder %s6038_s27, %s8429_s17 }
  0xbc   : > { %p6041_p0 = pnand %p6039_p13, %p6585_p8 }
  0xbe   : > { %p6042_p1 = pneg %p6041_p0 }
  0xc0   : > { %p6047_p2 = pnand %p6045_p3, %p6042_p1 }
  0xc2   : > { %6050 = shalt.err (!%p6047_p2)
}
  0xc3   : > { %s6051_s22 = scalar_lea.vmem %s729_s18, 16  ;;  %s6058_s5 = scalar_lea.vmem %s729_s18, 32 }
  0xc4   : > { %p6052_p5 = scmp.ne.s32.totalorder %s729_s18, %s6051_s22  ;;  %p6059_p10 = scmp.lt.s32.totalorder %s729_s18, %s729_s18 }
  0xc5   : > { %p6060_p11 = scmp.lt.s32.totalorder %s6058_s5, %s6051_s22 }
  0xc6   : > { %p6054_p7 = pnand %p6052_p5, %p6585_p8 }
  0xc7   : > { %p6061_p12 = por %p6060_p11, %p6059_p10 }
  0xc8   : > { %p6055_p9 = pneg %p6054_p7 }
  0xca   : > { %p6062_p4 = pnand %p6061_p12, %p6055_p9 }
  0xcc   : > { %6065 = shalt.err (!%p6062_p4)
}
  0xcd   : > { %5592 = dma.hbm_to_vmem [thread:$0]  (!%p6569_p6), %s8429_s17, 16, %s729_s18, [#allocation24]  }
  0xce   : > { %s6395_s6 = smov [#allocation7]   ;;  %s6396_s1 = smov [#allocation10]  }
  0xcf   : > { %s592_s23 = sshll.u32 %s6395_s6, 4  ;;  %s623_s27 = sshll.u32 %s6396_s1, 4  ;;  %s593_s23 = int_to_ptr.vmem [resolvable:$true] %s592_s23  ;;  %s624_s27 = int_to_ptr.vmem [resolvable:$true] %s623_s27 }
  0xd0   : > { %s8488_s0 = sld [smem:[#allocation45_spill]] }
  0xd6   : > { %s6066_s26 = scalar_lea.hbm %s8488_s0, 16 }
  0xd7   : > { %p6067_p13 = scmp.ne.s32.totalorder %s8488_s0, %s6066_s26  ;;  %p6073_p3 = scmp.lt.u32.totalorder %s6066_s26, %s8488_s0 }
  0xd9   : > { %p6069_p0 = pnand %p6067_p13, %p6585_p8 }
  0xdb   : > { %p6070_p1 = pneg %p6069_p0 }
  0xdd   : > { %p6075_p2 = pnand %p6073_p3, %p6070_p1 }
  0xdf   : > { %6078 = shalt.err (!%p6075_p2)
}
  0xe0   : > { %s6079_s18 = scalar_lea.vmem %s593_s23, 16  ;;  %s6086_s19 = scalar_lea.vmem %s593_s23, 32 }
  0xe1   : > { %p6080_p5 = scmp.ne.s32.totalorder %s593_s23, %s6079_s18  ;;  %p6087_p10 = scmp.lt.s32.totalorder %s593_s23, %s593_s23 }
  0xe2   : > { %p6088_p11 = scmp.lt.s32.totalorder %s6086_s19, %s6079_s18 }
  0xe3   : > { %p6082_p7 = pnand %p6080_p5, %p6585_p8 }
  0xe4   : > { %p6089_p12 = por %p6088_p11, %p6087_p10 }
  0xe5   : > { %p6083_p9 = pneg %p6082_p7 }
  0xe7   : > { %p6090_p4 = pnand %p6089_p12, %p6083_p9 }
  0xe9   : > { %6093 = shalt.err (!%p6090_p4)
}
  0xea   : > { %5559 = dma.hbm_to_vmem [thread:$0]  (!%p6569_p6), %s8488_s0, 16, %s593_s23, [#allocation6]  }
  0xeb   : > { %s8489_s8 = sld [smem:[#allocation50_spill]] }
  0xf1   : > { %s6094_s28 = scalar_lea.hbm %s8489_s8, 16 }
  0xf2   : > { %p6095_p13 = scmp.ne.s32.totalorder %s8489_s8, %s6094_s28  ;;  %p6101_p3 = scmp.lt.u32.totalorder %s6094_s28, %s8489_s8 }
  0xf4   : > { %p6097_p0 = pnand %p6095_p13, %p6585_p8 }
  0xf6   : > { %p6098_p1 = pneg %p6097_p0 }
  0xf8   : > { %p6103_p2 = pnand %p6101_p3, %p6098_p1 }
  0xfa   : > { %6106 = shalt.err (!%p6103_p2)
}
  0xfb   : > { %s6107_s18 = scalar_lea.vmem %s624_s27, 16  ;;  %s6114_s23 = scalar_lea.vmem %s624_s27, 32 }
  0xfc   : > { %p6108_p5 = scmp.ne.s32.totalorder %s624_s27, %s6107_s18  ;;  %p6115_p10 = scmp.lt.s32.totalorder %s624_s27, %s624_s27 }
  0xfd   : > { %p6116_p11 = scmp.lt.s32.totalorder %s6114_s23, %s6107_s18 }
  0xfe   : > { %p6110_p7 = pnand %p6108_p5, %p6585_p8 }
  0xff   : > { %p6117_p12 = por %p6116_p11, %p6115_p10 }
 0x100   : > { %p6111_p9 = pneg %p6110_p7 }
 0x102   : > { %p6118_p4 = pnand %p6117_p12, %p6111_p9 }
 0x104   : > { %6121 = shalt.err (!%p6118_p4)
}
 0x105   : > { %5565 = dma.hbm_to_vmem [thread:$0]  (!%p6569_p6), %s8489_s8, 16, %s624_s27, [#allocation9]  }
 0x106   : > { %s6397_s1 = smov [#allocation13]   ;;  %s8490_s10 = sld [smem:[#allocation52_spill]] }
 0x107   : > { %s644_s3 = sshll.u32 %s6397_s1, 4  ;;  %s645_s3 = int_to_ptr.vmem [resolvable:$true] %s644_s3 }
 0x10c   : > { %s6122_s26 = scalar_lea.hbm %s8490_s10, 512 }
 0x10d   : > { %p6123_p13 = scmp.ne.s32.totalorder %s8490_s10, %s6122_s26  ;;  %p6129_p3 = scmp.lt.u32.totalorder %s6122_s26, %s8490_s10 }
 0x10f   : > { %p6125_p0 = pnand %p6123_p13, %p6585_p8 }
 0x111   : > { %p6126_p1 = pneg %p6125_p0 }
 0x113   : > { %p6131_p2 = pnand %p6129_p3, %p6126_p1 }
 0x115   : > { %6134 = shalt.err (!%p6131_p2)
}
 0x116   : > { %s6135_s27 = scalar_lea.vmem %s645_s3, 512  ;;  %p6143_p10 = scmp.lt.s32.totalorder %s645_s3, %s645_s3 }
 0x117   : > { %p6136_p5 = scmp.ne.s32.totalorder %s645_s3, %s6135_s27  ;;  %p6144_p11 = scmp.lt.s32.totalorder %s6135_s27, %s6135_s27 }
 0x119   : > { %p6138_p7 = pnand %p6136_p5, %p6585_p8  ;;  %p6145_p12 = por %p6144_p11, %p6143_p10 }
 0x11b   : > { %p6139_p9 = pneg %p6138_p7 }
 0x11d   : > { %p6146_p4 = pnand %p6145_p12, %p6139_p9 }
 0x11f   : > { %6149 = shalt.err (!%p6146_p4)
}
 0x120   : > { %s6398_s23 = smov 64   ;;  %s6399_s19 = smov 4  }
 0x121   : > { %5571 = dma.hbm_to_vmem [thread:$0]  (!%p6569_p6), %s8490_s10, 512, %s645_s3, [#allocation12], %s6398_s23, %s6398_s23, %s6399_s19  }
 0x122   : > { %s6400_s4 = smov [#allocation16]   ;;  %s6401_s26 = smov [#allocation19]  }
 0x123   : > { %s668_s28 = sshll.u32 %s6400_s4, 4  ;;  %s693_s22 = sshll.u32 %s6401_s26, 4  ;;  %s669_s28 = int_to_ptr.vmem [resolvable:$true] %s668_s28  ;;  %s6785_s22 = int_to_ptr.vmem [resolvable:$true] %s693_s22 }
 0x124   : > { %s6150_s18 = scalar_lea.hbm %s8424_s12, 512 }
 0x125   : > { %p6151_p13 = scmp.ne.s32.totalorder %s8424_s12, %s6150_s18  ;;  %p6157_p3 = scmp.lt.u32.totalorder %s6150_s18, %s8424_s12 }
 0x127   : > { %p6153_p0 = pnand %p6151_p13, %p6585_p8 }
 0x129   : > { %p6154_p1 = pneg %p6153_p0 }
 0x12b   : > { %p6159_p2 = pnand %p6157_p3, %p6154_p1 }
 0x12d   : > { %6162 = shalt.err (!%p6159_p2)
}
 0x12e   : > { %s6163_s1 = scalar_lea.vmem %s669_s28, 512  ;;  %p6171_p10 = scmp.lt.s32.totalorder %s669_s28, %s669_s28 }
 0x12f   : > { %p6164_p5 = scmp.ne.s32.totalorder %s669_s28, %s6163_s1  ;;  %p6172_p11 = scmp.lt.s32.totalorder %s6163_s1, %s6163_s1 }
 0x131   : > { %p6166_p7 = pnand %p6164_p5, %p6585_p8  ;;  %p6173_p12 = por %p6172_p11, %p6171_p10 }
 0x133   : > { %p6167_p9 = pneg %p6166_p7 }
 0x135   : > { %p6174_p4 = pnand %p6173_p12, %p6167_p9 }
 0x137   : > { %6177 = shalt.err (!%p6174_p4)
}
 0x138   : > { %5577 = dma.hbm_to_vmem [thread:$0]  (!%p6569_p6), %s8424_s12, 512, %s669_s28, [#allocation15], %s6398_s23, %s6398_s23, %s6399_s19  }
 0x139   : > { %s6178_s2 = scalar_lea.hbm %s8426_s14, 16 }
 0x13a   : > { %p6179_p13 = scmp.ne.s32.totalorder %s8426_s14, %s6178_s2  ;;  %p6185_p3 = scmp.lt.u32.totalorder %s6178_s2, %s8426_s14 }
 0x13c   : > { %p6181_p0 = pnand %p6179_p13, %p6585_p8 }
 0x13e   : > { %p6182_p1 = pneg %p6181_p0 }
 0x140   : > { %p6187_p2 = pnand %p6185_p3, %p6182_p1 }
 0x142   : > { %6190 = shalt.err (!%p6187_p2)
}
 0x143   : > { %s6191_s28 = scalar_lea.vmem %s6785_s22, 16  ;;  %s6198_s1 = scalar_lea.vmem %s6785_s22, 32 }
 0x144   : > { %p6192_p5 = scmp.ne.s32.totalorder %s6785_s22, %s6191_s28  ;;  %p6199_p10 = scmp.lt.s32.totalorder %s6785_s22, %s6785_s22 }
 0x145   : > { %p6200_p11 = scmp.lt.s32.totalorder %s6198_s1, %s6191_s28 }
 0x146   : > { %p6194_p7 = pnand %p6192_p5, %p6585_p8 }
 0x147   : > { %p6201_p12 = por %p6200_p11, %p6199_p10 }
 0x148   : > { %p6195_p9 = pneg %p6194_p7 }
 0x14a   : > { %p6202_p4 = pnand %p6201_p12, %p6195_p9 }
 0x14c   : > { %6205 = shalt.err (!%p6202_p4)
}
 0x14d   : > { %5583 = dma.hbm_to_vmem [thread:$0]  (!%p6569_p6), %s8426_s14, 16, %s6785_s22, [#allocation18]  }
 0x14e   : > { %s6402_s26 = smov [#allocation22]   ;;  %s6403_s2 = smov [#allocation25]  }
 0x14f   : > { %s714_s5 = sshll.u32 %s6402_s26, 4  ;;  %s744_s18 = sshll.u32 %s6403_s2, 4  ;;  %s715_s5 = int_to_ptr.vmem [resolvable:$true] %s714_s5  ;;  %s6832_s18 = int_to_ptr.vmem [resolvable:$true] %s744_s18 }
 0x150   : > { %s6206_s3 = scalar_lea.hbm %s8428_s16, 512 }
 0x151   : > { %p6207_p13 = scmp.ne.s32.totalorder %s8428_s16, %s6206_s3  ;;  %p6213_p3 = scmp.lt.u32.totalorder %s6206_s3, %s8428_s16 }
 0x153   : > { %p6209_p0 = pnand %p6207_p13, %p6585_p8 }
 0x155   : > { %p6210_p1 = pneg %p6209_p0 }
 0x157   : > { %p6215_p2 = pnand %p6213_p3, %p6210_p1 }
 0x159   : > { %6218 = shalt.err (!%p6215_p2)
}
 0x15a   : > { %s6219_s4 = scalar_lea.vmem %s715_s5, 512  ;;  %p6227_p10 = scmp.lt.s32.totalorder %s715_s5, %s715_s5 }
 0x15b   : > { %p6220_p5 = scmp.ne.s32.totalorder %s715_s5, %s6219_s4  ;;  %p6228_p11 = scmp.lt.s32.totalorder %s6219_s4, %s6219_s4 }
 0x15d   : > { %p6222_p7 = pnand %p6220_p5, %p6585_p8  ;;  %p6229_p12 = por %p6228_p11, %p6227_p10 }
 0x15f   : > { %p6223_p9 = pneg %p6222_p7 }
 0x161   : > { %p6230_p4 = pnand %p6229_p12, %p6223_p9 }
 0x163   : > { %6233 = shalt.err (!%p6230_p4)
}
 0x164   : > { %5589 = dma.hbm_to_vmem [thread:$0]  (!%p6569_p6), %s8428_s16, 512, %s715_s5, [#allocation21], %s6398_s23, %s6398_s23, %s6399_s19  }
 0x165   : > { %s6234_s3 = scalar_lea.hbm %s8432_s20, 512 }
 0x166   : > { %p6235_p13 = scmp.ne.s32.totalorder %s8432_s20, %s6234_s3  ;;  %p6241_p3 = scmp.lt.u32.totalorder %s6234_s3, %s8432_s20 }
 0x168   : > { %p6237_p0 = pnand %p6235_p13, %p6585_p8 }
 0x16a   : > { %p6238_p1 = pneg %p6237_p0 }
 0x16c   : > { %p6243_p2 = pnand %p6241_p3, %p6238_p1 }
 0x16e   : > { %6246 = shalt.err (!%p6243_p2)
}
 0x16f   : > { %s6247_s5 = scalar_lea.vmem %s6832_s18, 512  ;;  %p6255_p10 = scmp.lt.s32.totalorder %s6832_s18, %s6832_s18 }
 0x170   : > { %p6248_p5 = scmp.ne.s32.totalorder %s6832_s18, %s6247_s5  ;;  %p6256_p11 = scmp.lt.s32.totalorder %s6247_s5, %s6247_s5 }
 0x172   : > { %p6250_p7 = pnand %p6248_p5, %p6585_p8  ;;  %p6257_p12 = por %p6256_p11, %p6255_p10 }
 0x174   : > { %p6251_p9 = pneg %p6250_p7 }
 0x176   : > { %p6258_p4 = pnand %p6257_p12, %p6251_p9 }
 0x178   : > { %6261 = shalt.err (!%p6258_p4)
}
 0x179   : > { %s8491_s7 = sld [smem:[#allocation36_spill]]  ;;  %s8492_s2 = sld [smem:[#allocation37_spill]] }
 0x17a   : > { %5595 = dma.hbm_to_vmem [thread:$0]  (!%p6569_p6), %s8432_s20, 512, %s6832_s18, [#allocation24], %s6398_s23, %s6398_s23, %s6399_s19  }
 0x17b   : > { %s4410_s29 = sadd.s32 4294967294, %s6386_s25   ;;  %s6883_s27 = sadd.s32 1, %s6386_s25  }
 0x17c   : > { %s50_s6 = ssub.s32 %s6386_s25, %s6883_s27  ;;  %s53_s3 = sadd.s32 1, %s6382_s24 }
 0x17d   : > { %p51_p8 = scmp.eq.s32.totalorder %s50_s6, 0  ;;  %p60_p13 = scmp.ne.s32.totalorder %s6382_s24, %s6378_s30 }
 0x17e   : > { %p61_p0 = scmp.eq.s32.totalorder %s6386_s25, 0  ;;  %p558_p7 = scmp.eq.s32.totalorder %s4410_s29, 1 }
 0x17f   : > { %p66_p1 = scmp.ne.s32.totalorder %s6378_s30, %s8491_s7  ;;  %p8494_p2 = scmp.eq.s32.totalorder %s8492_s2, 0 }
 0x180   : > { %s6894_s28 = scalar_select %p51_p8, %s6382_s24, %s53_s3  }
 0x181   : > { %p6896_p3 = por %p61_p0, %p60_p13  ;;  %p6902_p6 = por %p8494_p2, %p66_p1 }
 0x182   : > { %p552_p5 = scmp.eq.s32.totalorder %s8492_s2, 1  ;;  %p5618_p9 = scmp.lt.s32.totalorder %s6386_s25, 2 }
 0x183   : > { %s764_s19 = sand.u32 1, %s6382_s24   ;;  %p6913_p11 = por %p558_p7, %p66_p1 }
 0x184   : > { %p6909_p10 = por %p552_p5, %p60_p13  ;;  %s4427_s22 = sshll.u32 %s764_s19, 7 }
 0x185   : > { %s8497_s0 = scalar_select %p6913_p11, 1, 0 }
 0x186   : > { %s8496_s18 = scalar_select %p6909_p10, 1, 0 }
 0x187   : > { %s4619_s5 = sshll.u32 %s6386_s25, 11  ;;  %s8498_s7 = sld [smem:[#allocation42_spill]] }
 0x188   : > { %s768_s2 = scalar_lea.vmem [#allocation2], %s4427_s22  ;;  %p6927_p12 = pnand %p5618_p9, %p6896_p3 }
 0x189   : > { %s776_s29 = sshll.u32 %s768_s2, 4  ;;  %s6931_s8 = scalar_lea.sflag [#allocation3], %s764_s19  ;;  %s6923_s29 = int_to_ptr.vmem [resolvable:$true] %s776_s29 }
 0x18a   : > { %p6264_p8 = pneg %p6927_p12 }
 0x18d   : > { %s6921_s6 = scalar_lea.hbm %s8498_s7, %s4619_s5  ;;  %s6267_s1 = scalar_lea.hbm %s8498_s7, 4096 }
 0x18e   : > { %s6262_s4 = scalar_lea.hbm %s6921_s6, 2048  ;;  %p6268_p1 = scmp.lt.u32.totalorder %s6921_s6, %s8498_s7 }
 0x18f   : > { %p6263_p4 = scmp.ne.s32.totalorder %s6921_s6, %s6262_s4  ;;  %p6269_p3 = scmp.lt.u32.totalorder %s6267_s1, %s6262_s4 }
 0x190   : > { %p6271_p5 = scmp.lt.u32.totalorder %s6262_s4, %s6921_s6 }
 0x191   : > { %p6265_p13 = pnand %p6264_p8, %p6263_p4  ;;  %p6270_p2 = por %p6269_p3, %p6268_p1 }
 0x193   : > { %p6266_p0 = pneg %p6265_p13  ;;  %p6272_p7 = por %p6271_p5, %p6270_p2 }
 0x195   : > { %p6273_p9 = pnand %p6272_p7, %p6266_p0 }
 0x197   : > { %6276 = shalt.err (!%p6273_p9)
}
 0x198   : > { %s6277_s19 = scalar_lea.vmem %s6923_s29, 2048  ;;  %s6404_s22 = smov [#allocation2]  }
 0x199   : > { %p6278_p4 = scmp.ne.s32.totalorder %s6923_s29, %s6277_s19  ;;  %s6282_s5 = sshll.u32 %s6404_s22, 4  ;;  %s6283_s5 = int_to_ptr.vmem [resolvable:$false] %s6282_s5 }
 0x19a   : > { %s6284_s26 = scalar_lea.vmem %s6283_s5, 4096  ;;  %p6285_p10 = scmp.lt.s32.totalorder %s6923_s29, %s6283_s5 }
 0x19b   : > { %p6280_p13 = pnand %p6278_p4, %p6264_p8  ;;  %p6286_p1 = scmp.lt.s32.totalorder %s6284_s26, %s6277_s19 }
 0x19d   : > { %p6281_p11 = pneg %p6280_p13  ;;  %p6287_p3 = por %p6286_p1, %p6285_p10 }
 0x19f   : > { %p6288_p2 = pnand %p6287_p3, %p6281_p11 }
 0x1a1   : > { %6291 = shalt.err (!%p6288_p2)
}
 0x1a2   : > { %s6405_s4 = smov 128   ;;  %s6406_s1 = smov 8  }
 0x1a3   : > { %5599 = dma.hbm_to_vmem [thread:$0]  (!%p6927_p12), %s6921_s6, 2048, %s6923_s29, %s6931_s8, %s6405_s4, %s6405_s4, %s6406_s1  }
 0x1a4   : > { %s8500_s2 = sld [smem:[#allocation38_spill]] }
 0x1aa   : > { %p8501_p8 = scmp.ne.s32.totalorder %s8500_s2, 0 }
 0x1ac   : > { %788 = sbr.rel (%p8501_p8) target bundleno = 2959 (0xb8f), region = 112 }
 0x1b3   : > { %s6962_s22 = sand.u32 1, %s6378_s30  }
 0x1b4   : > { %s8455_s19 = sshll.u32 %s6962_s22, 7  ;;  %s791_s5 = scalar_lea.sflag [#allocation3], %s6962_s22 }
 0x1b5   : > { %s6968_s26 = scalar_lea.vmem [#allocation2], %s8455_s19 }
 0x1b6   : > { %6337 = dma.done.wait (%p6902_p6), %s791_s5, 2048  }
 0x1b7   : > { %6339 = vsyncadd (%p6902_p6), %s791_s5, 4294965248  ;;  %s8502_s8 = sld [smem:[#allocation37_spill]] }
 0x1bd   : > { %p8503_p10 = scmp.eq.s32.totalorder %s8502_s8, 0 }
 0x1bf   : > { %6341 = dma.done.wait (%p8503_p10), [#allocation6], 32   ;;  %p8504_p11 = pmov %p8503_p10 }
 0x1c0   : > { %p8505_p12 = pmov %p8503_p10 }
 0x1c1   : > { %6343 = vsyncadd (%p8504_p11), [#allocation6], 4294967264 }
 0x1c2   : > { %6345 = dma.done.wait (%p8505_p12), [#allocation9], 32   ;;  %p8506_p0 = pmov %p8503_p10 }
 0x1c4   : > { %6347 = vsyncadd (%p8506_p0), [#allocation9], 4294967264  ;;  %p8507_p5 = pmov %p8506_p0 }
 0x1c5   : > { %p8508_p7 = pmov %p8506_p0 }
 0x1c6   : > { %6349 = dma.done.wait (%p8507_p5), [#allocation12], 528  }
 0x1c7   : > { %6351 = vsyncadd (%p8508_p7), [#allocation12], 4294966768  ;;  %p8509_p6 = pmov %p8506_p0 }
 0x1c8   : > { %p8510_p9 = pmov %p8506_p0 }
 0x1c9   : > { %6353 = dma.done.wait (%p8509_p6), [#allocation15], 528  }
 0x1ca   : > { %6355 = vsyncadd (%p8510_p9), [#allocation15], 4294966768  ;;  %p8511_p4 = pmov %p8506_p0 }
 0x1cb   : > { %p8512_p13 = pmov %p8506_p0 }
 0x1cc   : > { %6357 = dma.done.wait (%p8511_p4), [#allocation18], 32  }
 0x1cd   : > { %6359 = vsyncadd (%p8512_p13), [#allocation18], 4294967264  ;;  %p8513_p1 = pmov %p8506_p0 }
 0x1ce   : > { %p8514_p3 = pmov %p8506_p0 }
 0x1cf   : > { %6361 = dma.done.wait (%p8513_p1), [#allocation21], 528  }
 0x1d0   : > { %6363 = vsyncadd (%p8514_p3), [#allocation21], 4294966768  ;;  %p8515_p2 = pmov %p8506_p0 }
 0x1d1   : > { %p8516_p8 = pmov %p8506_p0 }
 0x1d2   : > { %6365 = dma.done.wait (%p8515_p2), [#allocation24], 528  }
 0x1d3   : > { %6367 = vsyncadd (%p8516_p8), [#allocation24], 4294966768  ;;  %s8517_s29 = sld [smem:[#allocation43_spill]]  ;;  %v5694_v4 = vld [vmem:[%s6968_s26 + $0x4] ss:$8 sps:$4 sm:$0xff]   ;;  %s8518_s7 = sld [smem:[#allocation46_spill]] }
 0x1d4   : > { %4893 = vmatprep.mubr.bf16.mxu0 %v5694_v4  ;;  %v5695_v23 = vld [vmem:[%s6968_s26 + $0x14] ss:$8 sps:$4 sm:$0xff]   ;;  %v5696_v26 = vld [vmem:[%s6968_s26 + $0x24] ss:$8 sps:$4 sm:$0xff]   ;;  %s8519_s3 = sld [smem:[#allocation48_spill]]  ;;  %s8520_s23 = sld [smem:[#allocation47_spill]] }
 0x1d5   : > { %v5697_v31 = vld [vmem:[%s6968_s26 + $0x34] ss:$8 sps:$4 sm:$0xff]   ;;  %v5698_v32 = vld [vmem:[%s6968_s26 + $0x44] ss:$8 sps:$4 sm:$0xff]   ;;  %vm2064_vm0 = vcmask 523264   ;;  %s8521_s10 = sld [smem:[#allocation56_spill]] }
 0x1d6   : > { %v5699_v34 = vld [vmem:[%s6968_s26 + $0x54] ss:$8 sps:$4 sm:$0xff]   ;;  %v5700_v35 = vld [vmem:[%s6968_s26 + $0x64] ss:$8 sps:$4 sm:$0xff]   ;;  %s8527_s19 = sld [smem:[#allocation53_spill]]  ;;  %s8528_s9 = sld [smem:[#allocation54_spill]] }
 0x1d7   : > { %v5701_v36 = vld [vmem:[%s6968_s26 + $0x74] ss:$8 sps:$4 sm:$0xff]   ;;  %s4620_s2 = sshll.u32 %s8502_s8, 11  ;;  %p8536_p11 = scmp.ne.s32.totalorder %s8496_s18, 0 }
 0x1d9   : > { %v5686_v0 = vld [vmem:[%s8517_s29] sm:$0xff]   ;;  %v5687_v1 = vld [vmem:[%s8517_s29 + $0x8] sm:$0xff]   ;;  %v5688_v2 = vld [vmem:[%s8517_s29 + $0x10] sm:$0xff]  }
 0x1da   : > { %4877 = vmatprep.subr.bf16.mxu0 %v5686_v0  ;;  %v5689_v3 = vld [vmem:[%s8517_s29 + $0x18] sm:$0xff]   ;;  %v5690_v5 = vld [vmem:[%s8517_s29 + $0x20] sm:$0xff]   ;;  %v5691_v6 = vld [vmem:[%s8517_s29 + $0x28] sm:$0xff]  }
 0x1db   : > { %4878 = vmatpush3.bf16.msra.mxu0 %v5686_v0  ;;  %v1167_v7 = vld [vmem:[%s8518_s7] sm:$0xff]  ;;  %v1168_v8 = vld [vmem:[%s8518_s7 + $0x8] sm:$0xff]  ;;  %v1169_v9 = vld [vmem:[%s8518_s7 + $0x10] sm:$0xff] }
 0x1dc   : > { %4879 = vmatprep.subr.bf16.mxu0 %v5687_v1  ;;  %v5341_v10 = vpack.c.bf16 %v1168_v8, %v1167_v7  ;;  %v1170_v11 = vld [vmem:[%s8518_s7 + $0x18] sm:$0xff]  ;;  %v1171_v13 = vld [vmem:[%s8518_s7 + $0x20] sm:$0xff]  ;;  %v1172_v14 = vld [vmem:[%s8518_s7 + $0x28] sm:$0xff] }
 0x1dd   : > { %v5345_v12 = vpack.c.bf16 %v1170_v11, %v1169_v9  ;;  %v5692_v15 = vld [vmem:[%s8517_s29 + $0x30] sm:$0xff]   ;;  %v1174_v17 = vld [vmem:[%s8518_s7 + $0x38] sm:$0xff]  ;;  %v5349_v18 = vpack.c.bf16 %v1172_v14, %v1171_v13  ;;  %v1175_v20 = vld [vmem:[%s8518_s7 + $0x40] sm:$0xff] }
 0x1de   : > { %5342 = vmatprep.subr.bf16.mxu1 %v5341_v10  ;;  %v1173_v16 = vld [vmem:[%s8518_s7 + $0x30] sm:$0xff]  ;;  %v5693_v19 = vld [vmem:[%s8517_s29 + $0x38] sm:$0xff]   ;;  %v1176_v21 = vld [vmem:[%s8518_s7 + $0x48] sm:$0xff] }
 0x1df   : > { %4880 = vmatpush3.bf16.msra.mxu0 %v5687_v1  ;;  %5344 = vmatpush3.bf16.msra.mxu1 %v5341_v10  ;;  %v5353_v22 = vpack.c.bf16 %v1174_v17, %v1173_v16  ;;  %v1177_v24 = vld [vmem:[%s8518_s7 + $0x50] sm:$0xff]  ;;  %v1178_v25 = vld [vmem:[%s8518_s7 + $0x58] sm:$0xff]  ;;  %v5357_v27 = vpack.c.bf16 %v1176_v21, %v1175_v20  ;;  %v1179_v28 = vld [vmem:[%s8518_s7 + $0x60] sm:$0xff] }
 0x1e0   : > { %4881 = vmatprep.subr.bf16.mxu0 %v5688_v2  ;;  %5346 = vmatprep.subr.bf16.mxu1 %v5345_v12  ;;  %v1180_v29 = vld [vmem:[%s8518_s7 + $0x68] sm:$0xff]  ;;  %v5361_v30 = vpack.c.bf16 %v1178_v25, %v1177_v24  ;;  %v1181_v37 = vld [vmem:[%s8518_s7 + $0x70] sm:$0xff]  ;;  %v1182_v38 = vld [vmem:[%s8518_s7 + $0x78] sm:$0xff]  ;;  %s8533_s7 = sld [smem:[#allocation55_spill]] }
 0x1e1   : > { %v5365_v33 = vpack.c.bf16 %v1180_v29, %v1179_v28  ;;  %v5369_v39 = vpack.c.bf16 %v1182_v38, %v1181_v37  ;;  %v5702_v8 = vld [vmem:[%s8519_s3] sm:$0xff]   ;;  %v5703_v9 = vld [vmem:[%s8519_s3 + $0x8] sm:$0xff]   ;;  %v5705_v11 = vld [vmem:[%s8519_s3 + $0x18] sm:$0xff]  }
 0x1e2   : > { %v5707_v13 = vld [vmem:[%s8519_s3 + $0x28] sm:$0xff]   ;;  %v5708_v14 = vld [vmem:[%s8519_s3 + $0x30] sm:$0xff]   ;;  %v7189_v16 = vld [vmem:[%s8520_s23] sm:$0xff]  }
 0x1e3   : > { %4882 = vmatpush3.bf16.msra.mxu0 %v5688_v2  ;;  %5348 = vmatpush3.bf16.msra.mxu1 %v5345_v12 }
 0x1e4   : > { %4883 = vmatprep.subr.bf16.mxu0 %v5689_v3  ;;  %5350 = vmatprep.subr.bf16.mxu1 %v5349_v18 }
 0x1e7   : > { %4884 = vmatpush3.bf16.msra.mxu0 %v5689_v3  ;;  %5352 = vmatpush3.bf16.msra.mxu1 %v5349_v18 }
 0x1e8   : > { %4885 = vmatprep.subr.bf16.mxu0 %v5690_v5  ;;  %5354 = vmatprep.subr.bf16.mxu1 %v5353_v22 }
 0x1eb   : > { %4886 = vmatpush3.bf16.msra.mxu0 %v5690_v5  ;;  %5356 = vmatpush3.bf16.msra.mxu1 %v5353_v22 }
 0x1ec   : > { %4887 = vmatprep.subr.bf16.mxu0 %v5691_v6  ;;  %5358 = vmatprep.subr.bf16.mxu1 %v5357_v27 }
 0x1ef   : > { %4888 = vmatpush3.bf16.msra.mxu0 %v5691_v6  ;;  %5360 = vmatpush3.bf16.msra.mxu1 %v5357_v27 }
 0x1f0   : > { %4889 = vmatprep.subr.bf16.mxu0 %v5692_v15  ;;  %5362 = vmatprep.subr.bf16.mxu1 %v5361_v30 }
 0x1f3   : > { %4890 = vmatpush3.bf16.msra.mxu0 %v5692_v15  ;;  %5364 = vmatpush3.bf16.msra.mxu1 %v5361_v30  ;;  %v5709_v15 = vld [vmem:[%s8519_s3 + $0x38] sm:$0xff]  }
 0x1f4   : > { %4891 = vmatprep.subr.bf16.mxu0 %v5693_v19  ;;  %5366 = vmatprep.subr.bf16.mxu1 %v5365_v33 }
 0x1f7   : > { %4892 = vmatpush3.bf16.msra.mxu0 %v5693_v19  ;;  %5368 = vmatpush3.bf16.msra.mxu1 %v5365_v33 }
 0x1f8   : > { %5374 = vmatprep.subr.bf16.mxu0 %v5341_v10  ;;  %5370 = vmatprep.subr.bf16.mxu1 %v5369_v39 }
 0x1fa   : > { %4894 = vmatmul.mubr.bf16.vlgmr.msra.gmra.mrb[0].mxu0 %v5695_v23 }
 0x1fb   : > { %4897 = vmatprep.mubr.bf16.mxu0 %v5696_v26  ;;  %5376 = vmatpush3.bf16.msra.mxu0 %v5341_v10  ;;  %v5704_v10 = vld [vmem:[%s8519_s3 + $0x10] sm:$0xff]  }
 0x1fc   : > { %5378 = vmatprep.subr.bf16.mxu0 %v5345_v12  ;;  %5372 = vmatpush3.bf16.msra.mxu1 %v5369_v39 }
 0x1fd   : > { %5021 = vmatprep.subr.bf16.mxu1 %v5702_v8 }
 0x1ff   : > { %5380 = vmatpush3.bf16.msra.mxu0 %v5345_v12  ;;  %v5706_v12 = vld [vmem:[%s8519_s3 + $0x20] sm:$0xff]   ;;  %s8534_s3 = sshll.u32 %s6962_s22, 7 }
 0x200   : > { %5382 = vmatprep.subr.bf16.mxu0 %v5349_v18  ;;  %s8343_s1 = scalar_lea.vmem [#allocation26], %s8534_s3 }
 0x202   : > { %4898 = vmatmul.mubr.bf16.gmra.mrb[4].mxu0 %v5697_v31 }
 0x203   : > { %4901 = vmatprep.mubr.bf16.mxu0 %v5698_v32  ;;  %5384 = vmatpush3.bf16.msra.mxu0 %v5349_v18 }
 0x204   : > { %5386 = vmatprep.subr.bf16.mxu0 %v5353_v22 }
 0x207   : > { %5388 = vmatpush3.bf16.msra.mxu0 %v5353_v22 }
 0x208   : > { %5390 = vmatprep.subr.bf16.mxu0 %v5357_v27 }
 0x20a   : > { %4902 = vmatmul.mubr.bf16.gmra.mrb[8].mxu0 %v5699_v34 }
 0x20b   : > { %4905 = vmatprep.mubr.bf16.mxu0 %v5700_v35  ;;  %5392 = vmatpush3.bf16.msra.mxu0 %v5357_v27 }
 0x20c   : > { %5394 = vmatprep.subr.bf16.mxu0 %v5361_v30 }
 0x20f   : > { %5396 = vmatpush3.bf16.msra.mxu0 %v5361_v30 }
 0x210   : > { %5398 = vmatprep.subr.bf16.mxu0 %v5365_v33 }
 0x212   : > { %4906 = vmatmul.mubr.bf16.gmra.mrb[12].mxu0 %v5701_v36 }
 0x213   : > { %5400 = vmatpush3.bf16.msra.mxu0 %v5365_v33 }
 0x214   : > { %5402 = vmatprep.subr.bf16.mxu0 %v5369_v39 }
 0x217   : > { %5404 = vmatpush3.bf16.msra.mxu0 %v5369_v39 }
 0x2cd   : > { %v7082_v40 = vpop.f32.mrb[0].mxu0 }
 0x2ce   : > { %v7084_v41 = vpop.f32.mrb[1].mxu0  ;;  %v1330_v46 = vmul.f32 %v7082_v40, %v7082_v40 }
 0x2cf   : > { %v1328_v42 = vmul.f32 %v7084_v41, %v7084_v41  ;;  %v7088_v43 = vpop.f32.mrb[2].mxu0  ;;  %4941 = vmatprep.mubr.f32.mxu1 %v7084_v41 }
 0x2d0   : > { %v7091_v44 = vpop.f32.mrb[3].mxu0  ;;  %v1331_v47 = vmul.f32 %v7088_v43, %v7088_v43 }
 0x2d1   : > { %v1329_v45 = vmul.f32 %v7091_v44, %v7091_v44  ;;  %4942 = vmatmul.mubr.f32.vlgmr.msra.gmra.mrb[0].mxu1 %v7091_v44  ;;  %4997 = vmatprep.mubr.f32.mxu0 %v1328_v42 }
 0x2d2   : > { %4944 = vmatprep.mubr.f32.mxu1 %v7082_v40  ;;  %5022 = vmatpush3.bf16.msra.mxu1 %v5702_v8 }
 0x2d3   : > { %4998 = vmatmul.mubr.f32.vlgmr.msra.gmra.mrb[16].mxu0 %v1329_v45  ;;  %5023 = vmatprep.subr.bf16.mxu1 %v5703_v9 }
 0x2d4   : > { %5000 = vmatprep.mubr.f32.mxu0 %v1330_v46 }
 0x2d5   : > { %v7101_v48 = vpop.f32.mrb[4].mxu0  ;;  %4945 = vmatmul.mubr.f32.gmra.mrb[2].mxu1 %v7088_v43 }
 0x2d6   : > { %v7104_v49 = vpop.f32.mrb[5].mxu0  ;;  %v1334_v54 = vmul.f32 %v7101_v48, %v7101_v48  ;;  %5024 = vmatpush3.bf16.msra.mxu1 %v5703_v9 }
 0x2d7   : > { %v1332_v50 = vmul.f32 %v7104_v49, %v7104_v49  ;;  %v7108_v51 = vpop.f32.mrb[6].mxu0  ;;  %4947 = vmatprep.mubr.f32.mxu1 %v7104_v49  ;;  %5001 = vmatmul.mubr.f32.gmra.mrb[18].mxu0 %v1331_v47 }
 0x2d8   : > { %v7111_v52 = vpop.f32.mrb[7].mxu0  ;;  %v1335_v55 = vmul.f32 %v7108_v51, %v7108_v51  ;;  %5025 = vmatprep.subr.bf16.mxu1 %v5704_v10 }
 0x2d9   : > { %v1333_v53 = vmul.f32 %v7111_v52, %v7111_v52  ;;  %4948 = vmatmul.mubr.f32.gmra.mrb[4].mxu1 %v7111_v52  ;;  %5003 = vmatprep.mubr.f32.mxu0 %v1332_v50 }
 0x2da   : > { %4950 = vmatprep.mubr.f32.mxu1 %v7101_v48  ;;  %5026 = vmatpush3.bf16.msra.mxu1 %v5704_v10 }
 0x2db   : > { %5004 = vmatmul.mubr.f32.gmra.mrb[20].mxu0 %v1333_v53  ;;  %5027 = vmatprep.subr.bf16.mxu1 %v5705_v11 }
 0x2dc   : > { %5006 = vmatprep.mubr.f32.mxu0 %v1334_v54 }
 0x2dd   : > { %v7121_v56 = vpop.f32.mrb[8].mxu0  ;;  %4951 = vmatmul.mubr.f32.gmra.mrb[6].mxu1 %v7108_v51 }
 0x2de   : > { %v7124_v57 = vpop.f32.mrb[9].mxu0  ;;  %v1338_v62 = vmul.f32 %v7121_v56, %v7121_v56  ;;  %5028 = vmatpush3.bf16.msra.mxu1 %v5705_v11 }
 0x2df   : > { %v1336_v58 = vmul.f32 %v7124_v57, %v7124_v57  ;;  %v7128_v59 = vpop.f32.mrb[10].mxu0  ;;  %4953 = vmatprep.mubr.f32.mxu1 %v7124_v57  ;;  %5007 = vmatmul.mubr.f32.gmra.mrb[22].mxu0 %v1335_v55 }
 0x2e0   : > { %v7131_v60 = vpop.f32.mrb[11].mxu0  ;;  %v1339_v63 = vmul.f32 %v7128_v59, %v7128_v59  ;;  %5029 = vmatprep.subr.bf16.mxu1 %v5706_v12 }
 0x2e1   : > { %v1337_v61 = vmul.f32 %v7131_v60, %v7131_v60  ;;  %4954 = vmatmul.mubr.f32.gmra.mrb[8].mxu1 %v7131_v60  ;;  %5009 = vmatprep.mubr.f32.mxu0 %v1336_v58 }
 0x2e2   : > { %4956 = vmatprep.mubr.f32.mxu1 %v7121_v56  ;;  %5030 = vmatpush3.bf16.msra.mxu1 %v5706_v12 }
 0x2e3   : > { %5010 = vmatmul.mubr.f32.gmra.mrb[24].mxu0 %v1337_v61  ;;  %5031 = vmatprep.subr.bf16.mxu1 %v5707_v13 }
 0x2e4   : > { %5012 = vmatprep.mubr.f32.mxu0 %v1338_v62 }
 0x2e5   : > { %v7141_v0 = vpop.f32.mrb[12].mxu0  ;;  %4957 = vmatmul.mubr.f32.gmra.mrb[10].mxu1 %v7128_v59 }
 0x2e6   : > { %v7144_v1 = vpop.f32.mrb[13].mxu0  ;;  %v1342_v6 = vmul.f32 %v7141_v0, %v7141_v0  ;;  %5032 = vmatpush3.bf16.msra.mxu1 %v5707_v13 }
 0x2e7   : > { %v1340_v2 = vmul.f32 %v7144_v1, %v7144_v1  ;;  %v7148_v3 = vpop.f32.mrb[14].mxu0  ;;  %4959 = vmatprep.mubr.f32.mxu1 %v7144_v1  ;;  %5013 = vmatmul.mubr.f32.gmra.mrb[26].mxu0 %v1339_v63 }
 0x2e8   : > { %v7151_v4 = vpop.f32.mrb[15].mxu0  ;;  %v1343_v7 = vmul.f32 %v7148_v3, %v7148_v3  ;;  %5033 = vmatprep.subr.bf16.mxu1 %v5708_v14 }
 0x2e9   : > { %v1341_v5 = vmul.f32 %v7151_v4, %v7151_v4  ;;  %4960 = vmatmul.mubr.f32.gmra.mrb[12].mxu1 %v7151_v4  ;;  %5015 = vmatprep.mubr.f32.mxu0 %v1340_v2 }
 0x2ea   : > { %4962 = vmatprep.mubr.f32.mxu1 %v7141_v0  ;;  %5034 = vmatpush3.bf16.msra.mxu1 %v5708_v14 }
 0x2eb   : > { %5016 = vmatmul.mubr.f32.gmra.mrb[28].mxu0 %v1341_v5  ;;  %5035 = vmatprep.subr.bf16.mxu1 %v5709_v15 }
 0x2ec   : > { %5018 = vmatprep.mubr.f32.mxu0 %v1342_v6 }
 0x2ed   : > { %4963 = vmatmul.mubr.f32.gmra.mrb[14].mxu1 %v7148_v3 }
 0x2ee   : > { %5036 = vmatpush3.bf16.msra.mxu1 %v5709_v15 }
 0x2ef   : > { %5019 = vmatmul.mubr.f32.gmra.mrb[30].mxu0 %v1343_v7  ;;  %5053 = vmatprep.subr.bf16.mxu1 %v7189_v16 }
 0x3a4   : > { %v7192_v17 = vpop.f32.mrb[0].mxu1 }
 0x3a5   : > { %v1490_v18 = vmul.f32 %v7192_v17, %v7192_v17  ;;  %v1538_v19 = vsub.f32 %v7091_v44, %v7192_v17  ;;  %v7198_v20 = vpop.f32.mrb[1].mxu1 }
 0x3a6   : > { %v1489_v21 = vmul.f32 %v7198_v20, %v7198_v20  ;;  %v1537_v22 = vsub.f32 %v7084_v41, %v7198_v20  ;;  %v4999_v23 = vpop.f32.mrb[16].mxu0 }
 0x3a7   : > { %v1506_v24 = vsub.f32 %v4999_v23, %v1490_v18  ;;  %v1410_v25 = vpop.f32.mrb[17].mxu0 }
 0x3a8   : > { %v1505_v26 = vsub.f32 %v1410_v25, %v1489_v21  ;;  %v7204_v27 = vpop.f32.mrb[2].mxu1 }
 0x3a9   : > { %v1522_v28 = vmax.f32 %v1506_v24, 0.0  ;;  %v1492_v29 = vmul.f32 %v7204_v27, %v7204_v27  ;;  %v1540_v30 = vsub.f32 %v7088_v43, %v7204_v27  ;;  %v7210_v31 = vpop.f32.mrb[3].mxu1 }
 0x3aa   : > { %v1521_v32 = vmax.f32 %v1505_v26, 0.0  ;;  %v1491_v33 = vmul.f32 %v7210_v31, %v7210_v31  ;;  %v1539_v34 = vsub.f32 %v7082_v40, %v7210_v31  ;;  %v5002_v35 = vpop.f32.mrb[18].mxu0 }
 0x3ab   : > { %v1554_v36 = vadd.f32 1e-05, %v1522_v28  ;;  %v1508_v37 = vsub.f32 %v5002_v35, %v1492_v29  ;;  %v1420_v38 = vpop.f32.mrb[19].mxu0 }
 0x3ac   : > { %v1553_v39 = vadd.f32 1e-05, %v1521_v32  ;;  %v1507_v42 = vsub.f32 %v1420_v38, %v1491_v33  ;;  %v7216_v45 = vpop.f32.mrb[4].mxu1 }
 0x3ad   : > { %5742 = vrsqrt.f32 %v1554_v36  ;;  %v1524_v46 = vmax.f32 %v1508_v37, 0.0  ;;  %v1494_v47 = vmul.f32 %v7216_v45, %v7216_v45  ;;  %v1542_v50 = vsub.f32 %v7111_v52, %v7216_v45  ;;  %v7222_v53 = vpop.f32.mrb[5].mxu1 }
 0x3ae   : > { %5744 = vrsqrt.f32 %v1553_v39  ;;  %v1523_v54 = vmax.f32 %v1507_v42, 0.0  ;;  %v1493_v55 = vmul.f32 %v7222_v53, %v7222_v53  ;;  %v1541_v58 = vsub.f32 %v7104_v49, %v7222_v53  ;;  %v5005_v61 = vpop.f32.mrb[20].mxu0  ;;  %v5711_v49 = vld [vmem:[%s8520_s23 + $0x8] sm:$0xff]  }
 0x3af   : > { %v1556_v62 = vadd.f32 1e-05, %v1524_v46  ;;  %v1510_v63 = vsub.f32 %v5005_v61, %v1494_v47  ;;  %v1430_v2 = vpop.f32.mrb[21].mxu0 }
 0x3b0   : > { %v1555_v5 = vadd.f32 1e-05, %v1523_v54  ;;  %v1509_v6 = vsub.f32 %v1430_v2, %v1493_v55  ;;  %v7228_v7 = vpop.f32.mrb[6].mxu1  ;;  %v7257_v2 = vld [vmem:[#allocation5] ss:$0 sm:$0xff] }
 0x3b1   : > { %5746 = vrsqrt.f32 %v1556_v62  ;;  %v1526_v8 = vmax.f32 %v1510_v63, 0.0  ;;  %v1496_v9 = vmul.f32 %v7228_v7, %v7228_v7  ;;  %v1544_v10 = vsub.f32 %v7108_v51, %v7228_v7  ;;  %v7234_v11 = vpop.f32.mrb[7].mxu1 }
 0x3b2   : > { %5748 = vrsqrt.f32 %v1555_v5  ;;  %v1525_v12 = vmax.f32 %v1509_v6, 0.0  ;;  %v1495_v13 = vmul.f32 %v7234_v11, %v7234_v11  ;;  %v1543_v14 = vsub.f32 %v7101_v48, %v7234_v11  ;;  %v5008_v15 = vpop.f32.mrb[22].mxu0 }
 0x3b3   : > { %v1512_v18 = vsub.f32 %v5008_v15, %v1496_v9  ;;  %v1440_v21 = vpop.f32.mrb[23].mxu0  ;;  %v1558_v26 = vadd.f32 1e-05, %v1526_v8 }
 0x3b4   : > { %v1557_v23 = vadd.f32 1e-05, %v1525_v12  ;;  %v1511_v24 = vsub.f32 %v1440_v21, %v1495_v13  ;;  %v7240_v25 = vpop.f32.mrb[8].mxu1 }
 0x3b5   : > { %v1528_v28 = vmax.f32 %v1512_v18, 0.0  ;;  %v1498_v29 = vmul.f32 %v7240_v25, %v7240_v25  ;;  %v1546_v32 = vsub.f32 %v7131_v60, %v7240_v25  ;;  %v7246_v33 = vpop.f32.mrb[9].mxu1 }
 0x3b6   : > { %v1527_v35 = vmax.f32 %v1511_v24, 0.0  ;;  %v1497_v36 = vmul.f32 %v7246_v33, %v7246_v33  ;;  %v1545_v37 = vsub.f32 %v7124_v57, %v7246_v33  ;;  %v5011_v38 = vpop.f32.mrb[24].mxu0  ;;  %5750 = vrsqrt.f32 %v1557_v23  ;;  %v5712_v33 = vld [vmem:[%s8520_s23 + $0x10] sm:$0xff]  }
 0x3b7   : > { %v5743_v39 = vpop.eup %5742  ;;  %v1560_v42 = vadd.f32 1e-05, %v1528_v28  ;;  %v1514_v46 = vsub.f32 %v5011_v38, %v1498_v29  ;;  %v1450_v47 = vpop.f32.mrb[25].mxu0  ;;  %5752 = vrsqrt.f32 %v1558_v26 }
 0x3b8   : > { %v5745_v54 = vpop.eup %5744  ;;  %v1559_v55 = vadd.f32 1e-05, %v1527_v35  ;;  %v1513_v61 = vsub.f32 %v1450_v47, %v1497_v36  ;;  %v7252_v62 = vpop.f32.mrb[10].mxu1  ;;  %v1586_v63 = vmul.f32 %v5743_v39, %v1538_v19 }
 0x3b9   : > { %v1530_v5 = vmax.f32 %v1514_v46, 0.0  ;;  %v1500_v6 = vmul.f32 %v7252_v62, %v7252_v62  ;;  %v1548_v8 = vsub.f32 %v7128_v59, %v7252_v62  ;;  %v7263_v9 = vpop.f32.mrb[11].mxu1  ;;  %5754 = vrsqrt.f32 %v1560_v42 }
 0x3ba   : > { %v1529_v12 = vmax.f32 %v1513_v61, 0.0  ;;  %v1499_v13 = vmul.f32 %v7263_v9, %v7263_v9  ;;  %v1547_v44 = vsub.f32 %v7121_v56, %v7263_v9  ;;  %v5014_v17 = vpop.f32.mrb[26].mxu0  ;;  %5756 = vrsqrt.f32 %v1559_v55  ;;  %v5713_v9 = vld [vmem:[%s8520_s23 + $0x18] sm:$0xff]  }
 0x3bb   : > { %v5747_v19 = vpop.eup %5746  ;;  %v1562_v15 = vadd.f32 1e-05, %v1530_v5  ;;  %v1516_v18 = vsub.f32 %v5014_v17, %v1500_v6  ;;  %v1460_v21 = vpop.f32.mrb[27].mxu0  ;;  %v1585_v23 = vmul.f32 %v5745_v54, %v1537_v22  ;;  %v1608_v36 = vmul.f32 %v7257_v2, %v1586_v63  ;;  %v7285_v22 = vld [vmem:[#allocation7] ss:$0 sm:$0xff] }
 0x3bc   : > { %v5749_v24 = vpop.eup %5748  ;;  %v1588_v26 = vmul.f32 %v5747_v19, %v1540_v30  ;;  %v1561_v28 = vadd.f32 1e-05, %v1529_v12  ;;  %v1515_v29 = vsub.f32 %v1460_v21, %v1499_v13  ;;  %v7275_v35 = vpop.f32.mrb[12].mxu1 }
 0x3bd   : > { %v1587_v38 = vmul.f32 %v5749_v24, %v1539_v34  ;;  %5758 = vrsqrt.f32 %v1562_v15  ;;  %v1532_v39 = vmax.f32 %v1516_v18, 0.0  ;;  %v1502_v41 = vmul.f32 %v7275_v35, %v7275_v35  ;;  %v7283_v20 = vpop.f32.mrb[13].mxu1 }
 0x3be   : > { %v1610_v43 = vmul.f32 %v7257_v2, %v1588_v26  ;;  %5760 = vrsqrt.f32 %v1561_v28  ;;  %v1531_v27 = vmax.f32 %v1515_v29, 0.0  ;;  %v1550_v30 = vsub.f32 %v7151_v4, %v7275_v35  ;;  %v5017_v42 = vpop.f32.mrb[28].mxu0 }
 0x3bf   : > { %v1609_v40 = vmul.f32 %v7257_v2, %v1587_v38  ;;  %v1564_v31 = vadd.f32 1e-05, %v1532_v39  ;;  %v1501_v34 = vmul.f32 %v7283_v20, %v7283_v20  ;;  %v1549_v46 = vsub.f32 %v7144_v1, %v7283_v20  ;;  %v1470_v47 = vpop.f32.mrb[29].mxu0  ;;  %v5714_v1 = vld [vmem:[%s8520_s23 + $0x20] sm:$0xff]  }
 0x3c0   : > { %v1563_v54 = vadd.f32 1e-05, %v1531_v27  ;;  %v1518_v55 = vsub.f32 %v5017_v42, %v1502_v41  ;;  %v7295_v61 = vpop.f32.mrb[14].mxu1  ;;  %v1607_v63 = vmul.f32 %v7257_v2, %v1585_v23  ;;  %v1630_v5 = vadd.f32 %v7285_v22, %v1608_v36  ;;  %v5751_v19 = vpop.eup %5750 }
 0x3c1   : > { %5762 = vrsqrt.f32 %v1564_v31  ;;  %v1517_v6 = vsub.f32 %v1470_v47, %v1501_v34  ;;  %v1504_v12 = vmul.f32 %v7295_v61, %v7295_v61  ;;  %v1552_v13 = vsub.f32 %v7148_v3, %v7295_v61  ;;  %v7303_v17 = vpop.f32.mrb[15].mxu1  ;;  %v5753_v24 = vpop.eup %5752 }
 0x3c2   : > { %5764 = vrsqrt.f32 %v1563_v54  ;;  %v1534_v15 = vmax.f32 %v1518_v55, 0.0  ;;  %v1503_v18 = vmul.f32 %v7303_v17, %v7303_v17  ;;  %v1551_v21 = vsub.f32 %v7141_v0, %v7303_v17  ;;  %v5020_v23 = vpop.f32.mrb[30].mxu0 }
 0x3c3   : > { %v1533_v26 = vmax.f32 %v1517_v6, 0.0  ;;  %v1520_v28 = vsub.f32 %v5020_v23, %v1504_v12  ;;  %v1480_v29 = vpop.f32.mrb[31].mxu0  ;;  %v1629_v36 = vadd.f32 %v7285_v22, %v1607_v63  ;;  %v1646_v38 = vmax.f32 %v1630_v5, 0.0  ;;  %v5755_v39 = vpop.eup %5754 }
 0x3c4   : > { %v1566_v41 = vadd.f32 1e-05, %v1534_v15  ;;  %v1519_v27 = vsub.f32 %v1480_v29, %v1503_v18  ;;  %v1631_v42 = vadd.f32 %v7285_v22, %v1609_v40  ;;  %v1632_v31 = vadd.f32 %v7285_v22, %v1610_v43  ;;  %v5757_v34 = vpop.eup %5756 }
 0x3c5   : > { %v1565_v47 = vadd.f32 1e-05, %v1533_v26  ;;  %v1536_v54 = vmax.f32 %v1520_v28, 0.0  ;;  %v1645_v55 = vmax.f32 %v1629_v36, 0.0  ;;  %v1589_v6 = vmul.f32 %v5751_v19, %v1541_v58 }
 0x3c6   : > { %5766 = vrsqrt.f32 %v1566_v41  ;;  %v1535_v12 = vmax.f32 %v1519_v27, 0.0  ;;  %v1647_v23 = vmax.f32 %v1631_v42, 0.0  ;;  %v1648_v63 = vmax.f32 %v1632_v31, 0.0 }
 0x3c7   : > { %v5759_v5 = vpop.eup %5758  ;;  %5768 = vrsqrt.f32 %v1565_v47  ;;  %v1568_v15 = vadd.f32 1e-05, %v1536_v54  ;;  %v1677_v18 = vpack.c.bf16 %v1646_v38, %v1645_v55  ;;  %v1590_v43 = vmul.f32 %v5753_v24, %v1542_v50 }
 0x3c8   : > { %v5761_v40 = vpop.eup %5760  ;;  %v1567_v26 = vadd.f32 1e-05, %v1535_v12  ;;  %v1678_v28 = vpack.c.bf16 %v1648_v63, %v1647_v23  ;;  %v1611_v53 = vmul.f32 %v7257_v2, %v1589_v6  ;;  %v1591_v58 = vmul.f32 %v5757_v34, %v1543_v14 }
 0x3c9   : > { %5770 = vrsqrt.f32 %v1568_v15  ;;  %5037 = vmatprep.mubr.bf16.mxu1 %v1677_v18  ;;  %v1612_v19 = vmul.f32 %v7257_v2, %v1590_v43  ;;  %v1592_v52 = vmul.f32 %v5755_v39, %v1544_v10  ;;  %v1593_v45 = vmul.f32 %v5761_v40, %v1545_v37 }
 0x3ca   : > { %5772 = vrsqrt.f32 %v1567_v26  ;;  %5038 = vmatmul.mubr.bf16.vlgmr.msra.gmra.mrb[16].mxu1 %v1678_v28  ;;  %v1633_v50 = vadd.f32 %v7285_v22, %v1611_v53  ;;  %v1613_v24 = vmul.f32 %v7257_v2, %v1591_v58  ;;  %v1594_v48 = vmul.f32 %v5759_v5, %v1546_v32  ;;  %v5715_v26 = vld [vmem:[%s8520_s23 + $0x28] sm:$0xff]   ;;  %v5719_v58 = vld [vmem:[%s6968_s26 + $0x10] ss:$8 sps:$4 sm:$0xff]  }
 0x3cb   : > { %v5763_v11 = vpop.eup %5762  ;;  %5054 = vmatpush3.bf16.msra.mxu1 %v7189_v16  ;;  %v1634_v51 = vadd.f32 %v7285_v22, %v1612_v19  ;;  %v1614_v7 = vmul.f32 %v7257_v2, %v1592_v52  ;;  %v1615_v57 = vmul.f32 %v7257_v2, %v1593_v45  ;;  %v5718_v53 = vld [vmem:[%s6968_s26] ss:$8 sps:$4 sm:$0xff]   ;;  %v5721_v52 = vld [vmem:[%s6968_s26 + $0x30] ss:$8 sps:$4 sm:$0xff]  }
 0x3cc   : > { %v5765_v10 = vpop.eup %5764  ;;  %5055 = vmatprep.subr.bf16.mxu1 %v5711_v49  ;;  %v1649_v14 = vmax.f32 %v1633_v50, 0.0  ;;  %v1635_v37 = vadd.f32 %v7285_v22, %v1613_v24  ;;  %v1616_v60 = vmul.f32 %v7257_v2, %v1594_v48  ;;  %v1596_v16 = vmul.f32 %v5763_v11, %v1548_v8  ;;  %v5720_v19 = vld [vmem:[%s6968_s26 + $0x20] ss:$8 sps:$4 sm:$0xff]   ;;  %v5723_v50 = vld [vmem:[%s6968_s26 + $0x50] ss:$8 sps:$4 sm:$0xff]  }
 0x3cd   : > { %v1650_v25 = vmax.f32 %v1634_v51, 0.0  ;;  %v1636_v32 = vadd.f32 %v7285_v22, %v1614_v7  ;;  %v1637_v29 = vadd.f32 %v7285_v22, %v1615_v57  ;;  %v1595_v36 = vmul.f32 %v5765_v10, %v1547_v44  ;;  %v5722_v45 = vld [vmem:[%s6968_s26 + $0x40] ss:$8 sps:$4 sm:$0xff]   ;;  %v5725_v48 = vld [vmem:[%s6968_s26 + $0x70] ss:$8 sps:$4 sm:$0xff]  }
 0x3ce   : > { %v1651_v38 = vmax.f32 %v1635_v37, 0.0  ;;  %v1638_v39 = vadd.f32 %v7285_v22, %v1616_v60  ;;  %v1618_v41 = vmul.f32 %v7257_v2, %v1596_v16  ;;  %v5724_v24 = vld [vmem:[%s6968_s26 + $0x60] ss:$8 sps:$4 sm:$0xff]   ;;  %v4490_v11 = vld [vmem:[#allocation8] ss:$0 sm:$0xff] }
 0x3cf   : > { %v1679_v27 = vpack.c.bf16 %v1650_v25, %v1649_v14  ;;  %5056 = vmatpush3.bf16.msra.mxu1 %v5711_v49  ;;  %v1652_v42 = vmax.f32 %v1636_v32, 0.0  ;;  %v1653_v31 = vmax.f32 %v1637_v29, 0.0  ;;  %v1617_v59 = vmul.f32 %v7257_v2, %v1595_v36 }
 0x3d0   : > { %v5767_v62 = vpop.eup %5766  ;;  %5057 = vmatprep.subr.bf16.mxu1 %v5712_v33  ;;  %v1654_v8 = vmax.f32 %v1638_v39, 0.0  ;;  %v1640_v34 = vadd.f32 %v7285_v22, %v1618_v41 }
 0x3d1   : > { %v5769_v47 = vpop.eup %5768  ;;  %5041 = vmatprep.mubr.bf16.mxu1 %v1679_v27  ;;  %v1680_v56 = vpack.c.bf16 %v1652_v42, %v1651_v38  ;;  %v1639_v44 = vadd.f32 %v7285_v22, %v1617_v59  ;;  %v1598_v54 = vmul.f32 %v5767_v62, %v1550_v30 }
 0x3d2   : > { %v1681_v55 = vpack.c.bf16 %v1654_v8, %v1653_v31  ;;  %v1656_v6 = vmax.f32 %v1640_v34, 0.0  ;;  %v1597_v12 = vmul.f32 %v5769_v47, %v1549_v46 }
 0x3d3   : > { %v5771_v23 = vpop.eup %5770  ;;  %5042 = vmatmul.mubr.bf16.gmra.mrb[20].mxu1 %v1680_v56  ;;  %v1655_v63 = vmax.f32 %v1639_v44, 0.0  ;;  %v1620_v5 = vmul.f32 %v7257_v2, %v1598_v54 }
 0x3d4   : > { %v5773_v15 = vpop.eup %5772  ;;  %5058 = vmatpush3.bf16.msra.mxu1 %v5712_v33  ;;  %5045 = vmatprep.mubr.bf16.mxu1 %v1681_v55  ;;  %v1619_v18 = vmul.f32 %v7257_v2, %v1597_v12  ;;  %v1600_v4 = vmul.f32 %v5771_v23, %v1552_v13 }
 0x3d5   : > { %5059 = vmatprep.subr.bf16.mxu1 %v5713_v9  ;;  %v1682_v35 = vpack.c.bf16 %v1656_v6, %v1655_v63  ;;  %v1642_v20 = vadd.f32 %v7285_v22, %v1620_v5  ;;  %v1599_v30 = vmul.f32 %v5773_v15, %v1551_v21 }
 0x3d6   : > { %v1641_v46 = vadd.f32 %v7285_v22, %v1619_v18  ;;  %v1622_v43 = vmul.f32 %v7257_v2, %v1600_v4 }
 0x3d7   : > { %v1658_v40 = vmax.f32 %v1642_v20, 0.0  ;;  %v1621_v3 = vmul.f32 %v7257_v2, %v1599_v30  ;;  %v5716_v2 = vld [vmem:[%s8520_s23 + $0x30] sm:$0xff]  }
 0x3d8   : > { %5060 = vmatpush3.bf16.msra.mxu1 %v5713_v9  ;;  %v1657_v61 = vmax.f32 %v1641_v46, 0.0  ;;  %v1644_v13 = vadd.f32 %v7285_v22, %v1622_v43 }
 0x3d9   : > { %5061 = vmatprep.subr.bf16.mxu1 %v5714_v1  ;;  %v1643_v0 = vadd.f32 %v7285_v22, %v1621_v3  ;;  %v5717_v22 = vld [vmem:[%s8520_s23 + $0x38] sm:$0xff]  }
 0x3da   : > { %v1683_v17 = vpack.c.bf16 %v1658_v40, %v1657_v61  ;;  %v1660_v21 = vmax.f32 %v1644_v13, 0.0 }
 0x3db   : > { %5046 = vmatmul.mubr.bf16.gmra.mrb[24].mxu1 %v1682_v35  ;;  %v1659_v28 = vmax.f32 %v1643_v0, 0.0 }
 0x3dc   : > { %5062 = vmatpush3.bf16.msra.mxu1 %v5714_v1  ;;  %5049 = vmatprep.mubr.bf16.mxu1 %v1683_v17 }
 0x3dd   : > { %5063 = vmatprep.subr.bf16.mxu1 %v5715_v26  ;;  %v1684_v49 = vpack.c.bf16 %v1660_v21, %v1659_v28 }
 0x3e0   : > { %5064 = vmatpush3.bf16.msra.mxu1 %v5715_v26 }
 0x3e1   : > { %5065 = vmatprep.subr.bf16.mxu1 %v5716_v2 }
 0x3e3   : > { %5050 = vmatmul.mubr.bf16.gmra.mrb[28].mxu1 %v1684_v49 }
 0x3e4   : > { %5066 = vmatpush3.bf16.msra.mxu1 %v5716_v2  ;;  %5069 = vmatprep.mubr.bf16.mxu1 %v5718_v53 }
 0x3e5   : > { %5067 = vmatprep.subr.bf16.mxu1 %v5717_v22 }
 0x3e8   : > { %5068 = vmatpush3.bf16.msra.mxu1 %v5717_v22 }
 0x3eb   : > { %5070 = vmatmul.mubr.bf16.vlgmr.msra.gmra.mrb[16].mxu1 %v5719_v58 }
 0x3ec   : > { %5073 = vmatprep.mubr.bf16.mxu1 %v5720_v19 }
 0x3f3   : > { %5074 = vmatmul.mubr.bf16.gmra.mrb[20].mxu1 %v5721_v52 }
 0x3f4   : > { %5077 = vmatprep.mubr.bf16.mxu1 %v5722_v45 }
 0x3fb   : > { %5078 = vmatmul.mubr.bf16.gmra.mrb[24].mxu1 %v5723_v50 }
 0x3fc   : > { %5081 = vmatprep.mubr.bf16.mxu1 %v5724_v24 }
 0x403   : > { %5082 = vmatmul.mubr.bf16.gmra.mrb[28].mxu1 %v5725_v48 }
 0x4be   : > { %v5071_v51 = vpop.f32.mrb[16].mxu1 }
 0x4bf   : > { %v7402_v7 = vadd.f32 %v5071_v51, %v4490_v11  ;;  %v1976_v57 = vpop.f32.mrb[17].mxu1 }
 0x4c0   : > { %v7404_v10 = vadd.f32 %v4490_v11, %v1976_v57  ;;  %v5072_v14 = vpop.f32.mrb[18].mxu1 }
 0x4c1   : > { %v7406_v33 = vadd.f32 %v5072_v14, %v4490_v11  ;;  %v1979_v37 = vpop.f32.mrb[19].mxu1  ;;  %v2071_v60 = vsel %vm2064_vm0, %v7402_v7, 0.0 }
 0x4c2   : > { %v7410_v16 = vadd.f32 %v4490_v11, %v1979_v37  ;;  %2072 = vadd.xlane.f32.xlu1 %v2071_v60  ;;  %v2065_v25 = vsel %vm2064_vm0, %v7404_v10, 0.0 }
 0x4c3   : > { %2066 = vadd.xlane.f32.xlu0 %v2065_v25  ;;  %v2074_v32 = vsel %vm2064_vm0, %v7406_v33, 0.0 }
 0x4c4   : > { %v2068_v36 = vsel %vm2064_vm0, %v7410_v16, 0.0 }
 0x4c6   : > { %2075 = vadd.xlane.f32.xlu1 %v2074_v32  ;;  %v5075_v29 = vpop.f32.mrb[20].mxu1 }
 0x4c7   : > { %2069 = vadd.xlane.f32.xlu0 %v2068_v36  ;;  %v1992_v38 = vpop.f32.mrb[21].mxu1  ;;  %v7420_v42 = vadd.f32 %v5075_v29, %v4490_v11 }
 0x4c8   : > { %v7418_v39 = vadd.f32 %v4490_v11, %v1992_v38  ;;  %v5076_v41 = vpop.f32.mrb[22].mxu1 }
 0x4c9   : > { %v1995_v27 = vpop.f32.mrb[23].mxu1  ;;  %v7426_v62 = vadd.f32 %v5076_v41, %v4490_v11  ;;  %v2083_v47 = vsel %vm2064_vm0, %v7420_v42, 0.0 }
 0x4ca   : > { %v7422_v31 = vadd.f32 %v4490_v11, %v1995_v27  ;;  %v2077_v59 = vsel %vm2064_vm0, %v7418_v39, 0.0 }
 0x4cb   : > { %2078 = vadd.xlane.f32.xlu0 %v2077_v59  ;;  %v2086_v54 = vsel %vm2064_vm0, %v7426_v62, 0.0 }
 0x4cc   : > { %v2080_v8 = vsel %vm2064_vm0, %v7422_v31, 0.0 }
 0x4cd   : > { %2081 = vadd.xlane.f32.xlu1 %v2080_v8 }
 0x4ce   : > { %v5079_v34 = vpop.f32.mrb[24].mxu1 }
 0x4cf   : > { %2084 = vadd.xlane.f32.xlu0 %v2083_v47  ;;  %v2008_v56 = vpop.f32.mrb[25].mxu1  ;;  %v7436_v6 = vadd.f32 %v5079_v34, %v4490_v11 }
 0x4d0   : > { %v7432_v9 = vadd.f32 %v4490_v11, %v2008_v56  ;;  %v5080_v44 = vpop.f32.mrb[26].mxu1 }
 0x4d1   : > { %2087 = vadd.xlane.f32.xlu1 %v2086_v54  ;;  %v2011_v55 = vpop.f32.mrb[27].mxu1  ;;  %v7442_v63 = vadd.f32 %v5080_v44, %v4490_v11  ;;  %v2095_v18 = vsel %vm2064_vm0, %v7436_v6, 0.0 }
 0x4d2   : > { %v7438_v12 = vadd.f32 %v4490_v11, %v2011_v55  ;;  %v2089_v23 = vsel %vm2064_vm0, %v7432_v9, 0.0 }
 0x4d3   : > { %2090 = vadd.xlane.f32.xlu0 %v2089_v23  ;;  %v2098_v20 = vsel %vm2064_vm0, %v7442_v63, 0.0 }
 0x4d4   : > { %v2092_v5 = vsel %vm2064_vm0, %v7438_v12, 0.0 }
 0x4d5   : > { %2093 = vadd.xlane.f32.xlu1 %v2092_v5 }
 0x4d6   : > { %v5083_v15 = vpop.f32.mrb[28].mxu1 }
 0x4d7   : > { %2096 = vadd.xlane.f32.xlu0 %v2095_v18  ;;  %v2024_v4 = vpop.f32.mrb[29].mxu1  ;;  %v7452_v46 = vadd.f32 %v5083_v15, %v4490_v11 }
 0x4d8   : > { %v7448_v1 = vadd.f32 %v4490_v11, %v2024_v4  ;;  %v5084_v35 = vpop.f32.mrb[30].mxu1 }
 0x4d9   : > { %2099 = vadd.xlane.f32.xlu1 %v2098_v20  ;;  %v2027_v30 = vpop.f32.mrb[31].mxu1  ;;  %v7458_v3 = vadd.f32 %v5084_v35, %v4490_v11  ;;  %v2107_v13 = vsel %vm2064_vm0, %v7452_v46, 0.0 }
 0x4da   : > { %v7454_v43 = vadd.f32 %v4490_v11, %v2027_v30  ;;  %v2101_v40 = vsel %vm2064_vm0, %v7448_v1, 0.0 }
 0x4db   : > { %2102 = vadd.xlane.f32.xlu0 %v2101_v40  ;;  %v2110_v26 = vsel %vm2064_vm0, %v7458_v3, 0.0 }
 0x4dc   : > { %v2104_v61 = vsel %vm2064_vm0, %v7454_v43, 0.0 }
 0x4dd   : > { %2105 = vadd.xlane.f32.xlu1 %v2104_v61 }
 0x4df   : > { %2108 = vadd.xlane.f32.xlu0 %v2107_v13 }
 0x4e1   : > { %2111 = vadd.xlane.f32.xlu1 %v2110_v26 }
 0x54f   : > { %v2073_v0 = vpop.xlane.xlu1 %2072 }
 0x550   : > { %v2116_v17 = vmul.f32 0.015625, %v2073_v0  ;;  %v2067_v21 = vpop.xlane.xlu0 %2066 }
 0x551   : > { %v2114_v28 = vmul.f32 0.015625, %v2067_v21 }
 0x552   : > { %v7467_v2 = vsub.f32 %v7402_v7, %v2116_v17 }
 0x553   : > { %v7470_v49 = vsub.f32 %v7404_v10, %v2114_v28  ;;  %v2076_v53 = vpop.xlane.xlu1 %2075 }
 0x554   : > { %v2117_v22 = vmul.f32 0.015625, %v2076_v53  ;;  %v2070_v58 = vpop.xlane.xlu0 %2069  ;;  %v2148_v48 = vmul.f32 %v7467_v2, %v7467_v2 }
 0x555   : > { %v2115_v19 = vmul.f32 0.015625, %v2070_v58  ;;  %v2146_v52 = vmul.f32 %v7470_v49, %v7470_v49 }
 0x556   : > { %v7475_v45 = vsub.f32 %v7406_v33, %v2117_v22  ;;  %v2168_v37 = vsel %vm2064_vm0, %v2148_v48, 0.0 }
 0x557   : > { %v7478_v50 = vsub.f32 %v7410_v16, %v2115_v19  ;;  %v2162_v24 = vsel %vm2064_vm0, %v2146_v52, 0.0 }
 0x558   : > { %v2079_v11 = vpop.xlane.xlu0 %2078  ;;  %2163 = vadd.xlane.f32.xlu0 %v2162_v24  ;;  %v2149_v10 = vmul.f32 %v7475_v45, %v7475_v45 }
 0x559   : > { %v2118_v51 = vmul.f32 0.015625, %v2079_v11  ;;  %v2147_v7 = vmul.f32 %v7478_v50, %v7478_v50 }
 0x55a   : > { %v2082_v57 = vpop.xlane.xlu1 %2081  ;;  %v2171_v38 = vsel %vm2064_vm0, %v2149_v10, 0.0 }
 0x55b   : > { %v7488_v14 = vsub.f32 %v7418_v39, %v2118_v51  ;;  %v2119_v33 = vmul.f32 0.015625, %v2082_v57  ;;  %v2165_v60 = vsel %vm2064_vm0, %v2147_v7, 0.0 }
 0x55c   : > { %v2085_v16 = vpop.xlane.xlu0 %2084  ;;  %2169 = vadd.xlane.f32.xlu0 %v2168_v37  ;;  %2166 = vadd.xlane.f32.xlu1 %v2165_v60  ;;  %v5728_v60 = vld [vmem:[#allocation13 + $0x10] sm:$0xff]  }
 0x55d   : > { %v7493_v25 = vsub.f32 %v7422_v31, %v2119_v33  ;;  %v2120_v32 = vmul.f32 0.015625, %v2085_v16  ;;  %v2150_v29 = vmul.f32 %v7488_v14, %v7488_v14  ;;  %v5726_v33 = vld [vmem:[#allocation13] sm:$0xff]   ;;  %v5729_v16 = vld [vmem:[#allocation13 + $0x18] sm:$0xff]  }
 0x55e   : > { %v2088_v36 = vpop.xlane.xlu1 %2087  ;;  %5085 = vmatprep.subr.bf16.mxu0 %v5726_v33  ;;  %5469 = vmatprep.subr.bf16.mxu1 %v5726_v33 }
 0x55f   : > { %v7499_v39 = vsub.f32 %v7420_v42, %v2120_v32  ;;  %v2121_v41 = vmul.f32 0.015625, %v2088_v36  ;;  %v2174_v27 = vsel %vm2064_vm0, %v2150_v29, 0.0  ;;  %v2151_v59 = vmul.f32 %v7493_v25, %v7493_v25  ;;  %5086 = vmatpush3.bf16.msra.mxu0 %v5726_v33  ;;  %5473 = vmatpush3.bf16.msra.mxu1 %v5726_v33  ;;  %v7562_v32 = vld [vmem:[#allocation16] sm:$0xff]  }
 0x560   : > { %v2091_v8 = vpop.xlane.xlu0 %2090  ;;  %2175 = vadd.xlane.f32.xlu0 %v2174_v27  ;;  %2172 = vadd.xlane.f32.xlu1 %v2171_v38 }
 0x561   : > { %v7505_v31 = vsub.f32 %v7426_v62, %v2121_v41  ;;  %v2122_v34 = vmul.f32 0.015625, %v2091_v8  ;;  %v2152_v47 = vmul.f32 %v7499_v39, %v7499_v39  ;;  %v2177_v42 = vsel %vm2064_vm0, %v2151_v59, 0.0 }
 0x562   : > { %v2094_v56 = vpop.xlane.xlu1 %2093 }
 0x563   : > { %v7511_v44 = vsub.f32 %v7432_v9, %v2122_v34  ;;  %v2123_v54 = vmul.f32 0.015625, %v2094_v56  ;;  %v2180_v55 = vsel %vm2064_vm0, %v2152_v47, 0.0  ;;  %v2153_v23 = vmul.f32 %v7505_v31, %v7505_v31 }
 0x564   : > { %v2097_v5 = vpop.xlane.xlu0 %2096  ;;  %2181 = vadd.xlane.f32.xlu0 %v2180_v55  ;;  %2178 = vadd.xlane.f32.xlu1 %v2177_v42 }
 0x565   : > { %v7517_v62 = vsub.f32 %v7438_v12, %v2123_v54  ;;  %v2124_v15 = vmul.f32 0.015625, %v2097_v5  ;;  %v2154_v18 = vmul.f32 %v7511_v44, %v7511_v44  ;;  %v2183_v9 = vsel %vm2064_vm0, %v2153_v23, 0.0 }
 0x566   : > { %v2100_v4 = vpop.xlane.xlu1 %2099 }
 0x567   : > { %v7523_v35 = vsub.f32 %v7436_v6, %v2124_v15  ;;  %v2125_v20 = vmul.f32 0.015625, %v2100_v4  ;;  %v2186_v30 = vsel %vm2064_vm0, %v2154_v18, 0.0  ;;  %v2155_v40 = vmul.f32 %v7517_v62, %v7517_v62 }
 0x568   : > { %2187 = vadd.xlane.f32.xlu0 %v2186_v30  ;;  %v2103_v61 = vpop.xlane.xlu0 %2102  ;;  %2184 = vadd.xlane.f32.xlu1 %v2183_v9 }
 0x569   : > { %v7529_v12 = vsub.f32 %v7442_v63, %v2125_v20  ;;  %v2126_v13 = vmul.f32 0.015625, %v2103_v61  ;;  %v2156_v26 = vmul.f32 %v7523_v35, %v7523_v35  ;;  %v2189_v6 = vsel %vm2064_vm0, %v2155_v40, 0.0 }
 0x56a   : > { %v2106_v0 = vpop.xlane.xlu1 %2105 }
 0x56b   : > { %v7535_v17 = vsub.f32 %v7448_v1, %v2126_v13  ;;  %v2127_v21 = vmul.f32 0.015625, %v2106_v0  ;;  %v2192_v28 = vsel %vm2064_vm0, %v2156_v26, 0.0  ;;  %v2157_v53 = vmul.f32 %v7529_v12, %v7529_v12  ;;  %v7566_v0 = vld [vmem:[#allocation10] ss:$0 sm:$0xff] }
 0x56c   : > { %2193 = vadd.xlane.f32.xlu0 %v2192_v28  ;;  %v2109_v22 = vpop.xlane.xlu0 %2108  ;;  %2190 = vadd.xlane.f32.xlu1 %v2189_v6 }
 0x56d   : > { %v7541_v63 = vsub.f32 %v7454_v43, %v2127_v21  ;;  %v2128_v58 = vmul.f32 0.015625, %v2109_v22  ;;  %v2158_v19 = vmul.f32 %v7535_v17, %v7535_v17  ;;  %v2195_v1 = vsel %vm2064_vm0, %v2157_v53, 0.0 }
 0x56e   : > { %v2112_v52 = vpop.xlane.xlu1 %2111 }
 0x56f   : > { %v7547_v24 = vsub.f32 %v7452_v46, %v2128_v58  ;;  %v2129_v48 = vmul.f32 0.015625, %v2112_v52  ;;  %v2198_v11 = vsel %vm2064_vm0, %v2158_v19, 0.0  ;;  %v2159_v51 = vmul.f32 %v7541_v63, %v7541_v63 }
 0x570   : > { %2199 = vadd.xlane.f32.xlu0 %v2198_v11  ;;  %2196 = vadd.xlane.f32.xlu1 %v2195_v1  ;;  %v7570_v11 = vld [vmem:[#allocation11] ss:$0 sm:$0xff] }
 0x571   : > { %v7553_v43 = vsub.f32 %v7458_v3, %v2129_v48  ;;  %v2160_v7 = vmul.f32 %v7547_v24, %v7547_v24  ;;  %v2201_v10 = vsel %vm2064_vm0, %v2159_v51, 0.0  ;;  %v5727_v3 = vld [vmem:[#allocation13 + $0x8] sm:$0xff]  }
 0x572   : > { %5087 = vmatprep.subr.bf16.mxu0 %v5727_v3  ;;  %5470 = vmatprep.subr.bf16.mxu1 %v5727_v3 }
 0x573   : > { %v2204_v57 = vsel %vm2064_vm0, %v2160_v7, 0.0  ;;  %v2161_v46 = vmul.f32 %v7553_v43, %v7553_v43  ;;  %5088 = vmatpush3.bf16.msra.mxu0 %v5727_v3  ;;  %5474 = vmatpush3.bf16.msra.mxu1 %v5727_v3 }
 0x574   : > { %2205 = vadd.xlane.f32.xlu0 %v2204_v57  ;;  %2202 = vadd.xlane.f32.xlu1 %v2201_v10 }
 0x575   : > { %v2207_v37 = vsel %vm2064_vm0, %v2161_v46, 0.0  ;;  %5089 = vmatprep.subr.bf16.mxu0 %v5728_v60  ;;  %5471 = vmatprep.subr.bf16.mxu1 %v5728_v60 }
 0x577   : > { %5090 = vmatpush3.bf16.msra.mxu0 %v5728_v60  ;;  %5475 = vmatpush3.bf16.msra.mxu1 %v5728_v60 }
 0x578   : > { %2208 = vadd.xlane.f32.xlu1 %v2207_v37  ;;  %5091 = vmatprep.subr.bf16.mxu0 %v5729_v16 }
 0x579   : > { %5472 = vmatprep.subr.bf16.mxu1 %v5729_v16 }
 0x57b   : > { %5092 = vmatpush3.bf16.msra.mxu0 %v5729_v16  ;;  %5476 = vmatpush3.bf16.msra.mxu1 %v5729_v16 }
 0x57c   : > { %5109 = vmatprep.subr.bf16.mxu0 %v7562_v32 }
 0x5e5   : > { %v2164_v29 = vpop.xlane.xlu0 %2163 }
 0x5e6   : > { %v2210_v36 = vmul.f32 0.015625, %v2164_v29 }
 0x5e8   : > { %v2226_v38 = vadd.f32 1e-05, %v2210_v36 }
 0x5e9   : > { %v2170_v41 = vpop.xlane.xlu0 %2169  ;;  %v2167_v27 = vpop.xlane.xlu1 %2166 }
 0x5ea   : > { %5774 = vrsqrt.f32 %v2226_v38  ;;  %v2212_v59 = vmul.f32 0.015625, %v2170_v41  ;;  %v2211_v8 = vmul.f32 0.015625, %v2167_v27 }
 0x5ec   : > { %v2228_v34 = vadd.f32 1e-05, %v2212_v59  ;;  %v2227_v47 = vadd.f32 1e-05, %v2211_v8 }
 0x5ed   : > { %v2176_v56 = vpop.xlane.xlu0 %2175  ;;  %v2173_v42 = vpop.xlane.xlu1 %2172 }
 0x5ee   : > { %5776 = vrsqrt.f32 %v2228_v34  ;;  %v2214_v54 = vmul.f32 0.015625, %v2176_v56  ;;  %v2213_v55 = vmul.f32 0.015625, %v2173_v42 }
 0x5ef   : > { %5778 = vrsqrt.f32 %v2227_v47 }
 0x5f0   : > { %v2230_v23 = vadd.f32 1e-05, %v2214_v54  ;;  %v2229_v5 = vadd.f32 1e-05, %v2213_v55 }
 0x5f1   : > { %v2182_v15 = vpop.xlane.xlu0 %2181  ;;  %v2179_v18 = vpop.xlane.xlu1 %2178 }
 0x5f2   : > { %5780 = vrsqrt.f32 %v2230_v23  ;;  %v2216_v4 = vmul.f32 0.015625, %v2182_v15  ;;  %v2215_v9 = vmul.f32 0.015625, %v2179_v18 }
 0x5f3   : > { %5782 = vrsqrt.f32 %v2229_v5 }
 0x5f4   : > { %v5775_v20 = vpop.eup %5774  ;;  %v2232_v30 = vadd.f32 1e-05, %v2216_v4  ;;  %v2231_v40 = vadd.f32 1e-05, %v2215_v9 }
 0x5f5   : > { %v2258_v61 = vmul.f32 %v5775_v20, %v7470_v49  ;;  %v2188_v13 = vpop.xlane.xlu0 %2187  ;;  %v2185_v26 = vpop.xlane.xlu1 %2184 }
 0x5f6   : > { %5784 = vrsqrt.f32 %v2232_v30  ;;  %v2218_v6 = vmul.f32 0.015625, %v2188_v13  ;;  %v2217_v21 = vmul.f32 0.015625, %v2185_v26 }
 0x5f7   : > { %5786 = vrsqrt.f32 %v2231_v40  ;;  %v2280_v48 = vmul.f32 %v7566_v0, %v2258_v61 }
 0x5f8   : > { %v5777_v28 = vpop.eup %5776  ;;  %v2234_v53 = vadd.f32 1e-05, %v2218_v6  ;;  %v2233_v22 = vadd.f32 1e-05, %v2217_v21 }
 0x5f9   : > { %v5779_v58 = vpop.eup %5778  ;;  %v2260_v19 = vmul.f32 %v5777_v28, %v7467_v2  ;;  %v2194_v52 = vpop.xlane.xlu0 %2193  ;;  %v2302_v29 = vadd.f32 %v7570_v11, %v2280_v48 }
 0x5fa   : > { %v2191_v1 = vpop.xlane.xlu1 %2190  ;;  %v2259_v49 = vmul.f32 %v5779_v58, %v7478_v50  ;;  %5788 = vrsqrt.f32 %v2234_v53  ;;  %v2220_v51 = vmul.f32 0.015625, %v2194_v52 }
 0x5fb   : > { %v2219_v7 = vmul.f32 0.015625, %v2191_v1  ;;  %v2282_v57 = vmul.f32 %v7566_v0, %v2260_v19  ;;  %5790 = vrsqrt.f32 %v2233_v22  ;;  %v2318_v55 = vmax.f32 %v2302_v29, 0.0  ;;  %v5731_v19 = vld [vmem:[#allocation16 + $0x8] sm:$0xff]  }
 0x5fc   : > { %v5781_v10 = vpop.eup %5780  ;;  %v2236_v46 = vadd.f32 1e-05, %v2220_v51  ;;  %v2281_v37 = vmul.f32 %v7566_v0, %v2259_v49 }
 0x5fd   : > { %v2235_v33 = vadd.f32 1e-05, %v2219_v7  ;;  %v5783_v2 = vpop.eup %5782  ;;  %v2262_v3 = vmul.f32 %v5781_v10, %v7488_v14  ;;  %v2200_v60 = vpop.xlane.xlu0 %2199  ;;  %v2304_v41 = vadd.f32 %v7570_v11, %v2282_v57 }
 0x5fe   : > { %v2197_v16 = vpop.xlane.xlu1 %2196  ;;  %v2261_v50 = vmul.f32 %v5783_v2, %v7475_v45  ;;  %5792 = vrsqrt.f32 %v2236_v46  ;;  %v2222_v36 = vmul.f32 0.015625, %v2200_v60  ;;  %v2303_v27 = vadd.f32 %v7570_v11, %v2281_v37 }
 0x5ff   : > { %v2221_v38 = vmul.f32 0.015625, %v2197_v16  ;;  %5794 = vrsqrt.f32 %v2235_v33  ;;  %v2284_v23 = vmul.f32 %v7566_v0, %v2262_v3  ;;  %v2320_v4 = vmax.f32 %v2304_v41, 0.0 }
 0x600   : > { %v5785_v59 = vpop.eup %5784  ;;  %v2283_v8 = vmul.f32 %v7566_v0, %v2261_v50  ;;  %v2238_v34 = vadd.f32 1e-05, %v2222_v36  ;;  %v2319_v45 = vmax.f32 %v2303_v27, 0.0 }
 0x601   : > { %v2237_v47 = vadd.f32 1e-05, %v2221_v38  ;;  %v5787_v14 = vpop.eup %5786  ;;  %v2264_v56 = vmul.f32 %v5785_v59, %v7499_v39  ;;  %v2206_v42 = vpop.xlane.xlu0 %2205  ;;  %v2306_v28 = vadd.f32 %v7570_v11, %v2284_v23 }
 0x602   : > { %v2203_v54 = vpop.xlane.xlu1 %2202  ;;  %v2305_v5 = vadd.f32 %v7570_v11, %v2283_v8  ;;  %v2263_v15 = vmul.f32 %v5787_v14, %v7493_v25  ;;  %5796 = vrsqrt.f32 %v2238_v34  ;;  %v2224_v18 = vmul.f32 0.015625, %v2206_v42 }
 0x603   : > { %5798 = vrsqrt.f32 %v2237_v47  ;;  %v2223_v9 = vmul.f32 0.015625, %v2203_v54  ;;  %v2334_v20 = vpack.c.bf16 %v2319_v45, %v2318_v55  ;;  %v2286_v13 = vmul.f32 %v7566_v0, %v2264_v56 }
 0x604   : > { %v5789_v30 = vpop.eup %5788  ;;  %v2321_v40 = vmax.f32 %v2305_v5, 0.0  ;;  %v2240_v61 = vadd.f32 1e-05, %v2224_v18  ;;  %v2285_v39 = vmul.f32 %v7566_v0, %v2263_v15  ;;  %v2322_v57 = vmax.f32 %v2306_v28, 0.0  ;;  %v951_v28 = vld [vmem:[%s8521_s10 + $0x18] sm:$0xff] }
 0x605   : > { %v5791_v26 = vpop.eup %5790  ;;  %v2266_v6 = vmul.f32 %v5789_v30, %v7511_v44  ;;  %v2239_v21 = vadd.f32 1e-05, %v2223_v9  ;;  %5093 = vmatprep.mubr.msk.bf16.mxu0 %vm2064_vm0, %v2334_v20  ;;  %v2308_v51 = vadd.f32 %v7570_v11, %v2286_v13 }
 0x606   : > { %v2209_v25 = vpop.xlane.xlu1 %2208  ;;  %v2265_v53 = vmul.f32 %v5791_v26, %v7505_v31  ;;  %5800 = vrsqrt.f32 %v2240_v61  ;;  %v2335_v58 = vpack.c.bf16 %v2321_v40, %v2320_v4  ;;  %v2307_v52 = vadd.f32 %v7570_v11, %v2285_v39 }
 0x607   : > { %v2225_v22 = vmul.f32 0.015625, %v2209_v25  ;;  %5802 = vrsqrt.f32 %v2239_v21  ;;  %v2288_v1 = vmul.f32 %v7566_v0, %v2266_v6  ;;  %v2324_v16 = vmax.f32 %v2308_v51, 0.0  ;;  %v948_v6 = vld [vmem:[%s8521_s10] sm:$0xff]  ;;  %v950_v21 = vld [vmem:[%s8521_s10 + $0x10] sm:$0xff] }
 0x608   : > { %v5793_v48 = vpop.eup %5792  ;;  %5094 = vmatmul.mubr.msk.bf16.vlgmr.msra.gmra.mrb[32].mxu0 %vm2064_vm0, %v2335_v58  ;;  %v2287_v44 = vmul.f32 %v7566_v0, %v2265_v53  ;;  %v2323_v10 = vmax.f32 %v2307_v52, 0.0  ;;  %v7640_v53 = vpack.c.bf16 %v951_v28, %v950_v21  ;;  %v953_v58 = vld [vmem:[%s8521_s10 + $0x28] sm:$0xff]  ;;  %v954_v52 = vld [vmem:[%s8521_s10 + $0x30] sm:$0xff] }
 0x609   : > { %v2241_v49 = vadd.f32 1e-05, %v2225_v22  ;;  %v5795_v7 = vpop.eup %5794  ;;  %v2268_v31 = vmul.f32 %v5793_v48, %v7523_v35  ;;  %5110 = vmatpush3.bf16.msra.mxu0 %v7562_v32  ;;  %v2310_v2 = vadd.f32 %v7570_v11, %v2288_v1  ;;  %v952_v22 = vld [vmem:[%s8521_s10 + $0x20] sm:$0xff]  ;;  %v955_v1 = vld [vmem:[%s8521_s10 + $0x38] sm:$0xff] }
 0x60a   : > { %v2267_v46 = vmul.f32 %v5795_v7, %v7517_v62  ;;  %v2309_v33 = vadd.f32 %v7570_v11, %v2287_v44  ;;  %5111 = vmatprep.subr.bf16.mxu0 %v5731_v19  ;;  %v2336_v37 = vpack.c.bf16 %v2323_v10, %v2322_v57  ;;  %v7662_v48 = vpack.c.bf16 %v955_v1, %v954_v52  ;;  %v4493_v44 = vld [vmem:[#allocation14] ss:$0 sm:$0xff] }
 0x60b   : > { %5804 = vrsqrt.f32 %v2241_v49  ;;  %v2290_v60 = vmul.f32 %v7566_v0, %v2268_v31  ;;  %v2326_v41 = vmax.f32 %v2310_v2, 0.0 }
 0x60c   : > { %v5797_v3 = vpop.eup %5796  ;;  %v2325_v29 = vmax.f32 %v2309_v33, 0.0  ;;  %v2289_v35 = vmul.f32 %v7566_v0, %v2267_v46  ;;  %5097 = vmatprep.mubr.msk.bf16.mxu0 %vm2064_vm0, %v2336_v37 }
 0x60d   : > { %v5799_v50 = vpop.eup %5798  ;;  %v2270_v36 = vmul.f32 %v5797_v3, %v7535_v17  ;;  %5112 = vmatpush3.bf16.msra.mxu0 %v5731_v19  ;;  %v2312_v59 = vadd.f32 %v7570_v11, %v2290_v60  ;;  %v7651_v19 = vpack.c.bf16 %v953_v58, %v952_v22 }
 0x60e   : > { %v2269_v62 = vmul.f32 %v5799_v50, %v7529_v12  ;;  %v2337_v32 = vpack.c.bf16 %v2325_v29, %v2324_v16  ;;  %v2311_v38 = vadd.f32 %v7570_v11, %v2289_v35 }
 0x60f   : > { %v2292_v47 = vmul.f32 %v7566_v0, %v2270_v36  ;;  %v2328_v45 = vmax.f32 %v2312_v59, 0.0 }
 0x610   : > { %v5801_v27 = vpop.eup %5800  ;;  %v2291_v8 = vmul.f32 %v7566_v0, %v2269_v62  ;;  %5098 = vmatmul.mubr.msk.bf16.gmra.mrb[36].mxu0 %vm2064_vm0, %v2337_v32  ;;  %v2327_v34 = vmax.f32 %v2311_v38, 0.0 }
 0x611   : > { %v5803_v17 = vpop.eup %5802  ;;  %v2272_v14 = vmul.f32 %v5801_v27, %v7547_v24  ;;  %v2314_v15 = vadd.f32 %v7570_v11, %v2292_v47 }
 0x612   : > { %v2313_v56 = vadd.f32 %v7570_v11, %v2291_v8  ;;  %v2271_v12 = vmul.f32 %v5803_v17, %v7541_v63  ;;  %v2338_v42 = vpack.c.bf16 %v2327_v34, %v2326_v41 }
 0x613   : > { %v2294_v54 = vmul.f32 %v7566_v0, %v2272_v14  ;;  %v2330_v20 = vmax.f32 %v2314_v15, 0.0 }
 0x614   : > { %v2329_v23 = vmax.f32 %v2313_v56, 0.0  ;;  %5101 = vmatprep.mubr.msk.bf16.mxu1 %vm2064_vm0, %v2338_v42  ;;  %v2293_v5 = vmul.f32 %v7566_v0, %v2271_v12 }
 0x615   : > { %v5805_v55 = vpop.eup %5804  ;;  %v2316_v63 = vadd.f32 %v7570_v11, %v2294_v54 }
 0x616   : > { %v2273_v18 = vmul.f32 %v5805_v55, %v7553_v43  ;;  %v2339_v4 = vpack.c.bf16 %v2329_v23, %v2328_v45  ;;  %v2315_v24 = vadd.f32 %v7570_v11, %v2293_v5  ;;  %v5732_v43 = vld [vmem:[#allocation16 + $0x10] sm:$0xff]  }
 0x617   : > { %v2332_v39 = vmax.f32 %v2316_v63, 0.0  ;;  %5113 = vmatprep.subr.bf16.mxu0 %v5732_v43 }
 0x618   : > { %v2295_v9 = vmul.f32 %v7566_v0, %v2273_v18  ;;  %5102 = vmatmul.mubr.msk.bf16.vlgmr.msra.gmra.mrb[32].mxu1 %vm2064_vm0, %v2339_v4  ;;  %v2331_v30 = vmax.f32 %v2315_v24, 0.0  ;;  %5114 = vmatpush3.bf16.msra.mxu0 %v5732_v43  ;;  %v5733_v0 = vld [vmem:[#allocation16 + $0x18] sm:$0xff]  }
 0x619   : > { %5115 = vmatprep.subr.bf16.mxu0 %v5733_v0 }
 0x61a   : > { %v2317_v40 = vadd.f32 %v7570_v11, %v2295_v9  ;;  %v2340_v61 = vpack.c.bf16 %v2331_v30, %v2330_v20  ;;  %v949_v11 = vld [vmem:[%s8521_s10 + $0x8] sm:$0xff] }
 0x61b   : > { %v7635_v25 = vpack.c.bf16 %v949_v11, %v948_v6  ;;  %v7731_v9 = vld [vmem:[#allocation17] ss:$0 sm:$0xff] }
 0x61c   : > { %v2333_v13 = vmax.f32 %v2317_v40, 0.0  ;;  %5105 = vmatprep.mubr.msk.bf16.mxu1 %vm2064_vm0, %v2340_v61  ;;  %5116 = vmatpush3.bf16.msra.mxu0 %v5733_v0 }
 0x61d   : > { %5422 = vmatprep.subr.bf16.mxu0 %v7635_v25  ;;  %5406 = vmatprep.subr.bf16.mxu1 %v7635_v25 }
 0x61e   : > { %v2341_v26 = vpack.c.bf16 %v2333_v13, %v2332_v39  ;;  %5408 = vmatpush3.bf16.msra.mxu1 %v7635_v25 }
 0x61f   : > { %5410 = vmatprep.subr.bf16.mxu1 %v7640_v53 }
 0x620   : > { %5106 = vmatmul.mubr.msk.bf16.gmra.mrb[36].mxu1 %vm2064_vm0, %v2341_v26 }
 0x622   : > { %5412 = vmatpush3.bf16.msra.mxu1 %v7640_v53 }
 0x623   : > { %5414 = vmatprep.subr.bf16.mxu1 %v7651_v19 }
 0x626   : > { %5416 = vmatpush3.bf16.msra.mxu1 %v7651_v19 }
 0x627   : > { %5418 = vmatprep.subr.bf16.mxu1 %v7662_v48 }
 0x62a   : > { %5420 = vmatpush3.bf16.msra.mxu1 %v7662_v48 }
 0x6db   : > { %v5095_v49 = vpop.f32.mrb[32].mxu0 }
 0x6dc   : > { %v2439_v51 = vpop.f32.mrb[33].mxu0  ;;  %v7673_v33 = vadd.f32 %v5095_v49, %v4493_v44 }
 0x6dd   : > { %v5096_v7 = vpop.f32.mrb[34].mxu0  ;;  %v7669_v10 = vadd.f32 %v4493_v44, %v2439_v51 }
 0x6de   : > { %v7667_v31 = vadd.f32 %v5096_v7, %v4493_v44  ;;  %v2442_v57 = vpop.f32.mrb[35].mxu0 }
 0x6df   : > { %v7671_v46 = vadd.f32 %v4493_v44, %v2442_v57 }
 0x6e0   : > { %v2503_v2 = vpack.c.bf16 %v7667_v31, %v7673_v33 }
 0x6e1   : > { %v2502_v37 = vpack.c.bf16 %v7671_v46, %v7669_v10 }
 0x6e3   : > { %v5099_v3 = vpop.f32.mrb[36].mxu0  ;;  %5117 = vmatprep.mubr.msk.bf16.mxu0 %vm2064_vm0, %v2502_v37 }
 0x6e4   : > { %v2455_v60 = vpop.f32.mrb[37].mxu0  ;;  %5118 = vmatmul.mubr.msk.bf16.vlgmr.msra.gmra.mrb[40].mxu0 %vm2064_vm0, %v2503_v2  ;;  %v7689_v62 = vadd.f32 %v5099_v3, %v4493_v44 }
 0x6e5   : > { %v5100_v16 = vpop.f32.mrb[38].mxu0  ;;  %5424 = vmatpush3.bf16.msra.mxu0 %v7635_v25  ;;  %v7685_v50 = vadd.f32 %v4493_v44, %v2455_v60 }
 0x6e6   : > { %v7682_v29 = vadd.f32 %v5100_v16, %v4493_v44  ;;  %v2458_v35 = vpop.f32.mrb[39].mxu0  ;;  %5426 = vmatprep.subr.bf16.mxu0 %v7640_v53 }
 0x6e7   : > { %v7687_v36 = vadd.f32 %v4493_v44, %v2458_v35 }
 0x6e8   : > { %v2505_v38 = vpack.c.bf16 %v7682_v29, %v7689_v62 }
 0x6e9   : > { %v2504_v32 = vpack.c.bf16 %v7687_v36, %v7685_v50  ;;  %5428 = vmatpush3.bf16.msra.mxu0 %v7640_v53 }
 0x6ea   : > { %5430 = vmatprep.subr.bf16.mxu0 %v7651_v19 }
 0x6eb   : > { %v5103_v41 = vpop.f32.mrb[32].mxu1  ;;  %5121 = vmatprep.mubr.msk.bf16.mxu0 %vm2064_vm0, %v2504_v32 }
 0x6ec   : > { %v2471_v27 = vpop.f32.mrb[33].mxu1  ;;  %5122 = vmatmul.mubr.msk.bf16.gmra.mrb[44].mxu0 %vm2064_vm0, %v2505_v38  ;;  %v7707_v14 = vadd.f32 %v5103_v41, %v4493_v44 }
 0x6ed   : > { %v5104_v59 = vpop.f32.mrb[34].mxu1  ;;  %5432 = vmatpush3.bf16.msra.mxu0 %v7651_v19  ;;  %v7703_v47 = vadd.f32 %v4493_v44, %v2471_v27 }
 0x6ee   : > { %v7700_v8 = vadd.f32 %v5104_v59, %v4493_v44  ;;  %v2474_v34 = vpop.f32.mrb[35].mxu1  ;;  %5434 = vmatprep.subr.bf16.mxu0 %v7662_v48 }
 0x6ef   : > { %v7705_v17 = vadd.f32 %v4493_v44, %v2474_v34 }
 0x6f0   : > { %v2507_v12 = vpack.c.bf16 %v7700_v8, %v7707_v14 }
 0x6f1   : > { %v2506_v56 = vpack.c.bf16 %v7705_v17, %v7703_v47  ;;  %5436 = vmatpush3.bf16.msra.mxu0 %v7662_v48 }
 0x6f2   : > { %5438 = vmatprep.subr.bf16.mxu0 %v7635_v25 }
 0x6f3   : > { %v5107_v42 = vpop.f32.mrb[36].mxu1  ;;  %5125 = vmatprep.mubr.msk.bf16.mxu0 %vm2064_vm0, %v2506_v56 }
 0x6f4   : > { %v2487_v54 = vpop.f32.mrb[37].mxu1  ;;  %5126 = vmatmul.mubr.msk.bf16.gmra.mrb[48].mxu0 %vm2064_vm0, %v2507_v12  ;;  %v7723_v18 = vadd.f32 %v5107_v42, %v4493_v44 }
 0x6f5   : > { %v5108_v55 = vpop.f32.mrb[38].mxu1  ;;  %v7719_v5 = vadd.f32 %v4493_v44, %v2487_v54 }
 0x6f6   : > { %v7717_v45 = vadd.f32 %v5108_v55, %v4493_v44  ;;  %v2490_v23 = vpop.f32.mrb[39].mxu1  ;;  %8524 = vst [vmem:[#allocation41_spill] sm:$0xff] %v7723_v18 }
 0x6f7   : > { %8523 = vst [vmem:[#allocation40_spill] sm:$0xff] %v7719_v5  ;;  %v7721_v15 = vadd.f32 %v4493_v44, %v2490_v23 }
 0x6f8   : > { %8522 = vst [vmem:[#allocation39_spill] sm:$0xff] %v7717_v45  ;;  %v2509_v24 = vpack.c.bf16 %v7717_v45, %v7723_v18 }
 0x6f9   : > { %v2508_v4 = vpack.c.bf16 %v7721_v15, %v7719_v5 }
 0x6fb   : > { %5129 = vmatprep.mubr.msk.bf16.mxu0 %vm2064_vm0, %v2508_v4 }
 0x6fc   : > { %5130 = vmatmul.mubr.msk.bf16.gmra.mrb[52].mxu0 %vm2064_vm0, %v2509_v24 }
 0x7b7   : > { %v5119_v63 = vpop.f32.mrb[40].mxu0 }
 0x7b8   : > { %v2607_v20 = vpop.f32.mrb[41].mxu0  ;;  %v7737_v61 = vadd.f32 %v5119_v63, %v7731_v9 }
 0x7b9   : > { %v7734_v30 = vadd.f32 %v7731_v9, %v2607_v20  ;;  %v5120_v40 = vpop.f32.mrb[42].mxu0 }
 0x7ba   : > { %v2610_v39 = vpop.f32.mrb[43].mxu0  ;;  %v7747_v43 = vadd.f32 %v5120_v40, %v7731_v9  ;;  %v2867_v6 = vmul.f32 %v7737_v61, %v7737_v61 }
 0x7bb   : > { %v2865_v13 = vmul.f32 %v7734_v30, %v7734_v30  ;;  %v7742_v26 = vadd.f32 %v7731_v9, %v2610_v39  ;;  %5149 = vmatprep.mubr.msk.f32.mxu1 %vm2064_vm0, %v7734_v30 }
 0x7bc   : > { %v2868_v28 = vmul.f32 %v7747_v43, %v7747_v43 }
 0x7bd   : > { %v2866_v0 = vmul.f32 %v7742_v26, %v7742_v26  ;;  %5150 = vmatmul.mubr.msk.f32.vlgmr.msra.gmra.mrb[40].mxu1 %vm2064_vm0, %v7742_v26  ;;  %5189 = vmatprep.mubr.msk.f32.mxu0 %vm2064_vm0, %v2865_v13  ;;  %v5734_v13 = vld [vmem:[#allocation22] sm:$0xff]  }
 0x7be   : > { %5152 = vmatprep.mubr.msk.f32.mxu1 %vm2064_vm0, %v7737_v61  ;;  %5213 = vmatprep.subr.bf16.mxu1 %v5734_v13 }
 0x7bf   : > { %v5123_v11 = vpop.f32.mrb[44].mxu0  ;;  %5190 = vmatmul.mubr.msk.f32.vlgmr.msra.gmra.mrb[56].mxu0 %vm2064_vm0, %v2866_v0  ;;  %5214 = vmatpush3.bf16.msra.mxu1 %v5734_v13  ;;  %v5735_v0 = vld [vmem:[#allocation22 + $0x8] sm:$0xff]  }
 0x7c0   : > { %v2623_v21 = vpop.f32.mrb[45].mxu0  ;;  %5192 = vmatprep.mubr.msk.f32.mxu0 %vm2064_vm0, %v2867_v6  ;;  %5440 = vmatpush3.bf16.msra.mxu0 %v7635_v25  ;;  %v7770_v52 = vadd.f32 %v5123_v11, %v7731_v9  ;;  %v5736_v6 = vld [vmem:[#allocation22 + $0x10] sm:$0xff]   ;;  %v5737_v11 = vld [vmem:[#allocation22 + $0x18] sm:$0xff]  }
 0x7c1   : > { %v7764_v22 = vadd.f32 %v7731_v9, %v2623_v21  ;;  %v5124_v58 = vpop.f32.mrb[46].mxu0  ;;  %5153 = vmatmul.mubr.msk.f32.gmra.mrb[42].mxu1 %vm2064_vm0, %v7747_v43  ;;  %5442 = vmatprep.subr.bf16.mxu0 %v7640_v53 }
 0x7c2   : > { %v2626_v1 = vpop.f32.mrb[47].mxu0  ;;  %v7782_v51 = vadd.f32 %v5124_v58, %v7731_v9  ;;  %v2871_v57 = vmul.f32 %v7770_v52, %v7770_v52  ;;  %5215 = vmatprep.subr.bf16.mxu1 %v5735_v0 }
 0x7c3   : > { %v2869_v49 = vmul.f32 %v7764_v22, %v7764_v22  ;;  %v7775_v44 = vadd.f32 %v7731_v9, %v2626_v1  ;;  %5155 = vmatprep.mubr.msk.f32.mxu1 %vm2064_vm0, %v7764_v22  ;;  %5193 = vmatmul.mubr.msk.f32.gmra.mrb[58].mxu0 %vm2064_vm0, %v2868_v28 }
 0x7c4   : > { %5444 = vmatpush3.bf16.msra.mxu0 %v7640_v53  ;;  %v2872_v3 = vmul.f32 %v7782_v51, %v7782_v51  ;;  %5216 = vmatpush3.bf16.msra.mxu1 %v5735_v0 }
 0x7c5   : > { %v2870_v7 = vmul.f32 %v7775_v44, %v7775_v44  ;;  %5156 = vmatmul.mubr.msk.f32.gmra.mrb[44].mxu1 %vm2064_vm0, %v7775_v44  ;;  %5195 = vmatprep.mubr.msk.f32.mxu0 %vm2064_vm0, %v2869_v49 }
 0x7c6   : > { %5158 = vmatprep.mubr.msk.f32.mxu1 %vm2064_vm0, %v7770_v52  ;;  %5446 = vmatprep.subr.bf16.mxu0 %v7651_v19 }
 0x7c7   : > { %v5127_v37 = vpop.f32.mrb[48].mxu0  ;;  %5196 = vmatmul.mubr.msk.f32.gmra.mrb[60].mxu0 %vm2064_vm0, %v2870_v7  ;;  %5217 = vmatprep.subr.bf16.mxu1 %v5736_v6 }
 0x7c8   : > { %v2639_v2 = vpop.f32.mrb[49].mxu0  ;;  %5198 = vmatprep.mubr.msk.f32.mxu0 %vm2064_vm0, %v2871_v57  ;;  %5448 = vmatpush3.bf16.msra.mxu0 %v7651_v19  ;;  %v7806_v35 = vadd.f32 %v5127_v37, %v7731_v9 }
 0x7c9   : > { %v7800_v60 = vadd.f32 %v7731_v9, %v2639_v2  ;;  %v5128_v16 = vpop.f32.mrb[50].mxu0  ;;  %5159 = vmatmul.mubr.msk.f32.gmra.mrb[46].mxu1 %vm2064_vm0, %v7782_v51  ;;  %5450 = vmatprep.subr.bf16.mxu0 %v7662_v48 }
 0x7ca   : > { %v2642_v32 = vpop.f32.mrb[51].mxu0  ;;  %v7818_v27 = vadd.f32 %v5128_v16, %v7731_v9  ;;  %v2875_v34 = vmul.f32 %v7806_v35, %v7806_v35  ;;  %5218 = vmatpush3.bf16.msra.mxu1 %v5736_v6 }
 0x7cb   : > { %v2873_v38 = vmul.f32 %v7800_v60, %v7800_v60  ;;  %v7811_v41 = vadd.f32 %v7731_v9, %v2642_v32  ;;  %5161 = vmatprep.mubr.msk.f32.mxu1 %vm2064_vm0, %v7800_v60  ;;  %5199 = vmatmul.mubr.msk.f32.gmra.mrb[62].mxu0 %vm2064_vm0, %v2872_v3 }
 0x7cc   : > { %5452 = vmatpush3.bf16.msra.mxu0 %v7662_v48  ;;  %v2876_v42 = vmul.f32 %v7818_v27, %v7818_v27  ;;  %5219 = vmatprep.subr.bf16.mxu1 %v5737_v11 }
 0x7cd   : > { %v2874_v59 = vmul.f32 %v7811_v41, %v7811_v41  ;;  %5162 = vmatmul.mubr.msk.f32.gmra.mrb[48].mxu1 %vm2064_vm0, %v7811_v41  ;;  %5201 = vmatprep.mubr.msk.f32.mxu0 %vm2064_vm0, %v2873_v38 }
 0x7ce   : > { %5164 = vmatprep.mubr.msk.f32.mxu1 %vm2064_vm0, %v7806_v35  ;;  %5220 = vmatpush3.bf16.msra.mxu1 %v5737_v11 }
 0x7cf   : > { %v5131_v56 = vpop.f32.mrb[52].mxu0  ;;  %5202 = vmatmul.mubr.msk.f32.gmra.mrb[64].mxu0 %vm2064_vm0, %v2874_v59  ;;  %5454 = vmatprep.subr.bf16.mxu1 %v7635_v25 }
 0x7d0   : > { %v2655_v12 = vpop.f32.mrb[53].mxu0  ;;  %5204 = vmatprep.mubr.msk.f32.mxu0 %vm2064_vm0, %v2875_v34  ;;  %v7839_v23 = vadd.f32 %v5131_v56, %v7731_v9 }
 0x7d1   : > { %v7834_v54 = vadd.f32 %v7731_v9, %v2655_v12  ;;  %v5132_v55 = vpop.f32.mrb[54].mxu0  ;;  %5165 = vmatmul.mubr.msk.f32.gmra.mrb[50].mxu1 %vm2064_vm0, %v7818_v27 }
 0x7d2   : > { %v2658_v4 = vpop.f32.mrb[55].mxu0  ;;  %v7850_v20 = vadd.f32 %v5132_v55, %v7731_v9  ;;  %v2879_v39 = vmul.f32 %v7839_v23, %v7839_v23 }
 0x7d3   : > { %v2877_v24 = vmul.f32 %v7834_v54, %v7834_v54  ;;  %v7844_v63 = vadd.f32 %v7731_v9, %v2658_v4  ;;  %5167 = vmatprep.mubr.msk.f32.mxu1 %vm2064_vm0, %v7834_v54  ;;  %5205 = vmatmul.mubr.msk.f32.gmra.mrb[66].mxu0 %vm2064_vm0, %v2876_v42 }
 0x7d4   : > { %v2880_v9 = vmul.f32 %v7850_v20, %v7850_v20 }
 0x7d5   : > { %v2878_v40 = vmul.f32 %v7844_v63, %v7844_v63  ;;  %5168 = vmatmul.mubr.msk.f32.gmra.mrb[52].mxu1 %vm2064_vm0, %v7844_v63  ;;  %5207 = vmatprep.mubr.msk.f32.mxu0 %vm2064_vm0, %v2877_v24 }
 0x7d6   : > { %5170 = vmatprep.mubr.msk.f32.mxu1 %vm2064_vm0, %v7839_v23 }
 0x7d7   : > { %5208 = vmatmul.mubr.msk.f32.gmra.mrb[68].mxu0 %vm2064_vm0, %v2878_v40 }
 0x7d8   : > { %5210 = vmatprep.mubr.msk.f32.mxu0 %vm2064_vm0, %v2879_v39 }
 0x7d9   : > { %5171 = vmatmul.mubr.msk.f32.gmra.mrb[54].mxu1 %vm2064_vm0, %v7850_v20 }
 0x7db   : > { %5211 = vmatmul.mubr.msk.f32.gmra.mrb[70].mxu0 %vm2064_vm0, %v2880_v9 }
 0x890   : > { %v7869_v21 = vpop.f32.mrb[40].mxu1 }
 0x891   : > { %v3075_v28 = vmul.f32 %v7869_v21, %v7869_v21  ;;  %v7873_v58 = vpop.f32.mrb[41].mxu1 }
 0x892   : > { %v3074_v1 = vmul.f32 %v7873_v58, %v7873_v58  ;;  %v5191_v49 = vpop.f32.mrb[56].mxu0 }
 0x893   : > { %v3091_v7 = vsub.f32 %v5191_v49, %v3075_v28  ;;  %v2995_v57 = vpop.f32.mrb[57].mxu0 }
 0x894   : > { %v3090_v37 = vsub.f32 %v2995_v57, %v3074_v1  ;;  %v7877_v2 = vpop.f32.mrb[42].mxu1 }
 0x895   : > { %v3107_v3 = vmax.f32 %v3091_v7, 0.0  ;;  %v3077_v16 = vmul.f32 %v7877_v2, %v7877_v2  ;;  %v7881_v32 = vpop.f32.mrb[43].mxu1 }
 0x896   : > { %v3106_v38 = vmax.f32 %v3090_v37, 0.0  ;;  %v3076_v59 = vmul.f32 %v7881_v32, %v7881_v32  ;;  %v5194_v34 = vpop.f32.mrb[58].mxu0 }
 0x897   : > { %v3139_v56 = vadd.f32 1e-05, %v3107_v3  ;;  %v3093_v12 = vsub.f32 %v5194_v34, %v3077_v16  ;;  %v3005_v42 = vpop.f32.mrb[59].mxu0 }
 0x898   : > { %v3138_v55 = vadd.f32 1e-05, %v3106_v38  ;;  %v3092_v4 = vsub.f32 %v3005_v42, %v3076_v59  ;;  %v7885_v24 = vpop.f32.mrb[44].mxu1 }
 0x899   : > { %5806 = vrsqrt.f32 %v3139_v56  ;;  %v3109_v40 = vmax.f32 %v3093_v12, 0.0  ;;  %v3079_v39 = vmul.f32 %v7885_v24, %v7885_v24  ;;  %v7889_v9 = vpop.f32.mrb[45].mxu1 }
 0x89a   : > { %5808 = vrsqrt.f32 %v3138_v55  ;;  %v3108_v13 = vmax.f32 %v3092_v4, 0.0  ;;  %v3078_v0 = vmul.f32 %v7889_v9, %v7889_v9  ;;  %v5197_v6 = vpop.f32.mrb[60].mxu0  ;;  %v3123_v55 = vsub.f32 %v7742_v26, %v7869_v21 }
 0x89b   : > { %v3141_v11 = vadd.f32 1e-05, %v3109_v40  ;;  %v3095_v28 = vsub.f32 %v5197_v6, %v3079_v39  ;;  %v3015_v1 = vpop.f32.mrb[61].mxu0 }
 0x89c   : > { %v3140_v49 = vadd.f32 1e-05, %v3108_v13  ;;  %v3094_v7 = vsub.f32 %v3015_v1, %v3078_v0  ;;  %v7893_v57 = vpop.f32.mrb[46].mxu1  ;;  %v3122_v13 = vsub.f32 %v7734_v30, %v7873_v58  ;;  %v3124_v30 = vsub.f32 %v7737_v61, %v7881_v32 }
 0x89d   : > { %5810 = vrsqrt.f32 %v3141_v11  ;;  %v3111_v37 = vmax.f32 %v3095_v28, 0.0  ;;  %v3081_v3 = vmul.f32 %v7893_v57, %v7893_v57  ;;  %v7897_v16 = vpop.f32.mrb[47].mxu1  ;;  %v3125_v28 = vsub.f32 %v7747_v43, %v7877_v2 }
 0x89e   : > { %5812 = vrsqrt.f32 %v3140_v49  ;;  %v3110_v38 = vmax.f32 %v3094_v7, 0.0  ;;  %v3080_v59 = vmul.f32 %v7897_v16, %v7897_v16  ;;  %v5200_v34 = vpop.f32.mrb[62].mxu0  ;;  %v3127_v58 = vsub.f32 %v7775_v44, %v7885_v24 }
 0x89f   : > { %v3143_v56 = vadd.f32 1e-05, %v3111_v37  ;;  %v3097_v12 = vsub.f32 %v5200_v34, %v3081_v3  ;;  %v3025_v42 = vpop.f32.mrb[63].mxu0  ;;  %v3126_v43 = vsub.f32 %v7764_v22, %v7889_v9  ;;  %v3129_v44 = vsub.f32 %v7782_v51, %v7893_v57 }
 0x8a0   : > { %v3142_v4 = vadd.f32 1e-05, %v3110_v38  ;;  %v3096_v40 = vsub.f32 %v3025_v42, %v3080_v59  ;;  %v7903_v39 = vpop.f32.mrb[48].mxu1 }
 0x8a1   : > { %5814 = vrsqrt.f32 %v3143_v56  ;;  %v3113_v0 = vmax.f32 %v3097_v12, 0.0  ;;  %v3083_v6 = vmul.f32 %v7903_v39, %v7903_v39  ;;  %v7909_v11 = vpop.f32.mrb[49].mxu1 }
 0x8a2   : > { %5816 = vrsqrt.f32 %v3142_v4  ;;  %v3112_v1 = vmax.f32 %v3096_v40, 0.0  ;;  %v3082_v26 = vmul.f32 %v7909_v11, %v7909_v11  ;;  %v5203_v21 = vpop.f32.mrb[64].mxu0  ;;  %v7931_v4 = vld [vmem:[#allocation19] ss:$0 sm:$0xff]  ;;  %v3128_v40 = vsub.f32 %v7770_v52, %v7897_v16 }
 0x8a3   : > { %v5807_v49 = vpop.eup %5806  ;;  %v3145_v7 = vadd.f32 1e-05, %v3113_v0  ;;  %v3099_v37 = vsub.f32 %v5203_v21, %v3083_v6  ;;  %v3035_v3 = vpop.f32.mrb[65].mxu0 }
 0x8a4   : > { %v5809_v38 = vpop.eup %5808  ;;  %v3171_v59 = vmul.f32 %v5807_v49, %v3123_v55  ;;  %v3144_v2 = vadd.f32 1e-05, %v3112_v1  ;;  %v3098_v34 = vsub.f32 %v3035_v3, %v3082_v26  ;;  %v7921_v56 = vpop.f32.mrb[50].mxu1 }
 0x8a5   : > { %v3170_v12 = vmul.f32 %v5809_v38, %v3122_v13  ;;  %5818 = vrsqrt.f32 %v3145_v7  ;;  %v3115_v42 = vmax.f32 %v3099_v37, 0.0  ;;  %v3085_v61 = vmul.f32 %v7921_v56, %v7921_v56  ;;  %v7925_v32 = vpop.f32.mrb[51].mxu1 }
 0x8a6   : > { %5820 = vrsqrt.f32 %v3144_v2  ;;  %v3114_v24 = vmax.f32 %v3098_v34, 0.0  ;;  %v3084_v22 = vmul.f32 %v7925_v32, %v7925_v32  ;;  %v5206_v9 = vpop.f32.mrb[66].mxu0 }
 0x8a7   : > { %v5811_v55 = vpop.eup %5810  ;;  %v3147_v0 = vadd.f32 1e-05, %v3115_v42  ;;  %v3101_v6 = vsub.f32 %v5206_v9, %v3085_v61  ;;  %v3045_v1 = vpop.f32.mrb[67].mxu0  ;;  %v3192_v34 = vmul.f32 %v7931_v4, %v3170_v12  ;;  %v7947_v61 = vld [vmem:[#allocation20] ss:$0 sm:$0xff] }
 0x8a8   : > { %v5813_v26 = vpop.eup %5812  ;;  %v3173_v51 = vmul.f32 %v5811_v55, %v3125_v28  ;;  %v3146_v21 = vadd.f32 1e-05, %v3114_v24  ;;  %v3100_v49 = vsub.f32 %v3045_v1, %v3084_v22  ;;  %v7939_v7 = vpop.f32.mrb[52].mxu1  ;;  %v3193_v55 = vmul.f32 %v7931_v4, %v3171_v59 }
 0x8a9   : > { %v3172_v37 = vmul.f32 %v5813_v26, %v3124_v30  ;;  %5822 = vrsqrt.f32 %v3147_v0  ;;  %v3117_v3 = vmax.f32 %v3101_v6, 0.0  ;;  %v3087_v52 = vmul.f32 %v7939_v7, %v7939_v7  ;;  %v7943_v16 = vpop.f32.mrb[53].mxu1 }
 0x8aa   : > { %v3195_v38 = vmul.f32 %v7931_v4, %v3173_v51  ;;  %5824 = vrsqrt.f32 %v3146_v21  ;;  %v3116_v2 = vmax.f32 %v3100_v49, 0.0  ;;  %v5209_v28 = vpop.f32.mrb[68].mxu0  ;;  %v3086_v22 = vmul.f32 %v7943_v16, %v7943_v16 }
 0x8ab   : > { %v5815_v42 = vpop.eup %5814  ;;  %v3194_v24 = vmul.f32 %v7931_v4, %v3172_v37  ;;  %v3149_v30 = vadd.f32 1e-05, %v3117_v3  ;;  %v3055_v9 = vpop.f32.mrb[69].mxu0  ;;  %v3103_v51 = vsub.f32 %v5209_v28, %v3087_v52  ;;  %v3133_v52 = vsub.f32 %v7818_v27, %v7921_v56 }
 0x8ac   : > { %v5817_v0 = vpop.eup %5816  ;;  %v3217_v6 = vadd.f32 %v7947_v61, %v3195_v38  ;;  %v3175_v1 = vmul.f32 %v5815_v42, %v3127_v58  ;;  %v3148_v26 = vadd.f32 1e-05, %v3116_v2  ;;  %v7954_v21 = vpop.f32.mrb[54].mxu1  ;;  %v3102_v37 = vsub.f32 %v3055_v9, %v3086_v22 }
 0x8ad   : > { %v3216_v12 = vadd.f32 %v7947_v61, %v3194_v24  ;;  %v3174_v49 = vmul.f32 %v5817_v0, %v3126_v43  ;;  %5826 = vrsqrt.f32 %v3149_v30  ;;  %v7957_v3 = vpop.f32.mrb[55].mxu1  ;;  %v3119_v13 = vmax.f32 %v3103_v51, 0.0 }
 0x8ae   : > { %v3233_v57 = vmax.f32 %v3217_v6, 0.0  ;;  %5828 = vrsqrt.f32 %v3148_v26  ;;  %v3089_v59 = vmul.f32 %v7954_v21, %v7954_v21  ;;  %v5212_v18 = vpop.f32.mrb[70].mxu0  ;;  %v3118_v2 = vmax.f32 %v3102_v37, 0.0 }
 0x8af   : > { %v5819_v38 = vpop.eup %5818  ;;  %v3232_v58 = vmax.f32 %v3216_v12, 0.0  ;;  %v3088_v43 = vmul.f32 %v7957_v3, %v7957_v3  ;;  %v3065_v28 = vpop.f32.mrb[71].mxu0  ;;  %v3132_v30 = vsub.f32 %v7806_v35, %v7925_v32  ;;  %v3151_v22 = vadd.f32 1e-05, %v3119_v13 }
 0x8b0   : > { %v5821_v42 = vpop.eup %5820  ;;  %v3177_v24 = vmul.f32 %v5819_v38, %v3129_v44  ;;  %v3105_v9 = vsub.f32 %v5212_v18, %v3089_v59  ;;  %v3150_v6 = vadd.f32 1e-05, %v3118_v2  ;;  %v3214_v51 = vadd.f32 %v7947_v61, %v3192_v34 }
 0x8b1   : > { %v3176_v0 = vmul.f32 %v5821_v42, %v3128_v40  ;;  %v3104_v26 = vsub.f32 %v3065_v28, %v3088_v43  ;;  %5830 = vrsqrt.f32 %v3151_v22  ;;  %v3215_v27 = vadd.f32 %v7947_v61, %v3193_v55 }
 0x8b2   : > { %v3121_v12 = vmax.f32 %v3105_v9, 0.0  ;;  %v3247_v56 = vpack.c.bf16 %v3233_v57, %v3232_v58  ;;  %5832 = vrsqrt.f32 %v3150_v6  ;;  %v3230_v5 = vmax.f32 %v3214_v51, 0.0 }
 0x8b3   : > { %v5823_v37 = vpop.eup %5822  ;;  %v3120_v45 = vmax.f32 %v3104_v26, 0.0  ;;  %v3196_v44 = vmul.f32 %v7931_v4, %v3174_v49  ;;  %v8525_v18 = vsub.f32 %v7811_v41, %v7903_v39  ;;  %v3231_v40 = vmax.f32 %v3215_v27, 0.0 }
 0x8b4   : > { %v5825_v38 = vpop.eup %5824  ;;  %v3153_v32 = vadd.f32 1e-05, %v3121_v12  ;;  %v3197_v13 = vmul.f32 %v7931_v4, %v3175_v1  ;;  %v8526_v34 = vsub.f32 %v7800_v60, %v7909_v11  ;;  %v3198_v58 = vmul.f32 %v7931_v4, %v3176_v0 }
 0x8b5   : > { %v3179_v35 = vmul.f32 %v5823_v37, %v8525_v18  ;;  %v3152_v57 = vadd.f32 1e-05, %v3120_v45  ;;  %v3218_v59 = vadd.f32 %v7947_v61, %v3196_v44  ;;  %v3246_v49 = vpack.c.bf16 %v3231_v40, %v3230_v5 }
 0x8b6   : > { %v3178_v55 = vmul.f32 %v5825_v38, %v8526_v34  ;;  %5834 = vrsqrt.f32 %v3153_v32  ;;  %v3219_v2 = vadd.f32 %v7947_v61, %v3197_v13  ;;  %v3199_v41 = vmul.f32 %v7931_v4, %v3177_v24 }
 0x8b7   : > { %v5827_v39 = vpop.eup %5826  ;;  %5836 = vrsqrt.f32 %v3152_v57  ;;  %v3234_v43 = vmax.f32 %v3218_v59, 0.0  ;;  %v3220_v1 = vadd.f32 %v7947_v61, %v3198_v58  ;;  %5221 = vmatprep.mubr.msk.bf16.mxu1 %vm2064_vm0, %v3246_v49  ;;  %v3201_v5 = vmul.f32 %v7931_v4, %v3179_v35 }
 0x8b8   : > { %v3200_v28 = vmul.f32 %v7931_v4, %v3178_v55  ;;  %v5829_v60 = vpop.eup %5828  ;;  %v3181_v11 = vmul.f32 %v5827_v39, %v3133_v52  ;;  %v3235_v45 = vmax.f32 %v3219_v2, 0.0  ;;  %v3221_v42 = vadd.f32 %v7947_v61, %v3199_v41  ;;  %5222 = vmatmul.mubr.msk.bf16.vlgmr.msra.gmra.mrb[56].mxu1 %vm2064_vm0, %v3247_v56 }
 0x8b9   : > { %v3180_v22 = vmul.f32 %v5829_v60, %v3132_v30  ;;  %v3236_v24 = vmax.f32 %v3220_v1, 0.0  ;;  %v3223_v26 = vadd.f32 %v7947_v61, %v3201_v5  ;;  %5456 = vmatpush3.bf16.msra.mxu1 %v7635_v25  ;;  %v3135_v52 = vsub.f32 %v7844_v63, %v7939_v7  ;;  %v8022_v60 = vld [vmem:[#allocation23] ss:$0 sm:$0xff] }
 0x8ba   : > { %v3222_v9 = vadd.f32 %v7947_v61, %v3200_v28  ;;  %v3248_v0 = vpack.c.bf16 %v3235_v45, %v3234_v43  ;;  %v3237_v6 = vmax.f32 %v3221_v42, 0.0  ;;  %v3203_v51 = vmul.f32 %v7931_v4, %v3181_v11  ;;  %5458 = vmatprep.subr.bf16.mxu1 %v7640_v53 }
 0x8bb   : > { %v3202_v27 = vmul.f32 %v7931_v4, %v3180_v22  ;;  %v5831_v30 = vpop.eup %5830  ;;  %v3134_v56 = vsub.f32 %v7834_v54, %v7943_v16  ;;  %v3239_v44 = vmax.f32 %v3223_v26, 0.0  ;;  %v3137_v40 = vsub.f32 %v7850_v20, %v7954_v21 }
 0x8bc   : > { %v3238_v12 = vmax.f32 %v3222_v9, 0.0  ;;  %5225 = vmatprep.mubr.msk.bf16.mxu1 %vm2064_vm0, %v3248_v0  ;;  %v3249_v37 = vpack.c.bf16 %v3237_v6, %v3236_v24  ;;  %v3225_v38 = vadd.f32 %v7947_v61, %v3203_v51  ;;  %v5833_v18 = vpop.eup %5832  ;;  %v3183_v25 = vmul.f32 %v5831_v30, %v3135_v52 }
 0x8bd   : > { %v3224_v35 = vadd.f32 %v7947_v61, %v3202_v27  ;;  %v3182_v63 = vmul.f32 %v5833_v18, %v3134_v56  ;;  %5460 = vmatpush3.bf16.msra.mxu1 %v7640_v53  ;;  %v3136_v34 = vsub.f32 %v7839_v23, %v7957_v3 }
 0x8be   : > { %v3250_v7 = vpack.c.bf16 %v3239_v44, %v3238_v12  ;;  %v3241_v32 = vmax.f32 %v3225_v38, 0.0  ;;  %v3205_v54 = vmul.f32 %v7931_v4, %v3183_v25  ;;  %5462 = vmatprep.subr.bf16.mxu1 %v7651_v19 }
 0x8bf   : > { %v3240_v13 = vmax.f32 %v3224_v35, 0.0  ;;  %v3204_v55 = vmul.f32 %v7931_v4, %v3182_v63 }
 0x8c0   : > { %v5835_v16 = vpop.eup %5834  ;;  %5226 = vmatmul.mubr.msk.bf16.gmra.mrb[60].mxu1 %vm2064_vm0, %v3249_v37  ;;  %v3227_v53 = vadd.f32 %v7947_v61, %v3205_v54 }
 0x8c1   : > { %v5837_v57 = vpop.eup %5836  ;;  %v3185_v59 = vmul.f32 %v5835_v16, %v3137_v40  ;;  %v3251_v58 = vpack.c.bf16 %v3241_v32, %v3240_v13  ;;  %5229 = vmatprep.mubr.msk.bf16.mxu1 %vm2064_vm0, %v3250_v7  ;;  %v3226_v20 = vadd.f32 %v7947_v61, %v3204_v55  ;;  %5464 = vmatpush3.bf16.msra.mxu1 %v7651_v19 }
 0x8c2   : > { %v3184_v49 = vmul.f32 %v5837_v57, %v3136_v34  ;;  %v3243_v21 = vmax.f32 %v3227_v53, 0.0  ;;  %5466 = vmatprep.subr.bf16.mxu1 %v7662_v48 }
 0x8c3   : > { %v3207_v2 = vmul.f32 %v7931_v4, %v3185_v59  ;;  %v3242_v23 = vmax.f32 %v3226_v20, 0.0 }
 0x8c4   : > { %v3206_v3 = vmul.f32 %v7931_v4, %v3184_v49 }
 0x8c5   : > { %v3229_v41 = vadd.f32 %v7947_v61, %v3207_v2  ;;  %v3252_v39 = vpack.c.bf16 %v3243_v21, %v3242_v23  ;;  %5468 = vmatpush3.bf16.msra.mxu1 %v7662_v48 }
 0x8c6   : > { %v3228_v43 = vadd.f32 %v7947_v61, %v3206_v3 }
 0x8c7   : > { %v3245_v1 = vmax.f32 %v3229_v41, 0.0 }
 0x8c8   : > { %v3244_v28 = vmax.f32 %v3228_v43, 0.0  ;;  %5230 = vmatmul.mubr.msk.bf16.gmra.mrb[64].mxu1 %vm2064_vm0, %v3251_v58 }
 0x8c9   : > { %5233 = vmatprep.mubr.msk.bf16.mxu1 %vm2064_vm0, %v3252_v39 }
 0x8ca   : > { %v3253_v19 = vpack.c.bf16 %v3245_v1, %v3244_v28  ;;  %v5738_v28 = vld [vmem:[#allocation25] sm:$0xff]  }
 0x8cb   : > { %5317 = vmatprep.subr.bf16.mxu0 %v5738_v28 }
 0x8d0   : > { %5234 = vmatmul.mubr.msk.bf16.gmra.mrb[68].mxu1 %vm2064_vm0, %v3253_v19  ;;  %v5739_v19 = vld [vmem:[#allocation25 + $0x8] sm:$0xff]  }
 0x98b   : > { %v5223_v11 = vpop.f32.mrb[56].mxu1 }
 0x98c   : > { %v3351_v4 = vpop.f32.mrb[57].mxu1  ;;  %v8028_v61 = vadd.f32 %v5223_v11, %v8022_v60  ;;  %v5741_v11 = vld [vmem:[#allocation25 + $0x18] sm:$0xff]  }
 0x98d   : > { %v8025_v45 = vadd.f32 %v8022_v60, %v3351_v4  ;;  %v5224_v42 = vpop.f32.mrb[58].mxu1 }
 0x98e   : > { %v3354_v48 = vpop.f32.mrb[59].mxu1  ;;  %v8038_v24 = vadd.f32 %v5224_v42, %v8022_v60  ;;  %v3611_v0 = vmul.f32 %v8028_v61, %v8028_v61 }
 0x98f   : > { %v3609_v5 = vmul.f32 %v8025_v45, %v8025_v45  ;;  %v8033_v22 = vadd.f32 %v8022_v60, %v3354_v48  ;;  %5253 = vmatprep.mubr.msk.f32.mxu0 %vm2064_vm0, %v8025_v45 }
 0x990   : > { %v3612_v51 = vmul.f32 %v8038_v24, %v8038_v24 }
 0x991   : > { %v3610_v9 = vmul.f32 %v8033_v22, %v8033_v22  ;;  %5254 = vmatmul.mubr.msk.f32.vlgmr.msra.gmra.mrb[72].mxu0 %vm2064_vm0, %v8033_v22  ;;  %5293 = vmatprep.mubr.msk.f32.mxu1 %vm2064_vm0, %v3609_v5 }
 0x992   : > { %5256 = vmatprep.mubr.msk.f32.mxu0 %vm2064_vm0, %v8028_v61  ;;  %5318 = vmatpush3.bf16.msra.mxu0 %v5738_v28 }
 0x993   : > { %v5227_v6 = vpop.f32.mrb[60].mxu1  ;;  %5294 = vmatmul.mubr.msk.f32.vlgmr.msra.gmra.mrb[72].mxu1 %vm2064_vm0, %v3610_v9  ;;  %5319 = vmatprep.subr.bf16.mxu0 %v5739_v19 }
 0x994   : > { %v3367_v26 = vpop.f32.mrb[61].mxu1  ;;  %5296 = vmatprep.mubr.msk.f32.mxu1 %vm2064_vm0, %v3611_v0  ;;  %v8059_v27 = vadd.f32 %v5227_v6, %v8022_v60 }
 0x995   : > { %v8054_v52 = vadd.f32 %v8022_v60, %v3367_v26  ;;  %v5228_v12 = vpop.f32.mrb[62].mxu1  ;;  %5257 = vmatmul.mubr.msk.f32.gmra.mrb[74].mxu0 %vm2064_vm0, %v8038_v24 }
 0x996   : > { %v3370_v30 = vpop.f32.mrb[63].mxu1  ;;  %v8070_v44 = vadd.f32 %v5228_v12, %v8022_v60  ;;  %v3615_v18 = vmul.f32 %v8059_v27, %v8059_v27  ;;  %5320 = vmatpush3.bf16.msra.mxu0 %v5739_v19 }
 0x997   : > { %v3613_v56 = vmul.f32 %v8054_v52, %v8054_v52  ;;  %v8064_v37 = vadd.f32 %v8022_v60, %v3370_v30  ;;  %5259 = vmatprep.mubr.msk.f32.mxu0 %vm2064_vm0, %v8054_v52  ;;  %5297 = vmatmul.mubr.msk.f32.gmra.mrb[74].mxu1 %vm2064_vm0, %v3612_v51 }
 0x998   : > { %v3616_v63 = vmul.f32 %v8070_v44, %v8070_v44 }
 0x999   : > { %v3614_v38 = vmul.f32 %v8064_v37, %v8064_v37  ;;  %5260 = vmatmul.mubr.msk.f32.gmra.mrb[76].mxu0 %vm2064_vm0, %v8064_v37  ;;  %5299 = vmatprep.mubr.msk.f32.mxu1 %vm2064_vm0, %v3613_v56 }
 0x99a   : > { %5262 = vmatprep.mubr.msk.f32.mxu0 %vm2064_vm0, %v8059_v27 }
 0x99b   : > { %v5231_v25 = vpop.f32.mrb[64].mxu1  ;;  %5300 = vmatmul.mubr.msk.f32.gmra.mrb[76].mxu1 %vm2064_vm0, %v3614_v38 }
 0x99c   : > { %v3383_v35 = vpop.f32.mrb[65].mxu1  ;;  %5302 = vmatprep.mubr.msk.f32.mxu1 %vm2064_vm0, %v3615_v18  ;;  %v8091_v40 = vadd.f32 %v5231_v25, %v8022_v60 }
 0x99d   : > { %v8086_v7 = vadd.f32 %v8022_v60, %v3383_v35  ;;  %v5232_v32 = vpop.f32.mrb[66].mxu1  ;;  %5263 = vmatmul.mubr.msk.f32.gmra.mrb[78].mxu0 %vm2064_vm0, %v8070_v44 }
 0x99e   : > { %v3386_v13 = vpop.f32.mrb[67].mxu1  ;;  %v8102_v34 = vadd.f32 %v5232_v32, %v8022_v60  ;;  %v3619_v57 = vmul.f32 %v8091_v40, %v8091_v40 }
 0x99f   : > { %v3617_v54 = vmul.f32 %v8086_v7, %v8086_v7  ;;  %v8096_v16 = vadd.f32 %v8022_v60, %v3386_v13  ;;  %5265 = vmatprep.mubr.msk.f32.mxu0 %vm2064_vm0, %v8086_v7  ;;  %5303 = vmatmul.mubr.msk.f32.gmra.mrb[78].mxu1 %vm2064_vm0, %v3616_v63 }
 0x9a0   : > { %v3620_v53 = vmul.f32 %v8102_v34, %v8102_v34 }
 0x9a1   : > { %v3618_v55 = vmul.f32 %v8096_v16, %v8096_v16  ;;  %5266 = vmatmul.mubr.msk.f32.gmra.mrb[80].mxu0 %vm2064_vm0, %v8096_v16  ;;  %5305 = vmatprep.mubr.msk.f32.mxu1 %vm2064_vm0, %v3617_v54 }
 0x9a2   : > { %5268 = vmatprep.mubr.msk.f32.mxu0 %vm2064_vm0, %v8091_v40 }
 0x9a3   : > { %v5235_v59 = vpop.f32.mrb[68].mxu1  ;;  %5306 = vmatmul.mubr.msk.f32.gmra.mrb[80].mxu1 %vm2064_vm0, %v3618_v55 }
 0x9a4   : > { %v3399_v58 = vpop.f32.mrb[69].mxu1  ;;  %5308 = vmatprep.mubr.msk.f32.mxu1 %vm2064_vm0, %v3619_v57  ;;  %v8123_v21 = vadd.f32 %v5235_v59, %v8022_v60 }
 0x9a5   : > { %v8118_v49 = vadd.f32 %v8022_v60, %v3399_v58  ;;  %v5236_v20 = vpop.f32.mrb[70].mxu1  ;;  %5269 = vmatmul.mubr.msk.f32.gmra.mrb[82].mxu0 %vm2064_vm0, %v8102_v34 }
 0x9a6   : > { %v3402_v2 = vpop.f32.mrb[71].mxu1  ;;  %v8134_v41 = vadd.f32 %v5236_v20, %v8022_v60  ;;  %v3623_v43 = vmul.f32 %v8123_v21, %v8123_v21 }
 0x9a7   : > { %v3621_v23 = vmul.f32 %v8118_v49, %v8118_v49  ;;  %v8128_v3 = vadd.f32 %v8022_v60, %v3402_v2  ;;  %5271 = vmatprep.mubr.msk.f32.mxu0 %vm2064_vm0, %v8118_v49  ;;  %5309 = vmatmul.mubr.msk.f32.gmra.mrb[82].mxu1 %vm2064_vm0, %v3620_v53  ;;  %v5740_v60 = vld [vmem:[#allocation25 + $0x10] sm:$0xff]  }
 0x9a8   : > { %v3624_v1 = vmul.f32 %v8134_v41, %v8134_v41  ;;  %5321 = vmatprep.subr.bf16.mxu0 %v5740_v60 }
 0x9a9   : > { %v3622_v39 = vmul.f32 %v8128_v3, %v8128_v3  ;;  %5272 = vmatmul.mubr.msk.f32.gmra.mrb[84].mxu0 %vm2064_vm0, %v8128_v3  ;;  %5311 = vmatprep.mubr.msk.f32.mxu1 %vm2064_vm0, %v3621_v23 }
 0x9aa   : > { %5274 = vmatprep.mubr.msk.f32.mxu0 %vm2064_vm0, %v8123_v21  ;;  %5322 = vmatpush3.bf16.msra.mxu0 %v5740_v60 }
 0x9ab   : > { %5312 = vmatmul.mubr.msk.f32.gmra.mrb[84].mxu1 %vm2064_vm0, %v3622_v39  ;;  %5323 = vmatprep.subr.bf16.mxu0 %v5741_v11 }
 0x9ac   : > { %5314 = vmatprep.mubr.msk.f32.mxu1 %vm2064_vm0, %v3623_v43 }
 0x9ad   : > { %5275 = vmatmul.mubr.msk.f32.gmra.mrb[86].mxu0 %vm2064_vm0, %v8134_v41 }
 0x9ae   : > { %5324 = vmatpush3.bf16.msra.mxu0 %v5741_v11 }
 0x9af   : > { %5315 = vmatmul.mubr.msk.f32.gmra.mrb[86].mxu1 %vm2064_vm0, %v3624_v1 }
 0xa64   : > { %v8152_v4 = vpop.f32.mrb[72].mxu0 }
 0xa65   : > { %v3819_v42 = vmul.f32 %v8152_v4, %v8152_v4  ;;  %v8156_v48 = vpop.f32.mrb[73].mxu0 }
 0xa66   : > { %v3818_v5 = vmul.f32 %v8156_v48, %v8156_v48  ;;  %v5295_v9 = vpop.f32.mrb[72].mxu1 }
 0xa67   : > { %v3835_v0 = vsub.f32 %v5295_v9, %v3819_v42  ;;  %v3739_v6 = vpop.f32.mrb[73].mxu1 }
 0xa68   : > { %v3834_v26 = vsub.f32 %v3739_v6, %v3818_v5  ;;  %v8160_v51 = vpop.f32.mrb[74].mxu0  ;;  %v3867_v6 = vsub.f32 %v8033_v22, %v8152_v4 }
 0xa69   : > { %v3851_v12 = vmax.f32 %v3835_v0, 0.0  ;;  %v3821_v30 = vmul.f32 %v8160_v51, %v8160_v51  ;;  %v8164_v56 = vpop.f32.mrb[75].mxu0 }
 0xa6a   : > { %v3850_v38 = vmax.f32 %v3834_v26, 0.0  ;;  %v3820_v18 = vmul.f32 %v8164_v56, %v8164_v56  ;;  %v5298_v25 = vpop.f32.mrb[74].mxu1 }
 0xa6b   : > { %v3883_v35 = vadd.f32 1e-05, %v3851_v12  ;;  %v3837_v63 = vsub.f32 %v5298_v25, %v3821_v30  ;;  %v3749_v32 = vpop.f32.mrb[75].mxu1 }
 0xa6c   : > { %v3882_v13 = vadd.f32 1e-05, %v3850_v38  ;;  %v3836_v54 = vsub.f32 %v3749_v32, %v3820_v18  ;;  %v8168_v55 = vpop.f32.mrb[76].mxu0  ;;  %v3866_v38 = vsub.f32 %v8025_v45, %v8156_v48  ;;  %v3869_v18 = vsub.f32 %v8038_v24, %v8160_v51 }
 0xa6d   : > { %5838 = vrsqrt.f32 %v3883_v35  ;;  %v3853_v57 = vmax.f32 %v3837_v63, 0.0  ;;  %v3823_v59 = vmul.f32 %v8168_v55, %v8168_v55  ;;  %v8172_v58 = vpop.f32.mrb[77].mxu0  ;;  %v3868_v32 = vsub.f32 %v8028_v61, %v8164_v56 }
 0xa6e   : > { %5840 = vrsqrt.f32 %v3882_v13  ;;  %v3852_v53 = vmax.f32 %v3836_v54, 0.0  ;;  %v3822_v20 = vmul.f32 %v8172_v58, %v8172_v58  ;;  %v5301_v2 = vpop.f32.mrb[76].mxu1  ;;  %v3871_v45 = vsub.f32 %v8064_v37, %v8168_v55 }
 0xa6f   : > { %v3885_v23 = vadd.f32 1e-05, %v3853_v57  ;;  %v3839_v39 = vsub.f32 %v5301_v2, %v3823_v59  ;;  %v3759_v43 = vpop.f32.mrb[77].mxu1  ;;  %v3870_v61 = vsub.f32 %v8054_v52, %v8172_v58 }
 0xa70   : > { %v3884_v1 = vadd.f32 1e-05, %v3852_v53  ;;  %v3838_v28 = vsub.f32 %v3759_v43, %v3822_v20  ;;  %v8176_v19 = vpop.f32.mrb[78].mxu0 }
 0xa71   : > { %5842 = vrsqrt.f32 %v3885_v23  ;;  %v3855_v60 = vmax.f32 %v3839_v39, 0.0  ;;  %v3825_v11 = vmul.f32 %v8176_v19, %v8176_v19  ;;  %v8180_v42 = vpop.f32.mrb[79].mxu0  ;;  %v3873_v56 = vsub.f32 %v8070_v44, %v8176_v19 }
 0xa72   : > { %5844 = vrsqrt.f32 %v3884_v1  ;;  %v3854_v5 = vmax.f32 %v3838_v28, 0.0  ;;  %v3824_v9 = vmul.f32 %v8180_v42, %v8180_v42  ;;  %v5304_v0 = vpop.f32.mrb[78].mxu1  ;;  %v3872_v37 = vsub.f32 %v8059_v27, %v8180_v42 }
 0xa73   : > { %v3887_v26 = vadd.f32 1e-05, %v3855_v60  ;;  %v3841_v12 = vsub.f32 %v5304_v0, %v3825_v11  ;;  %v3769_v30 = vpop.f32.mrb[79].mxu1  ;;  %v8221_v0 = vld [vmem:[%s8527_s19] ss:$0 sm:$0xff]  ;;  %s4204_s19 = sshll.u32 %s8343_s1, 4  ;;  %s8365_s19 = int_to_ptr.vmem [resolvable:$true] %s4204_s19 }
 0xa74   : > { %v3886_v25 = vadd.f32 1e-05, %v3854_v5  ;;  %v3840_v35 = vsub.f32 %v3769_v30, %v3824_v9  ;;  %v8190_v63 = vpop.f32.mrb[80].mxu0  ;;  %s6292_s4 = scalar_lea.vmem %s8365_s19, 2048 }
 0xa75   : > { %5846 = vrsqrt.f32 %v3887_v26  ;;  %v3857_v13 = vmax.f32 %v3841_v12, 0.0  ;;  %v3827_v22 = vmul.f32 %v8190_v63, %v8190_v63  ;;  %v8196_v4 = vpop.f32.mrb[81].mxu0  ;;  %v3875_v28 = vsub.f32 %v8096_v16, %v8190_v63  ;;  %p6293_p10 = scmp.ne.s32.totalorder %s8365_s19, %s6292_s4 }
 0xa76   : > { %5848 = vrsqrt.f32 %v3886_v25  ;;  %v3856_v48 = vmax.f32 %v3840_v35, 0.0  ;;  %v3826_v24 = vmul.f32 %v8196_v4, %v8196_v4  ;;  %v5307_v51 = vpop.f32.mrb[80].mxu1 }
 0xa77   : > { %v5839_v54 = vpop.eup %5838  ;;  %v3889_v57 = vadd.f32 1e-05, %v3857_v13  ;;  %v3843_v59 = vsub.f32 %v5307_v51, %v3827_v22  ;;  %v3779_v53 = vpop.f32.mrb[81].mxu1  ;;  %p6294_p12 = pnand %p6293_p10, %p8536_p11 }
 0xa78   : > { %v5841_v20 = vpop.eup %5840  ;;  %v3915_v2 = vmul.f32 %v5839_v54, %v3867_v6  ;;  %v3888_v55 = vadd.f32 1e-05, %v3856_v48  ;;  %v3842_v23 = vsub.f32 %v3779_v53, %v3826_v24  ;;  %v8208_v39 = vpop.f32.mrb[82].mxu0  ;;  %v3874_v6 = vsub.f32 %v8086_v7, %v8196_v4 }
 0xa79   : > { %v3914_v43 = vmul.f32 %v5841_v20, %v3866_v38  ;;  %5850 = vrsqrt.f32 %v3889_v57  ;;  %v3859_v1 = vmax.f32 %v3843_v59, 0.0  ;;  %v3829_v52 = vmul.f32 %v8208_v39, %v8208_v39  ;;  %v8212_v58 = vpop.f32.mrb[83].mxu0  ;;  %p6295_p0 = pneg %p6294_p12 }
 0xa7a   : > { %5852 = vrsqrt.f32 %v3888_v55  ;;  %v3858_v60 = vmax.f32 %v3842_v23, 0.0  ;;  %v3828_v11 = vmul.f32 %v8212_v58, %v8212_v58  ;;  %v5310_v5 = vpop.f32.mrb[82].mxu1  ;;  %v3877_v12 = vsub.f32 %v8102_v34, %v8208_v39 }
 0xa7b   : > { %v5843_v9 = vpop.eup %5842  ;;  %v3891_v26 = vadd.f32 1e-05, %v3859_v1  ;;  %v3845_v30 = vsub.f32 %v5310_v5, %v3829_v52  ;;  %v3789_v38 = vpop.f32.mrb[83].mxu1  ;;  %v3876_v22 = vsub.f32 %v8091_v40, %v8212_v58  ;;  %v3936_v55 = vmul.f32 %v8221_v0, %v3914_v43  ;;  %v8240_v1 = vld [vmem:[%s8528_s9] ss:$0 sm:$0xff]  ;;  %s8535_s9 = sld [smem:[#allocation57_spill]] }
 0xa7c   : > { %v5845_v25 = vpop.eup %5844  ;;  %v3917_v35 = vmul.f32 %v5843_v9, %v3869_v18  ;;  %v3890_v13 = vadd.f32 1e-05, %v3858_v60  ;;  %v3844_v48 = vsub.f32 %v3789_v38, %v3828_v11  ;;  %v8229_v24 = vpop.f32.mrb[84].mxu0  ;;  %v3937_v5 = vmul.f32 %v8221_v0, %v3915_v2 }
 0xa7d   : > { %v3916_v51 = vmul.f32 %v5845_v25, %v3868_v32  ;;  %5854 = vrsqrt.f32 %v3891_v26  ;;  %v3861_v54 = vmax.f32 %v3845_v30, 0.0  ;;  %v3831_v57 = vmul.f32 %v8229_v24, %v8229_v24  ;;  %v8233_v59 = vpop.f32.mrb[85].mxu0 }
 0xa7e   : > { %v3939_v53 = vmul.f32 %v8221_v0, %v3917_v35  ;;  %5856 = vrsqrt.f32 %v3890_v13  ;;  %v3860_v20 = vmax.f32 %v3844_v48, 0.0  ;;  %v5313_v18 = vpop.f32.mrb[84].mxu1  ;;  %v3830_v60 = vmul.f32 %v8233_v59, %v8233_v59 }
 0xa7f   : > { %v5847_v23 = vpop.eup %5846  ;;  %v3938_v32 = vmul.f32 %v8221_v0, %v3916_v51  ;;  %v3893_v52 = vadd.f32 1e-05, %v3861_v54  ;;  %v3799_v11 = vpop.f32.mrb[85].mxu1  ;;  %v3847_v38 = vsub.f32 %v5313_v18, %v3831_v57 }
 0xa80   : > { %v5849_v9 = vpop.eup %5848  ;;  %v3961_v26 = vadd.f32 %v8240_v1, %v3939_v53  ;;  %v3919_v30 = vmul.f32 %v5847_v23, %v3871_v45  ;;  %v3892_v43 = vadd.f32 1e-05, %v3860_v20  ;;  %v8247_v25 = vpop.f32.mrb[86].mxu0  ;;  %v3846_v48 = vsub.f32 %v3799_v11, %v3830_v60 }
 0xa81   : > { %v3960_v35 = vadd.f32 %v8240_v1, %v3938_v32  ;;  %v3918_v13 = vmul.f32 %v5849_v9, %v3870_v61  ;;  %5858 = vrsqrt.f32 %v3893_v52  ;;  %v8250_v51 = vpop.f32.mrb[87].mxu0  ;;  %v3863_v2 = vmax.f32 %v3847_v38, 0.0  ;;  %s8363_s6 = scalar_lea.hbm %s8535_s9, %s4620_s2 }
 0xa82   : > { %5860 = vrsqrt.f32 %v3892_v43  ;;  %v3833_v53 = vmul.f32 %v8247_v25, %v8247_v25  ;;  %v5316_v45 = vpop.f32.mrb[86].mxu1  ;;  %v3977_v57 = vadd.f32 %v3961_v26, %v7667_v31  ;;  %v3862_v23 = vmax.f32 %v3846_v48, 0.0 }
 0xa83   : > { %v5851_v20 = vpop.eup %5850  ;;  %v3976_v18 = vadd.f32 %v3960_v35, %v7673_v33  ;;  %v3832_v61 = vmul.f32 %v8250_v51, %v8250_v51  ;;  %v3809_v32 = vpop.f32.mrb[87].mxu1  ;;  %v3878_v11 = vsub.f32 %v8118_v49, %v8233_v59  ;;  %v3895_v9 = vadd.f32 1e-05, %v3863_v2 }
 0xa84   : > { %v5853_v52 = vpop.eup %5852  ;;  %v3921_v60 = vmul.f32 %v5851_v20, %v3873_v56  ;;  %v3849_v43 = vsub.f32 %v5316_v45, %v3833_v53  ;;  %v3894_v33 = vadd.f32 1e-05, %v3862_v23  ;;  %v3958_v38 = vadd.f32 %v8240_v1, %v3936_v55 }
 0xa85   : > { %v3920_v31 = vmul.f32 %v5853_v52, %v3872_v37  ;;  %v3848_v26 = vsub.f32 %v3809_v32, %v3832_v61  ;;  %5862 = vrsqrt.f32 %v3895_v9  ;;  %v3959_v48 = vadd.f32 %v8240_v1, %v3937_v5 }
 0xa86   : > { %v3865_v35 = vmax.f32 %v3849_v43, 0.0  ;;  %v3992_v54 = vmax.f32 %v3976_v18, 0.0  ;;  %5864 = vrsqrt.f32 %v3894_v33  ;;  %v3974_v56 = vadd.f32 %v3958_v38, %v7669_v10 }
 0xa87   : > { %v5855_v44 = vpop.eup %5854  ;;  %v3864_v19 = vmax.f32 %v3848_v26, 0.0  ;;  %v3993_v2 = vmax.f32 %v3977_v57, 0.0  ;;  %v3975_v37 = vadd.f32 %v3959_v48, %v7671_v46  ;;  %v3940_v55 = vmul.f32 %v8221_v0, %v3918_v13 }
 0xa88   : > { %v5857_v53 = vpop.eup %5856  ;;  %v3923_v27 = vmul.f32 %v5855_v44, %v3875_v28  ;;  %v3897_v42 = vadd.f32 1e-05, %v3865_v35  ;;  %v3990_v20 = vmax.f32 %v3974_v56, 0.0  ;;  %v3941_v57 = vmul.f32 %v8221_v0, %v3919_v30 }
 0xa89   : > { %v3922_v5 = vmul.f32 %v5857_v53, %v3874_v6  ;;  %v3896_v45 = vadd.f32 1e-05, %v3864_v19  ;;  %v4007_v18 = vpack.c.bf16 %v3993_v2, %v3992_v54  ;;  %v3991_v10 = vmax.f32 %v3975_v37, 0.0 }
 0xa8a   : > { %5866 = vrsqrt.f32 %v3897_v42  ;;  %v3962_v23 = vadd.f32 %v8240_v1, %v3940_v55  ;;  %v3942_v63 = vmul.f32 %v8221_v0, %v3920_v31  ;;  %v3943_v46 = vmul.f32 %v8221_v0, %v3921_v60 }
 0xa8b   : > { %v5859_v16 = vpop.eup %5858  ;;  %5868 = vrsqrt.f32 %v3896_v45  ;;  %v3944_v28 = vmul.f32 %v8221_v0, %v3922_v5  ;;  %v4006_v4 = vpack.c.bf16 %v3991_v10, %v3990_v20  ;;  %v3963_v6 = vadd.f32 %v8240_v1, %v3941_v57  ;;  %v8530_v45 = vld [vmem:[#allocation40_spill] sm:$0xff] }
 0xa8c   : > { %v5861_v13 = vpop.eup %5860  ;;  %v3925_v7 = vmul.f32 %v5859_v16, %v3877_v12  ;;  %v3978_v30 = vadd.f32 %v3962_v23, %v7685_v50  ;;  %v3964_v61 = vadd.f32 %v8240_v1, %v3942_v63  ;;  %v3965_v32 = vadd.f32 %v8240_v1, %v3943_v46  ;;  %v8531_v63 = vld [vmem:[#allocation39_spill] sm:$0xff] }
 0xa8d   : > { %v3924_v54 = vmul.f32 %v5861_v13, %v3876_v22  ;;  %v3945_v52 = vmul.f32 %v8221_v0, %v3923_v27  ;;  %5325 = vmatprep.mubr.msk.bf16.mxu0 %vm2064_vm0, %v4006_v4  ;;  %v3979_v34 = vadd.f32 %v3963_v6, %v7687_v36  ;;  %v3966_v12 = vadd.f32 %v8240_v1, %v3944_v28 }
 0xa8e   : > { %v3994_v39 = vmax.f32 %v3978_v30, 0.0  ;;  %v3947_v60 = vmul.f32 %v8221_v0, %v3925_v7  ;;  %5326 = vmatmul.mubr.msk.bf16.vlgmr.msra.gmra.mrb[88].mxu0 %vm2064_vm0, %v4007_v18  ;;  %v3980_v50 = vadd.f32 %v3964_v61, %v7689_v62  ;;  %v3981_v40 = vadd.f32 %v3965_v32, %v7682_v29 }
 0xa8f   : > { %v3967_v58 = vadd.f32 %v8240_v1, %v3945_v52  ;;  %v3946_v22 = vmul.f32 %v8221_v0, %v3924_v54  ;;  %v5863_v9 = vpop.eup %5862  ;;  %v3881_v43 = vsub.f32 %v8134_v41, %v8247_v25  ;;  %v3995_v36 = vmax.f32 %v3979_v34, 0.0 }
 0xa90   : > { %v3982_v31 = vadd.f32 %v3966_v12, %v7703_v47  ;;  %v3969_v33 = vadd.f32 %v8240_v1, %v3947_v60  ;;  %v5865_v26 = vpop.eup %5864  ;;  %v8529_v38 = vsub.f32 %v8128_v3, %v8229_v24  ;;  %v3996_v35 = vmax.f32 %v3980_v50, 0.0 }
 0xa91   : > { %v3997_v29 = vmax.f32 %v3981_v40, 0.0  ;;  %v3983_v48 = vadd.f32 %v3967_v58, %v7705_v17  ;;  %v3926_v44 = vmul.f32 %v5865_v26, %v3878_v11  ;;  %v4008_v19 = vpack.c.bf16 %v3995_v36, %v3994_v39 }
 0xa92   : > { %v3927_v62 = vmul.f32 %v5863_v9, %v8529_v38  ;;  %v3998_v41 = vmax.f32 %v3982_v31, 0.0  ;;  %v3968_v25 = vadd.f32 %v8240_v1, %v3946_v22  ;;  %v3985_v2 = vadd.f32 %v3969_v33, %v7700_v8 }
 0xa93   : > { %v4009_v47 = vpack.c.bf16 %v3997_v29, %v3996_v35  ;;  %v3999_v56 = vmax.f32 %v3983_v48, 0.0  ;;  %v3880_v24 = vsub.f32 %v8123_v21, %v8250_v51  ;;  %5329 = vmatprep.mubr.msk.bf16.mxu0 %vm2064_vm0, %v4008_v19  ;;  %v3948_v49 = vmul.f32 %v8221_v0, %v3926_v44 }
 0xa94   : > { %v3949_v53 = vmul.f32 %v8221_v0, %v3927_v62  ;;  %v5867_v3 = vpop.eup %5866  ;;  %v3984_v17 = vadd.f32 %v3968_v25, %v7707_v14  ;;  %v4001_v42 = vmax.f32 %v3985_v2, 0.0 }
 0xa95   : > { %v5869_v59 = vpop.eup %5868  ;;  %v3929_v11 = vmul.f32 %v5867_v3, %v3881_v43  ;;  %v4010_v27 = vpack.c.bf16 %v3999_v56, %v3998_v41  ;;  %v3970_v5 = vadd.f32 %v8240_v1, %v3948_v49 }
 0xa96   : > { %v3971_v37 = vadd.f32 %v8240_v1, %v3949_v53  ;;  %v3928_v55 = vmul.f32 %v5869_v59, %v3880_v24  ;;  %v4000_v8 = vmax.f32 %v3984_v17, 0.0  ;;  %5330 = vmatmul.mubr.msk.bf16.gmra.mrb[92].mxu0 %vm2064_vm0, %v4009_v47 }
 0xa97   : > { %v3951_v51 = vmul.f32 %v8221_v0, %v3929_v11  ;;  %5333 = vmatprep.mubr.msk.bf16.mxu0 %vm2064_vm0, %v4010_v27  ;;  %v3986_v20 = vadd.f32 %v3970_v5, %v8530_v45 }
 0xa98   : > { %v3987_v21 = vadd.f32 %v3971_v37, %v7721_v15  ;;  %v4011_v14 = vpack.c.bf16 %v4001_v42, %v4000_v8  ;;  %v3950_v18 = vmul.f32 %v8221_v0, %v3928_v55  ;;  %v8532_v15 = vld [vmem:[#allocation41_spill] sm:$0xff]  ;;  %v4600_v0 = vld [vmem:[%s8533_s7] ss:$0 sm:$0xff]  ;;  %s6407_s7 = smov [#allocation26]  }
 0xa99   : > { %v3973_v57 = vadd.f32 %v8240_v1, %v3951_v51  ;;  %v4002_v23 = vmax.f32 %v3986_v20, 0.0  ;;  %s6296_s3 = sshll.u32 %s6407_s7, 4  ;;  %s6297_s3 = int_to_ptr.vmem [resolvable:$false] %s6296_s3 }
 0xa9a   : > { %v4003_v10 = vmax.f32 %v3987_v21, 0.0  ;;  %v3972_v16 = vadd.f32 %v8240_v1, %v3950_v18  ;;  %s6298_s2 = scalar_lea.vmem %s6297_s3, 4096  ;;  %p6299_p5 = scmp.lt.s32.totalorder %s8365_s19, %s6297_s3 }
 0xa9b   : > { %v3989_v46 = vadd.f32 %v3973_v57, %v8531_v63  ;;  %p6300_p7 = scmp.lt.s32.totalorder %s6298_s2, %s6292_s4 }
 0xa9c   : > { %v4012_v28 = vpack.c.bf16 %v4003_v10, %v4002_v23  ;;  %v3988_v13 = vadd.f32 %v3972_v16, %v8532_v15 }
 0xa9d   : > { %v4005_v7 = vmax.f32 %v3989_v46, 0.0  ;;  %p6301_p6 = por %p6300_p7, %p6299_p5 }
 0xa9e   : > { %v4004_v4 = vmax.f32 %v3988_v13, 0.0  ;;  %5334 = vmatmul.mubr.msk.bf16.gmra.mrb[96].mxu0 %vm2064_vm0, %v4011_v14 }
 0xa9f   : > { %5337 = vmatprep.mubr.msk.bf16.mxu0 %vm2064_vm0, %v4012_v28  ;;  %p6302_p9 = pnand %p6301_p6, %p6295_p0 }
 0xaa0   : > { %v4013_v6 = vpack.c.bf16 %v4005_v7, %v4004_v4 }
 0xaa6   : > { %5338 = vmatmul.mubr.msk.bf16.gmra.mrb[100].mxu0 %vm2064_vm0, %v4013_v6 }
 0xb61   : > { %v5327_v1 = vpop.f32.mrb[88].mxu0 }
 0xb62   : > { %v4120_v30 = vadd.f32 %v5327_v1, %v4600_v0  ;;  %v4111_v54 = vpop.f32.mrb[89].mxu0 }
 0xb63   : > { %v4112_v61 = vadd.f32 %v4600_v0, %v4111_v54  ;;  %v5328_v32 = vpop.f32.mrb[90].mxu0 }
 0xb64   : > { %4176 = vst [vmem:[%s8343_s1 + $0x10] sm:$0xff] %v4120_v30  ;;  %v4123_v52 = vadd.f32 %v5328_v32, %v4600_v0  ;;  %v4114_v34 = vpop.f32.mrb[91].mxu0 }
 0xb65   : > { %4174 = vst [vmem:[%s8343_s1] sm:$0xff] %v4112_v61  ;;  %v4115_v39 = vadd.f32 %v4600_v0, %v4114_v34 }
 0xb66   : > { %4177 = vst [vmem:[%s8343_s1 + $0x18] sm:$0xff] %v4123_v52 }
 0xb67   : > { %4175 = vst [vmem:[%s8343_s1 + $0x8] sm:$0xff] %v4115_v39 }
 0xb69   : > { %v5331_v12 = vpop.f32.mrb[92].mxu0 }
 0xb6a   : > { %v4136_v60 = vadd.f32 %v5331_v12, %v4600_v0  ;;  %v4127_v50 = vpop.f32.mrb[93].mxu0 }
 0xb6b   : > { %v4128_v40 = vadd.f32 %v4600_v0, %v4127_v50  ;;  %v5332_v58 = vpop.f32.mrb[94].mxu0 }
 0xb6c   : > { %4180 = vst [vmem:[%s8343_s1 + $0x30] sm:$0xff] %v4136_v60  ;;  %v4139_v22 = vadd.f32 %v5332_v58, %v4600_v0  ;;  %v4130_v9 = vpop.f32.mrb[95].mxu0 }
 0xb6d   : > { %4178 = vst [vmem:[%s8343_s1 + $0x20] sm:$0xff] %v4128_v40  ;;  %v4131_v43 = vadd.f32 %v4600_v0, %v4130_v9 }
 0xb6e   : > { %4181 = vst [vmem:[%s8343_s1 + $0x38] sm:$0xff] %v4139_v22 }
 0xb6f   : > { %4179 = vst [vmem:[%s8343_s1 + $0x28] sm:$0xff] %v4131_v43 }
 0xb71   : > { %v5335_v36 = vpop.f32.mrb[96].mxu0 }
 0xb72   : > { %v4152_v31 = vadd.f32 %v5335_v36, %v4600_v0  ;;  %v4143_v33 = vpop.f32.mrb[97].mxu0 }
 0xb73   : > { %v4144_v26 = vadd.f32 %v4600_v0, %v4143_v33  ;;  %v5336_v38 = vpop.f32.mrb[98].mxu0 }
 0xb74   : > { %4184 = vst [vmem:[%s8343_s1 + $0x50] sm:$0xff] %v4152_v31  ;;  %v4155_v62 = vadd.f32 %v5336_v38, %v4600_v0  ;;  %v4146_v35 = vpop.f32.mrb[99].mxu0 }
 0xb75   : > { %4182 = vst [vmem:[%s8343_s1 + $0x40] sm:$0xff] %v4144_v26  ;;  %v4147_v29 = vadd.f32 %v4600_v0, %v4146_v35 }
 0xb76   : > { %4185 = vst [vmem:[%s8343_s1 + $0x58] sm:$0xff] %v4155_v62 }
 0xb77   : > { %4183 = vst [vmem:[%s8343_s1 + $0x48] sm:$0xff] %v4147_v29 }
 0xb79   : > { %v5339_v48 = vpop.f32.mrb[100].mxu0 }
 0xb7a   : > { %v4168_v44 = vadd.f32 %v5339_v48, %v4600_v0  ;;  %v4159_v19 = vpop.f32.mrb[101].mxu0 }
 0xb7b   : > { %v4160_v41 = vadd.f32 %v4600_v0, %v4159_v19  ;;  %v5340_v25 = vpop.f32.mrb[102].mxu0 }
 0xb7c   : > { %4188 = vst [vmem:[%s8343_s1 + $0x70] sm:$0xff] %v4168_v44  ;;  %v4171_v47 = vadd.f32 %v5340_v25, %v4600_v0  ;;  %v4162_v56 = vpop.f32.mrb[103].mxu0 }
 0xb7d   : > { %4186 = vst [vmem:[%s8343_s1 + $0x60] sm:$0xff] %v4160_v41  ;;  %v4163_v2 = vadd.f32 %v4600_v0, %v4162_v56 }
 0xb7e   : > { %4189 = vst [vmem:[%s8343_s1 + $0x78] sm:$0xff] %v4171_v47 }
 0xb7f   : > { %4187 = vst [vmem:[%s8343_s1 + $0x68] sm:$0xff] %v4163_v2 }
 0xb80   : > { %6305 = shalt.err (!%p6302_p9)
}
 0xb81   : > { %s6306_s1 = scalar_lea.hbm %s8363_s6, 2048  ;;  %s6310_s7 = scalar_lea.hbm %s8535_s9, 4096 }
 0xb82   : > { %p6307_p4 = scmp.ne.s32.totalorder %s8363_s6, %s6306_s1  ;;  %p6311_p3 = scmp.lt.u32.totalorder %s8363_s6, %s8535_s9 }
 0xb83   : > { %p6312_p2 = scmp.lt.u32.totalorder %s6310_s7, %s6306_s1  ;;  %p6314_p10 = scmp.lt.u32.totalorder %s6306_s1, %s8363_s6 }
 0xb84   : > { %p6308_p13 = pnand %p6307_p4, %p8536_p11 }
 0xb85   : > { %p6313_p8 = por %p6312_p2, %p6311_p3 }
 0xb86   : > { %p6309_p1 = pneg %p6308_p13 }
 0xb87   : > { %p6315_p12 = por %p6314_p10, %p6313_p8 }
 0xb89   : > { %p6316_p0 = pnand %p6315_p12, %p6309_p1 }
 0xb8b   : > { %6319 = shalt.err (!%p6316_p0)
}
 0xb8c   : > { %s6408_s4 = smov 128   ;;  %s6409_s2 = smov 8  }
 0xb8d   : > { %s8537_s10 = scalar_lea.sflag [#allocation4], %s6962_s22 }
 0xb8e   : > { %5551 = dma.vmem_to_hbm [thread:$0]  (%p8536_p11), %s8365_s19, 2048, %s8363_s6, %s8537_s10, %s6408_s4, %s6408_s4, %s6409_s2  }
 0xb8f PF: > { %s8538_s5 = sld [smem:[#allocation36_spill]]  ;;  %p8539_p5 = scmp.ne.s32.totalorder %s8497_s0, 0 }
 0xb90   : > { %p8540_p7 = scmp.ge.s32.totalorder %s6386_s25, 2 }
 0xb92   : > { %p5601_p6 = pnand %p8540_p7, %p8539_p5 }
 0xb95   : > { %s4219_s8 = sand.u32 1, %s8538_s5  }
 0xb96   : > { %s4220_s1 = scalar_lea.sflag [#allocation4], %s4219_s8 }
 0xb97   : > { %6369 = dma.done.wait (!%p5601_p6), %s4220_s1, 2048  }
 0xb98   : > { %6371 = vsyncadd (!%p5601_p6), %s4220_s1, 4294965248  ;;  %p43_p9 = scmp.ge.s32.totalorder %s6883_s27, 4   ;;  %s8541_s4 = smov %s6378_s30 }
 0xb99   : > { %s8542_s30 = smov %s6382_s24  ;;  %s8543_s24 = smov %s6894_s28 }
 0xb9a   : > { %s8544_s25 = smov %s6883_s27  ;;  %45 = sbr.rel (!%p43_p9) target bundleno = 29 (0x1d), region = 213 }
 0xba1   :  { %4225 = vsyncpa [#allocation3], 1 }
 0xba2   :  { %4227 = vsyncpa [#allocation3 + $0x1], 1 }
 0xba3   :  { %4228 = vsyncpa [#allocation6], 1 }
 0xba4   :  { %4229 = vsyncpa [#allocation9], 1 }
 0xba5   :  { %4230 = vsyncpa [#allocation12], 1 }
 0xba6   :  { %4231 = vsyncpa [#allocation15], 1 }
 0xba7   :  { %4232 = vsyncpa [#allocation18], 1 }
 0xba8   :  { %4233 = vsyncpa [#allocation21], 1 }
 0xba9   :  { %4234 = vsyncpa [#allocation24], 1 }
 0xbaa   :  { %4235 = vsyncpa [#allocation4], 1 }
 0xbab   :  { %4237 = vsyncpa [#allocation4 + $0x1], 1 }

</bundles_post_ra>
